<compile_context>
chip_gen: v6e
topology: v6e:2x2x1
jax: 0.10.0
libtpu: 0.0.40
codegen_flags: <defaults>
</compile_context>

<pallas_src>
import functools

import jax
import jax.numpy as jnp
from jax import lax
from jax.experimental import pallas as pl
from jax.experimental.pallas import tpu as pltpu


def _round_up(x, m):
    return (x + m - 1) // m * m


def _choose_tile_rows(H, W, max_pixels):
    """Largest TH dividing H with TH*W <= max_pixels and TH*W % 8 == 0."""
    best = None
    for th in range(1, H + 1):
        if H % th:
            continue
        if th != H and (th * W) % 8 != 0:
            continue
        if th * W <= max_pixels:
            best = th
    if best is None:
        for th in range(1, H + 1):
            if H % th == 0 and (th == H or (th * W) % 8 == 0):
                best = th
                break
    return best


def _bottleneck_kernel(x_ref, halo_ref, w1_ref, s1_ref, b1_ref,
                       w2_ref, s2_ref, b2_ref, w3_ref, s3_ref, b3_ref,
                       o_ref, *, TH, W, Pp, Cp):
    bf16 = jnp.bfloat16
    R = TH * W                              # pixels in this row-tile
    t_idx = pl.program_id(1)
    nt = pl.num_programs(1)

    x = x_ref[0]                            # (R, Cp)  f32, lane-dense
    halo = halo_ref[0, 0]                   # (2W, Cp) f32: row above / row below

    # ---- conv1 (1x1) + bn1 + relu  (tile rows + the 2 halo rows) ----
    w1 = w1_ref[...]
    s1 = s1_ref[...]
    b1 = b1_ref[...]
    h1_mid = jnp.dot(x.astype(bf16), w1, preferred_element_type=jnp.float32)
    h1_mid = jnp.maximum(h1_mid * s1 + b1, 0.0)                    # (R, Pp)
    h1_hal = jnp.dot(halo.astype(bf16), w1, preferred_element_type=jnp.float32)
    h1_hal = jnp.maximum(h1_hal * s1 + b1, 0.0)                    # (2W, Pp)

    # conv2's SAME padding must see zeros (not bn1(conv1(0))) outside the image:
    # zero the halo rows when this tile touches the image top / bottom.
    top_keep = (t_idx > 0).astype(jnp.float32)
    bot_keep = (t_idx + 1 < nt).astype(jnp.float32)
    h1_ext = jnp.concatenate(
        [h1_hal[:W] * top_keep, h1_mid, h1_hal[W:] * bot_keep], axis=0)  # ((TH+2)W, Pp)

    # ---- conv2 (3x3, pad=1): 9 per-tap accumulating matmuls, no im2col slab ----
    # x-edge masks hoisted out of the tap loop; applied to the packed bf16 taps.
    col = lax.broadcasted_iota(jnp.int32, (R, 1), 0) % W
    mask_l = jnp.where(col >= 1, 1.0, 0.0).astype(bf16)        # dx = -1
    mask_r = jnp.where(col <= W - 2, 1.0, 0.0).astype(bf16)    # dx = +1

    acc = jnp.zeros((R, Pp), jnp.float32)
    for dy in (-1, 0, 1):
        base = h1_ext[(1 + dy) * W:(1 + dy) * W + R]           # aligned slice
        for dx in (-1, 0, 1):
            if dx == 0:
                tap = base.astype(bf16)
            else:
                # sublane rotate on the XLU; the single wrapped row lands on an
                # x-edge pixel and is zeroed by the mask.
                tap = pltpu.roll(base, (-dx) % R, 0).astype(bf16)
                tap = tap * (mask_l if dx == -1 else mask_r)
            k = (dy + 1) * 3 + (dx + 1)
            acc += jnp.dot(tap, w2_ref[k], preferred_element_type=jnp.float32)

    h2 = jnp.maximum(acc * s2_ref[...] + b2_ref[...], 0.0)     # (R, Pp)

    # ---- conv3 (1x1) + bn3 + residual + relu ----
    h3 = jnp.dot(h2.astype(bf16), w3_ref[...], preferred_element_type=jnp.float32)
    h3 = h3 * s3_ref[...] + b3_ref[...]
    o_ref[0] = jnp.maximum(h3 + x, 0.0)


def bottleneck_pallas(x_nhwc, params, *, max_tile_pixels=2048):
    """x_nhwc: (N, H, W, C) float32 with C == 4*planes.  Returns (N, H, W, C)."""
    N, H, W, C = x_nhwc.shape
    P = params["w1"].shape[1]
    assert C == 4 * P, "no-downsample Bottleneck requires inplanes == 4*planes"

    Cp = _round_up(C, 128)
    Pp = _round_up(P, 128)
    HW = H * W
    bf16 = jnp.bfloat16

    TH = _choose_tile_rows(H, W, max_tile_pixels)
    nt = H // TH

    # ---- activations: lane-dense (N, HW, Cp); skip pad when already aligned ----
    if Cp == C:
        x4 = x_nhwc.astype(jnp.float32)
    else:
        x4 = jnp.pad(x_nhwc.astype(jnp.float32),
                     ((0, 0), (0, 0), (0, 0), (0, Cp - C)))
    x2d = x4.reshape(N, HW, Cp)

    # ---- halo rows: one image row above / below each tile, zero at borders ----
    zrow = jnp.zeros((N, 1, W, Cp), jnp.float32)
    if nt > 1:
        above = x4[:, TH - 1::TH][:, :nt - 1]       # rows t*TH - 1, t = 1..nt-1
        below = x4[:, TH::TH][:, :nt - 1]           # rows (t+1)*TH, t = 0..nt-2
        top = jnp.concatenate([zrow, above], axis=1)
        bot = jnp.concatenate([below, zrow], axis=1)
    else:
        top, bot = zrow, zrow
    halo = jnp.concatenate([top, bot], axis=2)      # (N, nt, 2*W, Cp)

    # ---- padded / bf16 weights, folded BN scale+bias ----
    w1 = jnp.pad(params["w1"], ((0, Cp - C), (0, Pp - P))).astype(bf16)
    w2 = jnp.pad(params["w2"], ((0, 0), (0, Pp - P), (0, Pp - P))).astype(bf16)
    w3 = jnp.pad(params["w3"], ((0, Pp - P), (0, Cp - C))).astype(bf16)
    s1 = jnp.pad(params["s1"], ((0, 0), (0, Pp - P)))
    b1 = jnp.pad(params["b1"], ((0, 0), (0, Pp - P)))
    s2 = jnp.pad(params["s2"], ((0, 0), (0, Pp - P)))
    b2 = jnp.pad(params["b2"], ((0, 0), (0, Pp - P)))
    s3 = jnp.pad(params["s3"], ((0, 0), (0, Cp - C)))
    b3 = jnp.pad(params["b3"], ((0, 0), (0, Cp - C)))

    kernel = functools.partial(_bottleneck_kernel, TH=TH, W=W, Pp=Pp, Cp=Cp)

    flops = 2 * N * HW * (Cp * Pp + 9 * Pp * Pp + Pp * Cp)
    bytes_accessed = ((x2d.size + halo.size + N * HW * Cp) * 4
                      + (w1.size + w2.size + w3.size) * 2
                      + (s1.size + b1.size + s2.size + b2.size
                         + s3.size + b3.size) * 4)
    cost = pl.CostEstimate(flops=int(flops), transcendentals=0,
                           bytes_accessed=int(bytes_accessed))

    def build(weight_mode):
        def wspec(shape):
            idx = lambda n, t: (0,) * len(shape)
            if weight_mode is None:
                return pl.BlockSpec(shape, idx)
            return pl.BlockSpec(shape, idx, pipeline_mode=weight_mode)

        grid_spec = pltpu.PrefetchScalarGridSpec(
            num_scalar_prefetch=0,
            grid=(N, nt),
            in_specs=[
                pl.BlockSpec((1, TH * W, Cp), lambda n, t: (n, t, 0)),     # x tile
                pl.BlockSpec((1, 1, 2 * W, Cp), lambda n, t: (n, t, 0, 0)),  # halo
                wspec((Cp, Pp)), wspec((1, Pp)), wspec((1, Pp)),           # conv1/bn1
                wspec((9, Pp, Pp)), wspec((1, Pp)), wspec((1, Pp)),        # conv2/bn2
                wspec((Pp, Cp)), wspec((1, Cp)), wspec((1, Cp)),           # conv3/bn3
            ],
            out_specs=pl.BlockSpec((1, TH * W, Cp), lambda n, t: (n, t, 0)),
        )
        return pl.pallas_call(
            kernel,
            out_shape=jax.ShapeDtypeStruct((N, HW, Cp), jnp.float32),
            grid_spec=grid_spec,
            compiler_params=pltpu.CompilerParams(
                dimension_semantics=("parallel", "parallel"),
                vmem_limit_bytes=32 * 1024 * 1024),
            cost_estimate=cost)

    args = (x2d, halo, w1, s1, b1, w2, s2, b2, w3, s3, b3)
    try:
        # Constant-index weights: request single buffering (saves VMEM on v7x).
        out2d = build(pl.Buffered(1))(*args)
    except Exception:
        # pipeline_mode=Buffered(1) unsupported on this JAX version -> default.
        out2d = build(None)(*args)

    out = out2d.reshape(N, H, W, Cp)
    return out[..., :C] if Cp != C else out


def _fold_bn(gamma, beta, mean, var, eps=1e-5):
    scale = gamma / jnp.sqrt(var + eps)
    bias = beta - mean * scale
    return scale[None, :], bias[None, :]


def make_params(key, inplanes, planes):
    """Deterministic synthetic parameters (shapes match the nn.Module)."""
    ks = jax.random.split(key, 6)
    C, P = inplanes, planes
    # conv weights stored as (Cin, Cout) / (k*k, Cin, Cout) for the kernel
    w1 = jax.random.normal(ks[0], (C, P), jnp.float32) / jnp.sqrt(C)
    w2 = jax.random.normal(ks[1], (9, P, P), jnp.float32) / jnp.sqrt(9 * P)
    w3 = jax.random.normal(ks[2], (P, 4 * P), jnp.float32) / jnp.sqrt(P)

    def bn(k, n):
        k1, k2, k3 = jax.random.split(k, 3)
        gamma = 1.0 + 0.1 * jax.random.normal(k1, (n,), jnp.float32)
        beta = 0.1 * jax.random.normal(k2, (n,), jnp.float32)
        mean = 0.05 * jax.random.normal(k3, (n,), jnp.float32)
        var = jnp.ones((n,), jnp.float32)
        return _fold_bn(gamma, beta, mean, var)

    s1, b1 = bn(ks[3], P)
    s2, b2 = bn(ks[4], P)
    s3, b3 = bn(ks[5], 4 * P)
    return dict(w1=w1, w2=w2, w3=w3, s1=s1, b1=b1, s2=s2, b2=b2, s3=s3, b3=b3)


def bottleneck_ref(x_nhwc, p):
    """Pure-JAX reference (eval-mode BN folded), same bf16-in / f32-acc math."""
    bf16 = jnp.bfloat16
    P = p["w1"].shape[1]
    h1 = jnp.einsum('nhwc,cp->nhwp', x_nhwc.astype(bf16), p["w1"].astype(bf16),
                    preferred_element_type=jnp.float32)
    h1 = jnp.maximum(h1 * p["s1"][0] + p["b1"][0], 0.0)
    w2_hwio = p["w2"].reshape(3, 3, P, P).astype(bf16)
    h2 = lax.conv_general_dilated(
        h1.astype(bf16), w2_hwio, window_strides=(1, 1), padding='SAME',
        dimension_numbers=('NHWC', 'HWIO', 'NHWC'),
        preferred_element_type=jnp.float32)
    h2 = jnp.maximum(h2 * p["s2"][0] + p["b2"][0], 0.0)
    h3 = jnp.einsum('nhwp,pc->nhwc', h2.astype(bf16), p["w3"].astype(bf16),
                    preferred_element_type=jnp.float32)
    h3 = h3 * p["s3"][0] + p["b3"][0]
    return jnp.maximum(h3 + x_nhwc, 0.0)


if __name__ == "__main__":
    key = jax.random.PRNGKey(0)
    k_x, k_p = jax.random.split(key)

    planes = 4
    inplanes = planes * 4            # downsample=None => residual shapes match
    N, H, W = 2, 16, 16

    x_nchw = jax.random.normal(k_x, (N, inplanes, H, W), jnp.float32)
    x_nhwc = jnp.transpose(x_nchw, (0, 2, 3, 1))   # NCHW -> NHWC for the kernel

    params = make_params(k_p, inplanes, planes)
    ref = bottleneck_ref(x_nhwc, params)

    # Multi-tile path: 4 row-tiles per image -> exercises the 3x3 halo logic.
    out_tiled = jax.block_until_ready(
        bottleneck_pallas(x_nhwc, params, max_tile_pixels=64))
    # Default tile picker (whole image in one step at this small size).
    out_full = jax.block_until_ready(bottleneck_pallas(x_nhwc, params))

    assert out_tiled.shape == (N, H, W, inplanes)
    assert jnp.allclose(out_tiled, ref, atol=2e-3, rtol=2e-3), "tiled mismatch"
    assert jnp.allclose(out_full, ref, atol=2e-3, rtol=2e-3), "full mismatch"

    print("KERNEL_OK")
</pallas_src>

<mosaic_0001>
module attributes {stable_mosaic.version = 11 : i64} {
  func.func @_bottleneck_kernel(%arg0: i32, %arg1: i32, %arg2: memref<1x64x128xf32, #tpu.memory_space<vmem>>, %arg3: memref<1x1x32x128xf32, #tpu.memory_space<vmem>>, %arg4: memref<128x128xbf16, #tpu.memory_space<vmem>>, %arg5: memref<1x128xf32, #tpu.memory_space<vmem>>, %arg6: memref<1x128xf32, #tpu.memory_space<vmem>>, %arg7: memref<9x128x128xbf16, #tpu.memory_space<vmem>>, %arg8: memref<1x128xf32, #tpu.memory_space<vmem>>, %arg9: memref<1x128xf32, #tpu.memory_space<vmem>>, %arg10: memref<128x128xbf16, #tpu.memory_space<vmem>>, %arg11: memref<1x128xf32, #tpu.memory_space<vmem>>, %arg12: memref<1x128xf32, #tpu.memory_space<vmem>>, %arg13: memref<1x64x128xf32, #tpu.memory_space<vmem>>) attributes {dimension_semantics = [#tpu.dimension_semantics<parallel>, #tpu.dimension_semantics<parallel>], iteration_bounds = array<i64: 2, 4>, scalar_prefetch = 0 : i64, scratch_operands = 0 : i64, tpu.core_type = #tpu.core_type<tc>, window_params = [{transform_indices = @transform_0, window_bounds = array<i64: 1, 64, 128>}, {transform_indices = @transform_1, window_bounds = array<i64: 1, 1, 32, 128>}, {pipeline_mode = #tpu.pipeline_mode<synchronous>, transform_indices = @transform_2, window_bounds = array<i64: 128, 128>}, {pipeline_mode = #tpu.pipeline_mode<synchronous>, transform_indices = @transform_3, window_bounds = array<i64: 1, 128>}, {pipeline_mode = #tpu.pipeline_mode<synchronous>, transform_indices = @transform_4, window_bounds = array<i64: 1, 128>}, {pipeline_mode = #tpu.pipeline_mode<synchronous>, transform_indices = @transform_5, window_bounds = array<i64: 9, 128, 128>}, {pipeline_mode = #tpu.pipeline_mode<synchronous>, transform_indices = @transform_6, window_bounds = array<i64: 1, 128>}, {pipeline_mode = #tpu.pipeline_mode<synchronous>, transform_indices = @transform_7, window_bounds = array<i64: 1, 128>}, {pipeline_mode = #tpu.pipeline_mode<synchronous>, transform_indices = @transform_8, window_bounds = array<i64: 128, 128>}, {pipeline_mode = #tpu.pipeline_mode<synchronous>, transform_indices = @transform_9, window_bounds = array<i64: 1, 128>}, {pipeline_mode = #tpu.pipeline_mode<synchronous>, transform_indices = @transform_10, window_bounds = array<i64: 1, 128>}, {transform_indices = @transform_11, window_bounds = array<i64: 1, 64, 128>}]} {
    %c0 = arith.constant 0 : index
    %c0_0 = arith.constant 0 : index
    %c0_1 = arith.constant 0 : index
    %0 = vector.load %arg2[%c0, %c0_0, %c0_1] : memref<1x64x128xf32, #tpu.memory_space<vmem>>, vector<1x64x128xf32>
    %1 = vector.shape_cast %0 : vector<1x64x128xf32> to vector<64x128xf32>
    %c0_2 = arith.constant 0 : index
    %c0_3 = arith.constant 0 : index
    %c0_4 = arith.constant 0 : index
    %c0_5 = arith.constant 0 : index
    %2 = vector.load %arg3[%c0_2, %c0_3, %c0_4, %c0_5] : memref<1x1x32x128xf32, #tpu.memory_space<vmem>>, vector<1x1x32x128xf32>
    %3 = vector.shape_cast %2 : vector<1x1x32x128xf32> to vector<32x128xf32>
    %c0_6 = arith.constant 0 : index
    %c0_7 = arith.constant 0 : index
    %4 = vector.load %arg4[%c0_6, %c0_7] : memref<128x128xbf16, #tpu.memory_space<vmem>>, vector<128x128xbf16>
    %c0_8 = arith.constant 0 : index
    %c0_9 = arith.constant 0 : index
    %5 = vector.load %arg5[%c0_8, %c0_9] : memref<1x128xf32, #tpu.memory_space<vmem>>, vector<1x128xf32>
    %c0_10 = arith.constant 0 : index
    %c0_11 = arith.constant 0 : index
    %6 = vector.load %arg6[%c0_10, %c0_11] : memref<1x128xf32, #tpu.memory_space<vmem>>, vector<1x128xf32>
    %7 = arith.truncf %1 : vector<64x128xf32> to vector<64x128xbf16>
    %cst = arith.constant dense<0.000000e+00> : vector<64x128xf32>
    %8 = tpu.matmul %7, %4, %cst {dimension_numbers = #tpu.dot_dimension_numbers<[1], [0], [0], [1], [0, 0, 1, 1], [], []>} : vector<64x128xbf16>, vector<128x128xbf16>, vector<64x128xf32> -> vector<64x128xf32>
    %9 = vector.broadcast %5 : vector<1x128xf32> to vector<64x128xf32>
    %10 = arith.mulf %8, %9 : vector<64x128xf32>
    %11 = vector.broadcast %6 : vector<1x128xf32> to vector<64x128xf32>
    %12 = arith.addf %10, %11 : vector<64x128xf32>
    %cst_12 = arith.constant 0.000000e+00 : f32
    %13 = vector.broadcast %cst_12 : f32 to vector<64x128xf32>
    %14 = arith.maximumf %12, %13 : vector<64x128xf32>
    %15 = arith.truncf %3 : vector<32x128xf32> to vector<32x128xbf16>
    %cst_13 = arith.constant dense<0.000000e+00> : vector<32x128xf32>
    %16 = tpu.matmul %15, %4, %cst_13 {dimension_numbers = #tpu.dot_dimension_numbers<[1], [0], [0], [1], [0, 0, 1, 1], [], []>} : vector<32x128xbf16>, vector<128x128xbf16>, vector<32x128xf32> -> vector<32x128xf32>
    %17 = vector.broadcast %5 : vector<1x128xf32> to vector<32x128xf32>
    %18 = arith.mulf %16, %17 : vector<32x128xf32>
    %19 = vector.broadcast %6 : vector<1x128xf32> to vector<32x128xf32>
    %20 = arith.addf %18, %19 : vector<32x128xf32>
    %cst_14 = arith.constant 0.000000e+00 : f32
    %21 = vector.broadcast %cst_14 : f32 to vector<32x128xf32>
    %22 = arith.maximumf %20, %21 : vector<32x128xf32>
    %c0_i32 = arith.constant 0 : i32
    %23 = arith.cmpi sgt, %arg1, %c0_i32 : i32
    %24 = arith.extui %23 : i1 to i32
    %25 = arith.sitofp %24 : i32 to f32
    %c1_i32 = arith.constant 1 : i32
    %26 = arith.addi %arg1, %c1_i32 : i32
    %c4_i32 = arith.constant 4 : i32
    %27 = arith.cmpi slt, %26, %c4_i32 : i32
    %28 = arith.extui %27 : i1 to i32
    %29 = arith.sitofp %28 : i32 to f32
    %30 = vector.extract_strided_slice %22 {offsets = [0, 0], sizes = [16, 128], strides = [1, 1]} : vector<32x128xf32> to vector<16x128xf32>
    %31 = vector.broadcast %25 : f32 to vector<16x128xf32>
    %32 = arith.mulf %30, %31 : vector<16x128xf32>
    %33 = vector.extract_strided_slice %22 {offsets = [16, 0], sizes = [16, 128], strides = [1, 1]} : vector<32x128xf32> to vector<16x128xf32>
    %34 = vector.broadcast %29 : f32 to vector<16x128xf32>
    %35 = arith.mulf %33, %34 : vector<16x128xf32>
    %36 = tpu.concatenate %32, %14, %35 in 0 : vector<16x128xf32>, vector<64x128xf32>, vector<16x128xf32> -> vector<96x128xf32>
    %37 = tpu.iota {dimensions = array<i32: 0>} : vector<64x1xi32>
    %c16_i32 = arith.constant 16 : i32
    %c0_i32_15 = arith.constant 0 : i32
    %38 = arith.cmpi eq, %c16_i32, %c0_i32_15 : i32
    %c1_i32_16 = arith.constant 1 : i32
    %39 = arith.select %38, %c1_i32_16, %c16_i32 : i32
    %40 = vector.broadcast %39 : i32 to vector<64x1xi32>
    %41 = arith.remsi %37, %40 : vector<64x1xi32>
    %c0_i32_17 = arith.constant 0 : i32
    %42 = vector.broadcast %c0_i32_17 : i32 to vector<64x1xi32>
    %43 = arith.cmpi ne, %41, %42 : vector<64x1xi32>
    %c0_i32_18 = arith.constant 0 : i32
    %44 = vector.broadcast %c0_i32_18 : i32 to vector<64x1xi32>
    %45 = arith.cmpi slt, %41, %44 : vector<64x1xi32>
    %c0_i32_19 = arith.constant 0 : i32
    %46 = arith.cmpi slt, %39, %c0_i32_19 : i32
    %47 = vector.broadcast %46 : i1 to vector<64x1xi1>
    %48 = vector.broadcast %47 : vector<64x1xi1> to vector<64x1xi1>
    %49 = arith.xori %45, %48 : vector<64x1xi1>
    %50 = arith.andi %49, %43 : vector<64x1xi1>
    %51 = vector.broadcast %39 : i32 to vector<64x1xi32>
    %52 = arith.addi %41, %51 : vector<64x1xi32>
    %53 = arith.select %50, %52, %41 : vector<64x1xi1>, vector<64x1xi32>
    %c1_i32_20 = arith.constant 1 : i32
    %54 = vector.broadcast %c1_i32_20 : i32 to vector<64x1xi32>
    %55 = arith.cmpi sge, %53, %54 : vector<64x1xi32>
    %cst_21 = arith.constant 1.000000e+00 : f32
    %cst_22 = arith.constant 0.000000e+00 : f32
    %56 = vector.broadcast %cst_21 : f32 to vector<64x1xf32>
    %57 = vector.broadcast %cst_22 : f32 to vector<64x1xf32>
    %58 = arith.select %55, %56, %57 : vector<64x1xi1>, vector<64x1xf32>
    %59 = arith.truncf %58 : vector<64x1xf32> to vector<64x1xbf16>
    %c14_i32 = arith.constant 14 : i32
    %60 = vector.broadcast %c14_i32 : i32 to vector<64x1xi32>
    %61 = arith.cmpi sle, %53, %60 : vector<64x1xi32>
    %cst_23 = arith.constant 1.000000e+00 : f32
    %cst_24 = arith.constant 0.000000e+00 : f32
    %62 = vector.broadcast %cst_23 : f32 to vector<64x1xf32>
    %63 = vector.broadcast %cst_24 : f32 to vector<64x1xf32>
    %64 = arith.select %61, %62, %63 : vector<64x1xi1>, vector<64x1xf32>
    %65 = arith.truncf %64 : vector<64x1xf32> to vector<64x1xbf16>
    %cst_25 = arith.constant 0.000000e+00 : f32
    %66 = vector.broadcast %cst_25 : f32 to vector<64x128xf32>
    %67 = vector.extract_strided_slice %36 {offsets = [0, 0], sizes = [64, 128], strides = [1, 1]} : vector<96x128xf32> to vector<64x128xf32>
    %c1_i32_26 = arith.constant 1 : i32
    %68 = tpu.dynamic_rotate %67 by %c1_i32_26 dim 0 : vector<64x128xf32>, i32 -> vector<64x128xf32>
    %69 = arith.truncf %68 : vector<64x128xf32> to vector<64x128xbf16>
    %70 = vector.broadcast %59 : vector<64x1xbf16> to vector<64x128xbf16>
    %71 = arith.mulf %69, %70 : vector<64x128xbf16>
    %c0_27 = arith.constant 0 : index
    %c0_28 = arith.constant 0 : index
    %c0_29 = arith.constant 0 : index
    %72 = vector.load %arg7[%c0_27, %c0_28, %c0_29] : memref<9x128x128xbf16, #tpu.memory_space<vmem>>, vector<1x128x128xbf16>
    %73 = vector.shape_cast %72 : vector<1x128x128xbf16> to vector<128x128xbf16>
    %cst_30 = arith.constant dense<0.000000e+00> : vector<64x128xf32>
    %74 = tpu.matmul %71, %73, %cst_30 {dimension_numbers = #tpu.dot_dimension_numbers<[1], [0], [0], [1], [0, 0, 1, 1], [], []>} : vector<64x128xbf16>, vector<128x128xbf16>, vector<64x128xf32> -> vector<64x128xf32>
    %75 = arith.addf %66, %74 : vector<64x128xf32>
    %76 = arith.truncf %67 : vector<64x128xf32> to vector<64x128xbf16>
    %c1 = arith.constant 1 : index
    %c0_31 = arith.constant 0 : index
    %c0_32 = arith.constant 0 : index
    %77 = vector.load %arg7[%c1, %c0_31, %c0_32] : memref<9x128x128xbf16, #tpu.memory_space<vmem>>, vector<1x128x128xbf16>
    %78 = vector.shape_cast %77 : vector<1x128x128xbf16> to vector<128x128xbf16>
    %cst_33 = arith.constant dense<0.000000e+00> : vector<64x128xf32>
    %79 = tpu.matmul %76, %78, %cst_33 {dimension_numbers = #tpu.dot_dimension_numbers<[1], [0], [0], [1], [0, 0, 1, 1], [], []>} : vector<64x128xbf16>, vector<128x128xbf16>, vector<64x128xf32> -> vector<64x128xf32>
    %80 = arith.addf %75, %79 : vector<64x128xf32>
    %c63_i32 = arith.constant 63 : i32
    %81 = tpu.dynamic_rotate %67 by %c63_i32 dim 0 : vector<64x128xf32>, i32 -> vector<64x128xf32>
    %82 = arith.truncf %81 : vector<64x128xf32> to vector<64x128xbf16>
    %83 = vector.broadcast %65 : vector<64x1xbf16> to vector<64x128xbf16>
    %84 = arith.mulf %82, %83 : vector<64x128xbf16>
    %c2 = arith.constant 2 : index
    %c0_34 = arith.constant 0 : index
    %c0_35 = arith.constant 0 : index
    %85 = vector.load %arg7[%c2, %c0_34, %c0_35] : memref<9x128x128xbf16, #tpu.memory_space<vmem>>, vector<1x128x128xbf16>
    %86 = vector.shape_cast %85 : vector<1x128x128xbf16> to vector<128x128xbf16>
    %cst_36 = arith.constant dense<0.000000e+00> : vector<64x128xf32>
    %87 = tpu.matmul %84, %86, %cst_36 {dimension_numbers = #tpu.dot_dimension_numbers<[1], [0], [0], [1], [0, 0, 1, 1], [], []>} : vector<64x128xbf16>, vector<128x128xbf16>, vector<64x128xf32> -> vector<64x128xf32>
    %88 = arith.addf %80, %87 : vector<64x128xf32>
    %89 = vector.extract_strided_slice %36 {offsets = [16, 0], sizes = [64, 128], strides = [1, 1]} : vector<96x128xf32> to vector<64x128xf32>
    %c1_i32_37 = arith.constant 1 : i32
    %90 = tpu.dynamic_rotate %89 by %c1_i32_37 dim 0 : vector<64x128xf32>, i32 -> vector<64x128xf32>
    %91 = arith.truncf %90 : vector<64x128xf32> to vector<64x128xbf16>
    %92 = vector.broadcast %59 : vector<64x1xbf16> to vector<64x128xbf16>
    %93 = arith.mulf %91, %92 : vector<64x128xbf16>
    %c3 = arith.constant 3 : index
    %c0_38 = arith.constant 0 : index
    %c0_39 = arith.constant 0 : index
    %94 = vector.load %arg7[%c3, %c0_38, %c0_39] : memref<9x128x128xbf16, #tpu.memory_space<vmem>>, vector<1x128x128xbf16>
    %95 = vector.shape_cast %94 : vector<1x128x128xbf16> to vector<128x128xbf16>
    %cst_40 = arith.constant dense<0.000000e+00> : vector<64x128xf32>
    %96 = tpu.matmul %93, %95, %cst_40 {dimension_numbers = #tpu.dot_dimension_numbers<[1], [0], [0], [1], [0, 0, 1, 1], [], []>} : vector<64x128xbf16>, vector<128x128xbf16>, vector<64x128xf32> -> vector<64x128xf32>
    %97 = arith.addf %88, %96 : vector<64x128xf32>
    %98 = arith.truncf %89 : vector<64x128xf32> to vector<64x128xbf16>
    %c4 = arith.constant 4 : index
    %c0_41 = arith.constant 0 : index
    %c0_42 = arith.constant 0 : index
    %99 = vector.load %arg7[%c4, %c0_41, %c0_42] : memref<9x128x128xbf16, #tpu.memory_space<vmem>>, vector<1x128x128xbf16>
    %100 = vector.shape_cast %99 : vector<1x128x128xbf16> to vector<128x128xbf16>
    %cst_43 = arith.constant dense<0.000000e+00> : vector<64x128xf32>
    %101 = tpu.matmul %98, %100, %cst_43 {dimension_numbers = #tpu.dot_dimension_numbers<[1], [0], [0], [1], [0, 0, 1, 1], [], []>} : vector<64x128xbf16>, vector<128x128xbf16>, vector<64x128xf32> -> vector<64x128xf32>
    %102 = arith.addf %97, %101 : vector<64x128xf32>
    %c63_i32_44 = arith.constant 63 : i32
    %103 = tpu.dynamic_rotate %89 by %c63_i32_44 dim 0 : vector<64x128xf32>, i32 -> vector<64x128xf32>
    %104 = arith.truncf %103 : vector<64x128xf32> to vector<64x128xbf16>
    %105 = vector.broadcast %65 : vector<64x1xbf16> to vector<64x128xbf16>
    %106 = arith.mulf %104, %105 : vector<64x128xbf16>
    %c5 = arith.constant 5 : index
    %c0_45 = arith.constant 0 : index
    %c0_46 = arith.constant 0 : index
    %107 = vector.load %arg7[%c5, %c0_45, %c0_46] : memref<9x128x128xbf16, #tpu.memory_space<vmem>>, vector<1x128x128xbf16>
    %108 = vector.shape_cast %107 : vector<1x128x128xbf16> to vector<128x128xbf16>
    %cst_47 = arith.constant dense<0.000000e+00> : vector<64x128xf32>
    %109 = tpu.matmul %106, %108, %cst_47 {dimension_numbers = #tpu.dot_dimension_numbers<[1], [0], [0], [1], [0, 0, 1, 1], [], []>} : vector<64x128xbf16>, vector<128x128xbf16>, vector<64x128xf32> -> vector<64x128xf32>
    %110 = arith.addf %102, %109 : vector<64x128xf32>
    %111 = vector.extract_strided_slice %36 {offsets = [32, 0], sizes = [64, 128], strides = [1, 1]} : vector<96x128xf32> to vector<64x128xf32>
    %c1_i32_48 = arith.constant 1 : i32
    %112 = tpu.dynamic_rotate %111 by %c1_i32_48 dim 0 : vector<64x128xf32>, i32 -> vector<64x128xf32>
    %113 = arith.truncf %112 : vector<64x128xf32> to vector<64x128xbf16>
    %114 = vector.broadcast %59 : vector<64x1xbf16> to vector<64x128xbf16>
    %115 = arith.mulf %113, %114 : vector<64x128xbf16>
    %c6 = arith.constant 6 : index
    %c0_49 = arith.constant 0 : index
    %c0_50 = arith.constant 0 : index
    %116 = vector.load %arg7[%c6, %c0_49, %c0_50] : memref<9x128x128xbf16, #tpu.memory_space<vmem>>, vector<1x128x128xbf16>
    %117 = vector.shape_cast %116 : vector<1x128x128xbf16> to vector<128x128xbf16>
    %cst_51 = arith.constant dense<0.000000e+00> : vector<64x128xf32>
    %118 = tpu.matmul %115, %117, %cst_51 {dimension_numbers = #tpu.dot_dimension_numbers<[1], [0], [0], [1], [0, 0, 1, 1], [], []>} : vector<64x128xbf16>, vector<128x128xbf16>, vector<64x128xf32> -> vector<64x128xf32>
    %119 = arith.addf %110, %118 : vector<64x128xf32>
    %120 = arith.truncf %111 : vector<64x128xf32> to vector<64x128xbf16>
    %c7 = arith.constant 7 : index
    %c0_52 = arith.constant 0 : index
    %c0_53 = arith.constant 0 : index
    %121 = vector.load %arg7[%c7, %c0_52, %c0_53] : memref<9x128x128xbf16, #tpu.memory_space<vmem>>, vector<1x128x128xbf16>
    %122 = vector.shape_cast %121 : vector<1x128x128xbf16> to vector<128x128xbf16>
    %cst_54 = arith.constant dense<0.000000e+00> : vector<64x128xf32>
    %123 = tpu.matmul %120, %122, %cst_54 {dimension_numbers = #tpu.dot_dimension_numbers<[1], [0], [0], [1], [0, 0, 1, 1], [], []>} : vector<64x128xbf16>, vector<128x128xbf16>, vector<64x128xf32> -> vector<64x128xf32>
    %124 = arith.addf %119, %123 : vector<64x128xf32>
    %c63_i32_55 = arith.constant 63 : i32
    %125 = tpu.dynamic_rotate %111 by %c63_i32_55 dim 0 : vector<64x128xf32>, i32 -> vector<64x128xf32>
    %126 = arith.truncf %125 : vector<64x128xf32> to vector<64x128xbf16>
    %127 = vector.broadcast %65 : vector<64x1xbf16> to vector<64x128xbf16>
    %128 = arith.mulf %126, %127 : vector<64x128xbf16>
    %c8 = arith.constant 8 : index
    %c0_56 = arith.constant 0 : index
    %c0_57 = arith.constant 0 : index
    %129 = vector.load %arg7[%c8, %c0_56, %c0_57] : memref<9x128x128xbf16, #tpu.memory_space<vmem>>, vector<1x128x128xbf16>
    %130 = vector.shape_cast %129 : vector<1x128x128xbf16> to vector<128x128xbf16>
    %cst_58 = arith.constant dense<0.000000e+00> : vector<64x128xf32>
    %131 = tpu.matmul %128, %130, %cst_58 {dimension_numbers = #tpu.dot_dimension_numbers<[1], [0], [0], [1], [0, 0, 1, 1], [], []>} : vector<64x128xbf16>, vector<128x128xbf16>, vector<64x128xf32> -> vector<64x128xf32>
    %132 = arith.addf %124, %131 : vector<64x128xf32>
    %c0_59 = arith.constant 0 : index
    %c0_60 = arith.constant 0 : index
    %133 = vector.load %arg8[%c0_59, %c0_60] : memref<1x128xf32, #tpu.memory_space<vmem>>, vector<1x128xf32>
    %134 = vector.broadcast %133 : vector<1x128xf32> to vector<64x128xf32>
    %135 = arith.mulf %132, %134 : vector<64x128xf32>
    %c0_61 = arith.constant 0 : index
    %c0_62 = arith.constant 0 : index
    %136 = vector.load %arg9[%c0_61, %c0_62] : memref<1x128xf32, #tpu.memory_space<vmem>>, vector<1x128xf32>
    %137 = vector.broadcast %136 : vector<1x128xf32> to vector<64x128xf32>
    %138 = arith.addf %135, %137 : vector<64x128xf32>
    %cst_63 = arith.constant 0.000000e+00 : f32
    %139 = vector.broadcast %cst_63 : f32 to vector<64x128xf32>
    %140 = arith.maximumf %138, %139 : vector<64x128xf32>
    %141 = arith.truncf %140 : vector<64x128xf32> to vector<64x128xbf16>
    %c0_64 = arith.constant 0 : index
    %c0_65 = arith.constant 0 : index
    %142 = vector.load %arg10[%c0_64, %c0_65] : memref<128x128xbf16, #tpu.memory_space<vmem>>, vector<128x128xbf16>
    %cst_66 = arith.constant dense<0.000000e+00> : vector<64x128xf32>
    %143 = tpu.matmul %141, %142, %cst_66 {dimension_numbers = #tpu.dot_dimension_numbers<[1], [0], [0], [1], [0, 0, 1, 1], [], []>} : vector<64x128xbf16>, vector<128x128xbf16>, vector<64x128xf32> -> vector<64x128xf32>
    %c0_67 = arith.constant 0 : index
    %c0_68 = arith.constant 0 : index
    %144 = vector.load %arg11[%c0_67, %c0_68] : memref<1x128xf32, #tpu.memory_space<vmem>>, vector<1x128xf32>
    %145 = vector.broadcast %144 : vector<1x128xf32> to vector<64x128xf32>
    %146 = arith.mulf %143, %145 : vector<64x128xf32>
    %c0_69 = arith.constant 0 : index
    %c0_70 = arith.constant 0 : index
    %147 = vector.load %arg12[%c0_69, %c0_70] : memref<1x128xf32, #tpu.memory_space<vmem>>, vector<1x128xf32>
    %148 = vector.broadcast %147 : vector<1x128xf32> to vector<64x128xf32>
    %149 = arith.addf %146, %148 : vector<64x128xf32>
    %150 = arith.addf %149, %1 : vector<64x128xf32>
    %cst_71 = arith.constant 0.000000e+00 : f32
    %151 = vector.broadcast %cst_71 : f32 to vector<64x128xf32>
    %152 = arith.maximumf %150, %151 : vector<64x128xf32>
    %c0_72 = arith.constant 0 : index
    %c0_73 = arith.constant 0 : index
    %c0_74 = arith.constant 0 : index
    %153 = vector.load %arg13[%c0_72, %c0_73, %c0_74] : memref<1x64x128xf32, #tpu.memory_space<vmem>>, vector<1x64x128xf32>
    %154 = vector.shape_cast %153 : vector<1x64x128xf32> to vector<64x128xf32>
    %155 = vector.shape_cast %152 : vector<64x128xf32> to vector<1x64x128xf32>
    tpu.vector_store %arg13[%c0_72, %c0_73, %c0_74], %155 {strides = array<i32>} : memref<1x64x128xf32, #tpu.memory_space<vmem>>, vector<1x64x128xf32>,
    return
  }
  func.func @transform_0(%arg0: i32, %arg1: i32) -> (i32, i32, i32) {
    %c0_i32 = arith.constant 0 : i32
    %c0_i32_0 = arith.constant 0 : i32
    return %arg0, %arg1, %c0_i32 : i32, i32, i32
  }
  func.func @transform_1(%arg0: i32, %arg1: i32) -> (i32, i32, i32, i32) {
    %c0_i32 = arith.constant 0 : i32
    %c0_i32_0 = arith.constant 0 : i32
    %c0_i32_1 = arith.constant 0 : i32
    return %arg0, %arg1, %c0_i32, %c0_i32_0 : i32, i32, i32, i32
  }
  func.func @transform_2(%arg0: i32, %arg1: i32) -> (i32, i32) {
    %c0_i32 = arith.constant 0 : i32
    %c0_i32_0 = arith.constant 0 : i32
    %c0_i32_1 = arith.constant 0 : i32
    return %c0_i32, %c0_i32_0 : i32, i32
  }
  func.func @transform_3(%arg0: i32, %arg1: i32) -> (i32, i32) {
    %c0_i32 = arith.constant 0 : i32
    %c0_i32_0 = arith.constant 0 : i32
    %c0_i32_1 = arith.constant 0 : i32
    return %c0_i32, %c0_i32_0 : i32, i32
  }
  func.func @transform_4(%arg0: i32, %arg1: i32) -> (i32, i32) {
    %c0_i32 = arith.constant 0 : i32
    %c0_i32_0 = arith.constant 0 : i32
    %c0_i32_1 = arith.constant 0 : i32
    return %c0_i32, %c0_i32_0 : i32, i32
  }
  func.func @transform_5(%arg0: i32, %arg1: i32) -> (i32, i32, i32) {
    %c0_i32 = arith.constant 0 : i32
    %c0_i32_0 = arith.constant 0 : i32
    %c0_i32_1 = arith.constant 0 : i32
    %c0_i32_2 = arith.constant 0 : i32
    return %c0_i32, %c0_i32_0, %c0_i32_1 : i32, i32, i32
  }
  func.func @transform_6(%arg0: i32, %arg1: i32) -> (i32, i32) {
    %c0_i32 = arith.constant 0 : i32
    %c0_i32_0 = arith.constant 0 : i32
    %c0_i32_1 = arith.constant 0 : i32
    return %c0_i32, %c0_i32_0 : i32, i32
  }
  func.func @transform_7(%arg0: i32, %arg1: i32) -> (i32, i32) {
    %c0_i32 = arith.constant 0 : i32
    %c0_i32_0 = arith.constant 0 : i32
    %c0_i32_1 = arith.constant 0 : i32
    return %c0_i32, %c0_i32_0 : i32, i32
  }
  func.func @transform_8(%arg0: i32, %arg1: i32) -> (i32, i32) {
    %c0_i32 = arith.constant 0 : i32
    %c0_i32_0 = arith.constant 0 : i32
    %c0_i32_1 = arith.constant 0 : i32
    return %c0_i32, %c0_i32_0 : i32, i32
  }
  func.func @transform_9(%arg0: i32, %arg1: i32) -> (i32, i32) {
    %c0_i32 = arith.constant 0 : i32
    %c0_i32_0 = arith.constant 0 : i32
    %c0_i32_1 = arith.constant 0 : i32
    return %c0_i32, %c0_i32_0 : i32, i32
  }
  func.func @transform_10(%arg0: i32, %arg1: i32) -> (i32, i32) {
    %c0_i32 = arith.constant 0 : i32
    %c0_i32_0 = arith.constant 0 : i32
    %c0_i32_1 = arith.constant 0 : i32
    return %c0_i32, %c0_i32_0 : i32, i32
  }
  func.func @transform_11(%arg0: i32, %arg1: i32) -> (i32, i32, i32) {
    %c0_i32 = arith.constant 0 : i32
    %c0_i32_0 = arith.constant 0 : i32
    return %arg0, %arg1, %c0_i32 : i32, i32, i32
  }
}

module attributes {stable_mosaic.version = 11 : i64} {
  func.func @_bottleneck_kernel(%arg0: i32, %arg1: i32, %arg2: memref<1x64x128xf32, #tpu.memory_space<vmem>>, %arg3: memref<1x1x32x128xf32, #tpu.memory_space<vmem>>, %arg4: memref<128x128xbf16, #tpu.memory_space<vmem>>, %arg5: memref<1x128xf32, #tpu.memory_space<vmem>>, %arg6: memref<1x128xf32, #tpu.memory_space<vmem>>, %arg7: memref<9x128x128xbf16, #tpu.memory_space<vmem>>, %arg8: memref<1x128xf32, #tpu.memory_space<vmem>>, %arg9: memref<1x128xf32, #tpu.memory_space<vmem>>, %arg10: memref<128x128xbf16, #tpu.memory_space<vmem>>, %arg11: memref<1x128xf32, #tpu.memory_space<vmem>>, %arg12: memref<1x128xf32, #tpu.memory_space<vmem>>, %arg13: memref<1x64x128xf32, #tpu.memory_space<vmem>>) attributes {dimension_semantics = [#tpu.dimension_semantics<parallel>, #tpu.dimension_semantics<parallel>], iteration_bounds = array<i64: 2, 4>, scalar_prefetch = 0 : i64, scratch_operands = 0 : i64, tpu.core_type = #tpu.core_type<tc>, window_params = [{transform_indices = @transform_0, window_bounds = array<i64: 1, 64, 128>}, {transform_indices = @transform_1, window_bounds = array<i64: 1, 1, 32, 128>}, {pipeline_mode = #tpu.pipeline_mode<synchronous>, transform_indices = @transform_2, window_bounds = array<i64: 128, 128>}, {pipeline_mode = #tpu.pipeline_mode<synchronous>, transform_indices = @transform_3, window_bounds = array<i64: 1, 128>}, {pipeline_mode = #tpu.pipeline_mode<synchronous>, transform_indices = @transform_4, window_bounds = array<i64: 1, 128>}, {pipeline_mode = #tpu.pipeline_mode<synchronous>, transform_indices = @transform_5, window_bounds = array<i64: 9, 128, 128>}, {pipeline_mode = #tpu.pipeline_mode<synchronous>, transform_indices = @transform_6, window_bounds = array<i64: 1, 128>}, {pipeline_mode = #tpu.pipeline_mode<synchronous>, transform_indices = @transform_7, window_bounds = array<i64: 1, 128>}, {pipeline_mode = #tpu.pipeline_mode<synchronous>, transform_indices = @transform_8, window_bounds = array<i64: 128, 128>}, {pipeline_mode = #tpu.pipeline_mode<synchronous>, transform_indices = @transform_9, window_bounds = array<i64: 1, 128>}, {pipeline_mode = #tpu.pipeline_mode<synchronous>, transform_indices = @transform_10, window_bounds = array<i64: 1, 128>}, {transform_indices = @transform_11, window_bounds = array<i64: 1, 64, 128>}]} {
    %c0 = arith.constant 0 : index
    %c0_0 = arith.constant 0 : index
    %c0_1 = arith.constant 0 : index
    %0 = vector.load %arg2[%c0, %c0_0, %c0_1] : memref<1x64x128xf32, #tpu.memory_space<vmem>>, vector<1x64x128xf32>
    %1 = vector.shape_cast %0 : vector<1x64x128xf32> to vector<64x128xf32>
    %c0_2 = arith.constant 0 : index
    %c0_3 = arith.constant 0 : index
    %c0_4 = arith.constant 0 : index
    %c0_5 = arith.constant 0 : index
    %2 = vector.load %arg3[%c0_2, %c0_3, %c0_4, %c0_5] : memref<1x1x32x128xf32, #tpu.memory_space<vmem>>, vector<1x1x32x128xf32>
    %3 = vector.shape_cast %2 : vector<1x1x32x128xf32> to vector<32x128xf32>
    %c0_6 = arith.constant 0 : index
    %c0_7 = arith.constant 0 : index
    %4 = vector.load %arg4[%c0_6, %c0_7] : memref<128x128xbf16, #tpu.memory_space<vmem>>, vector<128x128xbf16>
    %c0_8 = arith.constant 0 : index
    %c0_9 = arith.constant 0 : index
    %5 = vector.load %arg5[%c0_8, %c0_9] : memref<1x128xf32, #tpu.memory_space<vmem>>, vector<1x128xf32>
    %c0_10 = arith.constant 0 : index
    %c0_11 = arith.constant 0 : index
    %6 = vector.load %arg6[%c0_10, %c0_11] : memref<1x128xf32, #tpu.memory_space<vmem>>, vector<1x128xf32>
    %7 = arith.truncf %1 : vector<64x128xf32> to vector<64x128xbf16>
    %cst = arith.constant dense<0.000000e+00> : vector<64x128xf32>
    %8 = tpu.matmul %7, %4, %cst {dimension_numbers = #tpu.dot_dimension_numbers<[1], [0], [0], [1], [0, 0, 1, 1], [], []>} : vector<64x128xbf16>, vector<128x128xbf16>, vector<64x128xf32> -> vector<64x128xf32>
    %9 = vector.broadcast %5 : vector<1x128xf32> to vector<64x128xf32>
    %10 = arith.mulf %8, %9 : vector<64x128xf32>
    %11 = vector.broadcast %6 : vector<1x128xf32> to vector<64x128xf32>
    %12 = arith.addf %10, %11 : vector<64x128xf32>
    %cst_12 = arith.constant 0.000000e+00 : f32
    %13 = vector.broadcast %cst_12 : f32 to vector<64x128xf32>
    %14 = arith.maximumf %12, %13 : vector<64x128xf32>
    %15 = arith.truncf %3 : vector<32x128xf32> to vector<32x128xbf16>
    %cst_13 = arith.constant dense<0.000000e+00> : vector<32x128xf32>
    %16 = tpu.matmul %15, %4, %cst_13 {dimension_numbers = #tpu.dot_dimension_numbers<[1], [0], [0], [1], [0, 0, 1, 1], [], []>} : vector<32x128xbf16>, vector<128x128xbf16>, vector<32x128xf32> -> vector<32x128xf32>
    %17 = vector.broadcast %5 : vector<1x128xf32> to vector<32x128xf32>
    %18 = arith.mulf %16, %17 : vector<32x128xf32>
    %19 = vector.broadcast %6 : vector<1x128xf32> to vector<32x128xf32>
    %20 = arith.addf %18, %19 : vector<32x128xf32>
    %cst_14 = arith.constant 0.000000e+00 : f32
    %21 = vector.broadcast %cst_14 : f32 to vector<32x128xf32>
    %22 = arith.maximumf %20, %21 : vector<32x128xf32>
    %c0_i32 = arith.constant 0 : i32
    %23 = arith.cmpi sgt, %arg1, %c0_i32 : i32
    %24 = arith.extui %23 : i1 to i32
    %25 = arith.sitofp %24 : i32 to f32
    %c1_i32 = arith.constant 1 : i32
    %26 = arith.addi %arg1, %c1_i32 : i32
    %c4_i32 = arith.constant 4 : i32
    %27 = arith.cmpi slt, %26, %c4_i32 : i32
    %28 = arith.extui %27 : i1 to i32
    %29 = arith.sitofp %28 : i32 to f32
    %30 = vector.extract_strided_slice %22 {offsets = [0, 0], sizes = [16, 128], strides = [1, 1]} : vector<32x128xf32> to vector<16x128xf32>
    %31 = vector.broadcast %25 : f32 to vector<16x128xf32>
    %32 = arith.mulf %30, %31 : vector<16x128xf32>
    %33 = vector.extract_strided_slice %22 {offsets = [16, 0], sizes = [16, 128], strides = [1, 1]} : vector<32x128xf32> to vector<16x128xf32>
    %34 = vector.broadcast %29 : f32 to vector<16x128xf32>
    %35 = arith.mulf %33, %34 : vector<16x128xf32>
    %36 = tpu.concatenate %32, %14, %35 in 0 : vector<16x128xf32>, vector<64x128xf32>, vector<16x128xf32> -> vector<96x128xf32>
    %37 = tpu.iota {dimensions = array<i32: 0>} : vector<64x1xi32>
    %c16_i32 = arith.constant 16 : i32
    %c0_i32_15 = arith.constant 0 : i32
    %38 = arith.cmpi eq, %c16_i32, %c0_i32_15 : i32
    %c1_i32_16 = arith.constant 1 : i32
    %39 = arith.select %38, %c1_i32_16, %c16_i32 : i32
    %40 = vector.broadcast %39 : i32 to vector<64x1xi32>
    %41 = arith.remsi %37, %40 : vector<64x1xi32>
    %c0_i32_17 = arith.constant 0 : i32
    %42 = vector.broadcast %c0_i32_17 : i32 to vector<64x1xi32>
    %43 = arith.cmpi ne, %41, %42 : vector<64x1xi32>
    %c0_i32_18 = arith.constant 0 : i32
    %44 = vector.broadcast %c0_i32_18 : i32 to vector<64x1xi32>
    %45 = arith.cmpi slt, %41, %44 : vector<64x1xi32>
    %c0_i32_19 = arith.constant 0 : i32
    %46 = arith.cmpi slt, %39, %c0_i32_19 : i32
    %47 = vector.broadcast %46 : i1 to vector<64x1xi1>
    %48 = vector.broadcast %47 : vector<64x1xi1> to vector<64x1xi1>
    %49 = arith.xori %45, %48 : vector<64x1xi1>
    %50 = arith.andi %49, %43 : vector<64x1xi1>
    %51 = vector.broadcast %39 : i32 to vector<64x1xi32>
    %52 = arith.addi %41, %51 : vector<64x1xi32>
    %53 = arith.select %50, %52, %41 : vector<64x1xi1>, vector<64x1xi32>
    %c1_i32_20 = arith.constant 1 : i32
    %54 = vector.broadcast %c1_i32_20 : i32 to vector<64x1xi32>
    %55 = arith.cmpi sge, %53, %54 : vector<64x1xi32>
    %cst_21 = arith.constant 1.000000e+00 : f32
    %cst_22 = arith.constant 0.000000e+00 : f32
    %56 = vector.broadcast %cst_21 : f32 to vector<64x1xf32>
    %57 = vector.broadcast %cst_22 : f32 to vector<64x1xf32>
    %58 = arith.select %55, %56, %57 : vector<64x1xi1>, vector<64x1xf32>
    %59 = arith.truncf %58 : vector<64x1xf32> to vector<64x1xbf16>
    %c14_i32 = arith.constant 14 : i32
    %60 = vector.broadcast %c14_i32 : i32 to vector<64x1xi32>
    %61 = arith.cmpi sle, %53, %60 : vector<64x1xi32>
    %cst_23 = arith.constant 1.000000e+00 : f32
    %cst_24 = arith.constant 0.000000e+00 : f32
    %62 = vector.broadcast %cst_23 : f32 to vector<64x1xf32>
    %63 = vector.broadcast %cst_24 : f32 to vector<64x1xf32>
    %64 = arith.select %61, %62, %63 : vector<64x1xi1>, vector<64x1xf32>
    %65 = arith.truncf %64 : vector<64x1xf32> to vector<64x1xbf16>
    %cst_25 = arith.constant 0.000000e+00 : f32
    %66 = vector.broadcast %cst_25 : f32 to vector<64x128xf32>
    %67 = vector.extract_strided_slice %36 {offsets = [0, 0], sizes = [64, 128], strides = [1, 1]} : vector<96x128xf32> to vector<64x128xf32>
    %c1_i32_26 = arith.constant 1 : i32
    %68 = tpu.dynamic_rotate %67 by %c1_i32_26 dim 0 : vector<64x128xf32>, i32 -> vector<64x128xf32>
    %69 = arith.truncf %68 : vector<64x128xf32> to vector<64x128xbf16>
    %70 = vector.broadcast %59 : vector<64x1xbf16> to vector<64x128xbf16>
    %71 = arith.mulf %69, %70 : vector<64x128xbf16>
    %c0_27 = arith.constant 0 : index
    %c0_28 = arith.constant 0 : index
    %c0_29 = arith.constant 0 : index
    %72 = vector.load %arg7[%c0_27, %c0_28, %c0_29] : memref<9x128x128xbf16, #tpu.memory_space<vmem>>, vector<1x128x128xbf16>
    %73 = vector.shape_cast %72 : vector<1x128x128xbf16> to vector<128x128xbf16>
    %cst_30 = arith.constant dense<0.000000e+00> : vector<64x128xf32>
    %74 = tpu.matmul %71, %73, %cst_30 {dimension_numbers = #tpu.dot_dimension_numbers<[1], [0], [0], [1], [0, 0, 1, 1], [], []>} : vector<64x128xbf16>, vector<128x128xbf16>, vector<64x128xf32> -> vector<64x128xf32>
    %75 = arith.addf %66, %74 : vector<64x128xf32>
    %76 = arith.truncf %67 : vector<64x128xf32> to vector<64x128xbf16>
    %c1 = arith.constant 1 : index
    %c0_31 = arith.constant 0 : index
    %c0_32 = arith.constant 0 : index
    %77 = vector.load %arg7[%c1, %c0_31, %c0_32] : memref<9x128x128xbf16, #tpu.memory_space<vmem>>, vector<1x128x128xbf16>
    %78 = vector.shape_cast %77 : vector<1x128x128xbf16> to vector<128x128xbf16>
    %cst_33 = arith.constant dense<0.000000e+00> : vector<64x128xf32>
    %79 = tpu.matmul %76, %78, %cst_33 {dimension_numbers = #tpu.dot_dimension_numbers<[1], [0], [0], [1], [0, 0, 1, 1], [], []>} : vector<64x128xbf16>, vector<128x128xbf16>, vector<64x128xf32> -> vector<64x128xf32>
    %80 = arith.addf %75, %79 : vector<64x128xf32>
    %c63_i32 = arith.constant 63 : i32
    %81 = tpu.dynamic_rotate %67 by %c63_i32 dim 0 : vector<64x128xf32>, i32 -> vector<64x128xf32>
    %82 = arith.truncf %81 : vector<64x128xf32> to vector<64x128xbf16>
    %83 = vector.broadcast %65 : vector<64x1xbf16> to vector<64x128xbf16>
    %84 = arith.mulf %82, %83 : vector<64x128xbf16>
    %c2 = arith.constant 2 : index
    %c0_34 = arith.constant 0 : index
    %c0_35 = arith.constant 0 : index
    %85 = vector.load %arg7[%c2, %c0_34, %c0_35] : memref<9x128x128xbf16, #tpu.memory_space<vmem>>, vector<1x128x128xbf16>
    %86 = vector.shape_cast %85 : vector<1x128x128xbf16> to vector<128x128xbf16>
    %cst_36 = arith.constant dense<0.000000e+00> : vector<64x128xf32>
    %87 = tpu.matmul %84, %86, %cst_36 {dimension_numbers = #tpu.dot_dimension_numbers<[1], [0], [0], [1], [0, 0, 1, 1], [], []>} : vector<64x128xbf16>, vector<128x128xbf16>, vector<64x128xf32> -> vector<64x128xf32>
    %88 = arith.addf %80, %87 : vector<64x128xf32>
    %89 = vector.extract_strided_slice %36 {offsets = [16, 0], sizes = [64, 128], strides = [1, 1]} : vector<96x128xf32> to vector<64x128xf32>
    %c1_i32_37 = arith.constant 1 : i32
    %90 = tpu.dynamic_rotate %89 by %c1_i32_37 dim 0 : vector<64x128xf32>, i32 -> vector<64x128xf32>
    %91 = arith.truncf %90 : vector<64x128xf32> to vector<64x128xbf16>
    %92 = vector.broadcast %59 : vector<64x1xbf16> to vector<64x128xbf16>
    %93 = arith.mulf %91, %92 : vector<64x128xbf16>
    %c3 = arith.constant 3 : index
    %c0_38 = arith.constant 0 : index
    %c0_39 = arith.constant 0 : index
    %94 = vector.load %arg7[%c3, %c0_38, %c0_39] : memref<9x128x128xbf16, #tpu.memory_space<vmem>>, vector<1x128x128xbf16>
    %95 = vector.shape_cast %94 : vector<1x128x128xbf16> to vector<128x128xbf16>
    %cst_40 = arith.constant dense<0.000000e+00> : vector<64x128xf32>
    %96 = tpu.matmul %93, %95, %cst_40 {dimension_numbers = #tpu.dot_dimension_numbers<[1], [0], [0], [1], [0, 0, 1, 1], [], []>} : vector<64x128xbf16>, vector<128x128xbf16>, vector<64x128xf32> -> vector<64x128xf32>
    %97 = arith.addf %88, %96 : vector<64x128xf32>
    %98 = arith.truncf %89 : vector<64x128xf32> to vector<64x128xbf16>
    %c4 = arith.constant 4 : index
    %c0_41 = arith.constant 0 : index
    %c0_42 = arith.constant 0 : index
    %99 = vector.load %arg7[%c4, %c0_41, %c0_42] : memref<9x128x128xbf16, #tpu.memory_space<vmem>>, vector<1x128x128xbf16>
    %100 = vector.shape_cast %99 : vector<1x128x128xbf16> to vector<128x128xbf16>
    %cst_43 = arith.constant dense<0.000000e+00> : vector<64x128xf32>
    %101 = tpu.matmul %98, %100, %cst_43 {dimension_numbers = #tpu.dot_dimension_numbers<[1], [0], [0], [1], [0, 0, 1, 1], [], []>} : vector<64x128xbf16>, vector<128x128xbf16>, vector<64x128xf32> -> vector<64x128xf32>
    %102 = arith.addf %97, %101 : vector<64x128xf32>
    %c63_i32_44 = arith.constant 63 : i32
    %103 = tpu.dynamic_rotate %89 by %c63_i32_44 dim 0 : vector<64x128xf32>, i32 -> vector<64x128xf32>
    %104 = arith.truncf %103 : vector<64x128xf32> to vector<64x128xbf16>
    %105 = vector.broadcast %65 : vector<64x1xbf16> to vector<64x128xbf16>
    %106 = arith.mulf %104, %105 : vector<64x128xbf16>
    %c5 = arith.constant 5 : index
    %c0_45 = arith.constant 0 : index
    %c0_46 = arith.constant 0 : index
    %107 = vector.load %arg7[%c5, %c0_45, %c0_46] : memref<9x128x128xbf16, #tpu.memory_space<vmem>>, vector<1x128x128xbf16>
    %108 = vector.shape_cast %107 : vector<1x128x128xbf16> to vector<128x128xbf16>
    %cst_47 = arith.constant dense<0.000000e+00> : vector<64x128xf32>
    %109 = tpu.matmul %106, %108, %cst_47 {dimension_numbers = #tpu.dot_dimension_numbers<[1], [0], [0], [1], [0, 0, 1, 1], [], []>} : vector<64x128xbf16>, vector<128x128xbf16>, vector<64x128xf32> -> vector<64x128xf32>
    %110 = arith.addf %102, %109 : vector<64x128xf32>
    %111 = vector.extract_strided_slice %36 {offsets = [32, 0], sizes = [64, 128], strides = [1, 1]} : vector<96x128xf32> to vector<64x128xf32>
    %c1_i32_48 = arith.constant 1 : i32
    %112 = tpu.dynamic_rotate %111 by %c1_i32_48 dim 0 : vector<64x128xf32>, i32 -> vector<64x128xf32>
    %113 = arith.truncf %112 : vector<64x128xf32> to vector<64x128xbf16>
    %114 = vector.broadcast %59 : vector<64x1xbf16> to vector<64x128xbf16>
    %115 = arith.mulf %113, %114 : vector<64x128xbf16>
    %c6 = arith.constant 6 : index
    %c0_49 = arith.constant 0 : index
    %c0_50 = arith.constant 0 : index
    %116 = vector.load %arg7[%c6, %c0_49, %c0_50] : memref<9x128x128xbf16, #tpu.memory_space<vmem>>, vector<1x128x128xbf16>
    %117 = vector.shape_cast %116 : vector<1x128x128xbf16> to vector<128x128xbf16>
    %cst_51 = arith.constant dense<0.000000e+00> : vector<64x128xf32>
    %118 = tpu.matmul %115, %117, %cst_51 {dimension_numbers = #tpu.dot_dimension_numbers<[1], [0], [0], [1], [0, 0, 1, 1], [], []>} : vector<64x128xbf16>, vector<128x128xbf16>, vector<64x128xf32> -> vector<64x128xf32>
    %119 = arith.addf %110, %118 : vector<64x128xf32>
    %120 = arith.truncf %111 : vector<64x128xf32> to vector<64x128xbf16>
    %c7 = arith.constant 7 : index
    %c0_52 = arith.constant 0 : index
    %c0_53 = arith.constant 0 : index
    %121 = vector.load %arg7[%c7, %c0_52, %c0_53] : memref<9x128x128xbf16, #tpu.memory_space<vmem>>, vector<1x128x128xbf16>
    %122 = vector.shape_cast %121 : vector<1x128x128xbf16> to vector<128x128xbf16>
    %cst_54 = arith.constant dense<0.000000e+00> : vector<64x128xf32>
    %123 = tpu.matmul %120, %122, %cst_54 {dimension_numbers = #tpu.dot_dimension_numbers<[1], [0], [0], [1], [0, 0, 1, 1], [], []>} : vector<64x128xbf16>, vector<128x128xbf16>, vector<64x128xf32> -> vector<64x128xf32>
    %124 = arith.addf %119, %123 : vector<64x128xf32>
    %c63_i32_55 = arith.constant 63 : i32
    %125 = tpu.dynamic_rotate %111 by %c63_i32_55 dim 0 : vector<64x128xf32>, i32 -> vector<64x128xf32>
    %126 = arith.truncf %125 : vector<64x128xf32> to vector<64x128xbf16>
    %127 = vector.broadcast %65 : vector<64x1xbf16> to vector<64x128xbf16>
    %128 = arith.mulf %126, %127 : vector<64x128xbf16>
    %c8 = arith.constant 8 : index
    %c0_56 = arith.constant 0 : index
    %c0_57 = arith.constant 0 : index
    %129 = vector.load %arg7[%c8, %c0_56, %c0_57] : memref<9x128x128xbf16, #tpu.memory_space<vmem>>, vector<1x128x128xbf16>
    %130 = vector.shape_cast %129 : vector<1x128x128xbf16> to vector<128x128xbf16>
    %cst_58 = arith.constant dense<0.000000e+00> : vector<64x128xf32>
    %131 = tpu.matmul %128, %130, %cst_58 {dimension_numbers = #tpu.dot_dimension_numbers<[1], [0], [0], [1], [0, 0, 1, 1], [], []>} : vector<64x128xbf16>, vector<128x128xbf16>, vector<64x128xf32> -> vector<64x128xf32>
    %132 = arith.addf %124, %131 : vector<64x128xf32>
    %c0_59 = arith.constant 0 : index
    %c0_60 = arith.constant 0 : index
    %133 = vector.load %arg8[%c0_59, %c0_60] : memref<1x128xf32, #tpu.memory_space<vmem>>, vector<1x128xf32>
    %134 = vector.broadcast %133 : vector<1x128xf32> to vector<64x128xf32>
    %135 = arith.mulf %132, %134 : vector<64x128xf32>
    %c0_61 = arith.constant 0 : index
    %c0_62 = arith.constant 0 : index
    %136 = vector.load %arg9[%c0_61, %c0_62] : memref<1x128xf32, #tpu.memory_space<vmem>>, vector<1x128xf32>
    %137 = vector.broadcast %136 : vector<1x128xf32> to vector<64x128xf32>
    %138 = arith.addf %135, %137 : vector<64x128xf32>
    %cst_63 = arith.constant 0.000000e+00 : f32
    %139 = vector.broadcast %cst_63 : f32 to vector<64x128xf32>
    %140 = arith.maximumf %138, %139 : vector<64x128xf32>
    %141 = arith.truncf %140 : vector<64x128xf32> to vector<64x128xbf16>
    %c0_64 = arith.constant 0 : index
    %c0_65 = arith.constant 0 : index
    %142 = vector.load %arg10[%c0_64, %c0_65] : memref<128x128xbf16, #tpu.memory_space<vmem>>, vector<128x128xbf16>
    %cst_66 = arith.constant dense<0.000000e+00> : vector<64x128xf32>
    %143 = tpu.matmul %141, %142, %cst_66 {dimension_numbers = #tpu.dot_dimension_numbers<[1], [0], [0], [1], [0, 0, 1, 1], [], []>} : vector<64x128xbf16>, vector<128x128xbf16>, vector<64x128xf32> -> vector<64x128xf32>
    %c0_67 = arith.constant 0 : index
    %c0_68 = arith.constant 0 : index
    %144 = vector.load %arg11[%c0_67, %c0_68] : memref<1x128xf32, #tpu.memory_space<vmem>>, vector<1x128xf32>
    %145 = vector.broadcast %144 : vector<1x128xf32> to vector<64x128xf32>
    %146 = arith.mulf %143, %145 : vector<64x128xf32>
    %c0_69 = arith.constant 0 : index
    %c0_70 = arith.constant 0 : index
    %147 = vector.load %arg12[%c0_69, %c0_70] : memref<1x128xf32, #tpu.memory_space<vmem>>, vector<1x128xf32>
    %148 = vector.broadcast %147 : vector<1x128xf32> to vector<64x128xf32>
    %149 = arith.addf %146, %148 : vector<64x128xf32>
    %150 = arith.addf %149, %1 : vector<64x128xf32>
    %cst_71 = arith.constant 0.000000e+00 : f32
    %151 = vector.broadcast %cst_71 : f32 to vector<64x128xf32>
    %152 = arith.maximumf %150, %151 : vector<64x128xf32>
    %c0_72 = arith.constant 0 : index
    %c0_73 = arith.constant 0 : index
    %c0_74 = arith.constant 0 : index
    %153 = vector.load %arg13[%c0_72, %c0_73, %c0_74] : memref<1x64x128xf32, #tpu.memory_space<vmem>>, vector<1x64x128xf32>
    %154 = vector.shape_cast %153 : vector<1x64x128xf32> to vector<64x128xf32>
    %155 = vector.shape_cast %152 : vector<64x128xf32> to vector<1x64x128xf32>
    tpu.vector_store %arg13[%c0_72, %c0_73, %c0_74], %155 {strides = array<i32>} : memref<1x64x128xf32, #tpu.memory_space<vmem>>, vector<1x64x128xf32>,
    return
  }
  func.func @transform_0(%arg0: i32, %arg1: i32) -> (i32, i32, i32) {
    %c0_i32 = arith.constant 0 : i32
    %c0_i32_0 = arith.constant 0 : i32
    return %arg0, %arg1, %c0_i32 : i32, i32, i32
  }
  func.func @transform_1(%arg0: i32, %arg1: i32) -> (i32, i32, i32, i32) {
    %c0_i32 = arith.constant 0 : i32
    %c0_i32_0 = arith.constant 0 : i32
    %c0_i32_1 = arith.constant 0 : i32
    return %arg0, %arg1, %c0_i32, %c0_i32_0 : i32, i32, i32, i32
  }
  func.func @transform_2(%arg0: i32, %arg1: i32) -> (i32, i32) {
    %c0_i32 = arith.constant 0 : i32
    %c0_i32_0 = arith.constant 0 : i32
    %c0_i32_1 = arith.constant 0 : i32
    return %c0_i32, %c0_i32_0 : i32, i32
  }
  func.func @transform_3(%arg0: i32, %arg1: i32) -> (i32, i32) {
    %c0_i32 = arith.constant 0 : i32
    %c0_i32_0 = arith.constant 0 : i32
    %c0_i32_1 = arith.constant 0 : i32
    return %c0_i32, %c0_i32_0 : i32, i32
  }
  func.func @transform_4(%arg0: i32, %arg1: i32) -> (i32, i32) {
    %c0_i32 = arith.constant 0 : i32
    %c0_i32_0 = arith.constant 0 : i32
    %c0_i32_1 = arith.constant 0 : i32
    return %c0_i32, %c0_i32_0 : i32, i32
  }
  func.func @transform_5(%arg0: i32, %arg1: i32) -> (i32, i32, i32) {
    %c0_i32 = arith.constant 0 : i32
    %c0_i32_0 = arith.constant 0 : i32
    %c0_i32_1 = arith.constant 0 : i32
    %c0_i32_2 = arith.constant 0 : i32
    return %c0_i32, %c0_i32_0, %c0_i32_1 : i32, i32, i32
  }
  func.func @transform_6(%arg0: i32, %arg1: i32) -> (i32, i32) {
    %c0_i32 = arith.constant 0 : i32
    %c0_i32_0 = arith.constant 0 : i32
    %c0_i32_1 = arith.constant 0 : i32
    return %c0_i32, %c0_i32_0 : i32, i32
  }
  func.func @transform_7(%arg0: i32, %arg1: i32) -> (i32, i32) {
    %c0_i32 = arith.constant 0 : i32
    %c0_i32_0 = arith.constant 0 : i32
    %c0_i32_1 = arith.constant 0 : i32
    return %c0_i32, %c0_i32_0 : i32, i32
  }
  func.func @transform_8(%arg0: i32, %arg1: i32) -> (i32, i32) {
    %c0_i32 = arith.constant 0 : i32
    %c0_i32_0 = arith.constant 0 : i32
    %c0_i32_1 = arith.constant 0 : i32
    return %c0_i32, %c0_i32_0 : i32, i32
  }
  func.func @transform_9(%arg0: i32, %arg1: i32) -> (i32, i32) {
    %c0_i32 = arith.constant 0 : i32
    %c0_i32_0 = arith.constant 0 : i32
    %c0_i32_1 = arith.constant 0 : i32
    return %c0_i32, %c0_i32_0 : i32, i32
  }
  func.func @transform_10(%arg0: i32, %arg1: i32) -> (i32, i32) {
    %c0_i32 = arith.constant 0 : i32
    %c0_i32_0 = arith.constant 0 : i32
    %c0_i32_1 = arith.constant 0 : i32
    return %c0_i32, %c0_i32_0 : i32, i32
  }
  func.func @transform_11(%arg0: i32, %arg1: i32) -> (i32, i32, i32) {
    %c0_i32 = arith.constant 0 : i32
    %c0_i32_0 = arith.constant 0 : i32
    return %arg0, %arg1, %c0_i32 : i32, i32, i32
  }
}

</mosaic_0001>

<bundles_post_ra>
// kernel: tpu_custom_call.1
= control target key start
LH: loop header
LB: loop body
LE: loop exit
PB: predicated region body
PF: predicated region fallthrough
CT: control target
= control target key end

     0   :  { %s4448_s0 = inlined_call_operand.hbm [shape: f32[2,256,128], index: 0, kind: input, shape index: {}]   ;;  %s4449_s1 = inlined_call_operand.hbm [shape: f32[2,4,32,128], index: 1, kind: input, shape index: {}]   ;;  %s4450_s2 = inlined_call_operand.hbm [shape: bf16[128,128], index: 2, kind: input, shape index: {}]   ;;  %s4451_s3 = inlined_call_operand.vmem [shape: f32[1,128], index: 3, kind: input, shape index: {}]   ;;  %s4452_s4 = inlined_call_operand.vmem [shape: f32[1,128], index: 4, kind: input, shape index: {}]   ;;  %s4453_s5 = inlined_call_operand.hbm [shape: bf16[9,128,128], index: 5, kind: input, shape index: {}]   ;;  %s4454_s6 = inlined_call_operand.vmem [shape: f32[1,128], index: 6, kind: input, shape index: {}]   ;;  %s4455_s7 = inlined_call_operand.vmem [shape: f32[1,128], index: 7, kind: input, shape index: {}]   ;;  %s4456_s8 = inlined_call_operand.hbm [shape: bf16[128,128], index: 8, kind: input, shape index: {}]   ;;  %s4457_s9 = inlined_call_operand.vmem [shape: f32[1,128], index: 9, kind: input, shape index: {}]   ;;  %s4458_s10 = inlined_call_operand.vmem [shape: f32[1,128], index: 10, kind: input, shape index: {}]   ;;  %s4459_s11 = inlined_call_operand.hbm [shape: f32[2,256,128], index: 11, kind: output, shape index: {}]  }
   0x1   :  { %4470 = sst [smem:[#allocation33_spill]] %s4448_s0 }
   0x2   :  { %4471 = sst [smem:[#allocation34_spill]] %s4450_s2 }
   0x3   :  { %4472 = sst [smem:[#allocation35_spill]] %s4453_s5 }
   0x4   :  { %4473 = sst [smem:[#allocation36_spill]] %s4454_s6 }
   0x5   :  { %4474 = sst [smem:[#allocation37_spill]] %s4455_s7 }
   0x6   :  { %4475 = sst [smem:[#allocation38_spill]] %s4456_s8 }
   0x7   :  { %4476 = sst [smem:[#allocation39_spill]] %s4457_s9 }
   0x8   :  { %4477 = sst [smem:[#allocation40_spill]] %s4458_s10 }
   0x9   :  { %4478 = sst [smem:[#allocation41_spill]] %s4459_s11 }
   0xa   :  { %16 = vsyncpa [#allocation3], 0 }
   0xb   :  { %18 = vsyncpa [#allocation3 + $0x1], 0 }
   0xc   :  { %19 = vsyncpa [#allocation6], 0 }
   0xd   :  { %21 = vsyncpa [#allocation6 + $0x1], 0 }
   0xe   :  { %22 = vsyncpa [#allocation9], 0 }
   0xf   :  { %23 = vsyncpa [#allocation4], 0 }
  0x10   :  { %25 = vsyncpa [#allocation4 + $0x1], 0  ;;  %s3711_s17 = smov 0   ;;  %s3713_s18 = smov 0  }
  0x11   :  { %s3715_s19 = smov 0   ;;  %s3717_s20 = smov 0  }
  0x12   :  { %s3719_s21 = smov 0   ;;  %s3721_s22 = smov 0  }
  0x13   :  { %s3723_s23 = smov 0   ;;  %s3725_s24 = smov 0  }
  0x14 LB: > { %4479 = sst [smem:[#allocation17_spill]] %s3607_s17  ;;  %s3752_s25 = sadd.s32 4294967295, %s3635_s24   ;;  %s3635_s24 = sphi %s3725_s24, %s31_s24   ;;  %s3631_s23 = sphi %s3723_s23, %s4547_s23   ;;  %s3627_s22 = sphi %s3721_s22, %s4546_s22   ;;  %s3623_s21 = sphi %s3719_s21, %s4545_s21   ;;  %s3619_s20 = sphi %s3717_s20, %s4544_s20   ;;  %s3615_s19 = sphi %s3715_s19, %s4539_s19   ;;  %s3611_s18 = sphi %s3713_s18, %s4543_s18   ;;  %s3607_s17 = sphi %s3711_s17, %s4542_s17  }
  0x15   : > { %4480 = sst [smem:[#allocation18_spill]] %s3615_s19  ;;  %s2628_s26 = sadd.s32 4294967294, %s3635_s24  }
  0x16   : > { %4481 = sst [smem:[#allocation19_spill]] %s3623_s21  ;;  %p65_p0 = scmp.ne.s32.totalorder %s3611_s18, %s3607_s17 }
  0x17   : > { %p4463_p1 = scmp.eq.s32.totalorder %s3752_s25, 0  ;;  %p314_p3 = scmp.eq.s32.totalorder %s2628_s26, 7 }
  0x18   : > { %p2629_p5 = scmp.ge.s32.totalorder %s3635_s24, 1  ;;  %p321_p7 = scmp.lt.s32.totalorder %s3635_s24, 9 }
  0x19   : > { %p3761_p4 = por %p4463_p1, %p65_p0  ;;  %p3766_p6 = por %p314_p3, %p65_p0 }
  0x1a   : > { %p3771_p8 = pnand %p2629_p5, %p321_p7  ;;  %s3637_s30 = smov [#allocation7]  }
  0x1b   : > { %s4482_s27 = scalar_select %p3761_p4, 1, 0 }
  0x1c   : > { %s4483_s28 = scalar_select %p3766_p6, 1, 0 }
  0x1d   : > { %s333_s12 = sshll.u32 %s3637_s30, 4  ;;  %p3193_p9 = pneg %p3771_p8  ;;  %s334_s12 = int_to_ptr.vmem [resolvable:$true] %s333_s12 }
  0x1e   : > { %4484 = sst [smem:[#allocation20_spill]] %s4483_s28  ;;  %s3638_s14 = smov [#allocation8]  }
  0x1f   : > { %p3779_p10 = pnand %p3193_p9, %p4463_p1  ;;  %s352_s15 = sshll.u32 %s3638_s14, 4  ;;  %s353_s15 = int_to_ptr.vmem [resolvable:$true] %s352_s15 }
  0x20   : > { %s3639_s16 = smov [#allocation10]   ;;  %s3404_s28 = scalar_lea.vmem %s334_s12, 1024 }
  0x21   : > { %s371_s26 = sshll.u32 %s3639_s16, 4  ;;  %p3395_p11 = pneg %p3779_p10  ;;  %s372_s26 = int_to_ptr.vmem [resolvable:$true] %s371_s26 }
  0x22   : > { %p3405_p12 = scmp.ne.s32.totalorder %s334_s12, %s3404_s28  ;;  %p3412_p3 = scmp.lt.s32.totalorder %s334_s12, %s334_s12 }
  0x23   : > { %p3413_p5 = scmp.lt.s32.totalorder %s3404_s28, %s3404_s28 }
  0x24   : > { %p3407_p13 = pnand %p3405_p12, %p3395_p11 }
  0x25   : > { %p3414_p7 = por %p3413_p5, %p3412_p3 }
  0x26   : > { %p3408_p0 = pneg %p3407_p13 }
  0x28   : > { %p3415_p9 = pnand %p3414_p7, %p3408_p0 }
  0x2a   : > { %3418 = shalt.err (!%p3415_p9)
}
  0x2b   : > { %s3640_s30 = smov 64   ;;  %s3641_s14 = smov 4  }
  0x2c   : > { %s4487_s2 = sld [smem:[#allocation34_spill]]  ;;  %s3430_s11 = scalar_lea.vmem %s353_s15, 9216 }
  0x2d   : > { %p3431_p1 = scmp.ne.s32.totalorder %s353_s15, %s3430_s11  ;;  %p3438_p2 = scmp.lt.s32.totalorder %s353_s15, %s353_s15 }
  0x2e   : > { %p3439_p6 = scmp.lt.s32.totalorder %s3430_s11, %s3430_s11 }
  0x2f   : > { %p3433_p12 = pnand %p3431_p1, %p3395_p11 }
  0x30   : > { %p3440_p3 = por %p3439_p6, %p3438_p2 }
  0x31   : > { %p3434_p13 = pneg %p3433_p12 }
  0x32   : > { %3196 = dma.hbm_to_vmem [thread:$0]  (!%p3779_p10), %s4487_s2, 1024, %s334_s12, [#allocation6], %s3640_s30, %s3640_s30, %s3641_s14  }
  0x33   : > { %p3441_p0 = pnand %p3440_p3, %p3434_p13 }
  0x35   : > { %3444 = shalt.err (!%p3441_p0)
}
  0x36   : > { %s4488_s5 = sld [smem:[#allocation35_spill]]  ;;  %s3456_s17 = scalar_lea.vmem %s372_s26, 1024 }
  0x37   : > { %p3457_p5 = scmp.ne.s32.totalorder %s372_s26, %s3456_s17  ;;  %p3464_p9 = scmp.lt.s32.totalorder %s372_s26, %s372_s26 }
  0x38   : > { %p3465_p12 = scmp.lt.s32.totalorder %s3456_s17, %s3456_s17 }
  0x39   : > { %p3459_p7 = pnand %p3457_p5, %p3395_p11 }
  0x3a   : > { %p3466_p4 = por %p3465_p12, %p3464_p9 }
  0x3b   : > { %p3460_p1 = pneg %p3459_p7 }
  0x3c   : > { %3199 = dma.hbm_to_vmem [thread:$0]  (!%p3779_p10), %s4488_s5, 9216, %s353_s15, [#allocation9], %s3640_s30, %s3640_s30, %s3641_s14  }
  0x3d   : > { %p3467_p2 = pnand %p3466_p4, %p3460_p1 }
  0x3f   : > { %3470 = shalt.err (!%p3467_p2)
}
  0x40   : > { %s4489_s8 = sld [smem:[#allocation38_spill]]  ;;  %s40_s21 = sadd.s32 1, %s3627_s22 }
  0x41   : > { %p41_p4 = scmp.ge.s32.totalorder %s40_s21, 4  ;;  %s43_s13 = sadd.s32 1, %s3631_s23 }
  0x42   : > { %s52_s15 = sadd.s32 1, %s3615_s19  ;;  %p59_p6 = scmp.ne.s32.totalorder %s3615_s19, %s3611_s18 }
  0x43   : > { %s4549_s21 = smov (%p41_p4, %s40_s21), 0  ;;  %s4551_s13 = smov (!%p41_p4, %s43_s13), %s3631_s23 }
  0x44   : > { %4490 = sst [smem:[#allocation21_spill]] %s4549_s21  ;;  %s48_s16 = ssub.s32 %s3627_s22, %s4549_s21 }
  0x45   : > { %p60_p11 = scmp.eq.s32.totalorder %s3635_s24, 0  ;;  %p45_p13 = scmp.ge.s32.totalorder %s4551_s13, 2 }
  0x46   : > { %3202 = dma.hbm_to_vmem [thread:$0]  (!%p3779_p10), %s4489_s8, 1024, %s372_s26, [#allocation9], %s3640_s30, %s3640_s30, %s3641_s14  }
  0x47   : > { %p4491_p3 = scmp.eq.s32.totalorder %s3752_s25, 7  ;;  %p3826_p10 = por %p60_p11, %p59_p6 }
  0x48   : > { %p3217_p5 = scmp.lt.s32.totalorder %s3635_s24, 8  ;;  %s4553_s13 = smov (%p45_p13, %s4551_s13), 0 }
  0x49   : > { %p3822_p0 = por %p4491_p3, %p59_p6  ;;  %4495 = sst [smem:[#allocation23_spill]] %s4553_s13 }
  0x4a   : > { %s3834_s30 = sand.u32 1, %s3615_s19   ;;  %s2635_s14 = sshll.u32 %s3627_s22, 3 }
  0x4b   : > { %s4492_s28 = scalar_select %p3822_p0, 1, 0 }
  0x4c   : > { %s47_s17 = ssub.s32 %s3631_s23, %s4553_s13  ;;  %s2634_s12 = sshll.u32 %s3834_s30, 6 }
  0x4d   : > { %4493 = sst [smem:[#allocation22_spill]] %s4492_s28  ;;  %s49_s11 = sor.u32 %s48_s16, %s47_s17 }
  0x4e   : > { %p50_p7 = scmp.eq.s32.totalorder %s49_s11, 0  ;;  %s2636_s2 = sshll.u32 %s3631_s23, 5 }
  0x4f   : > { %s395_s5 = scalar_lea.vmem [#allocation2], %s2634_s12  ;;  %s401_s28 = sadd.s32 %s2636_s2, %s2635_s14 }
  0x50   : > { %s404_s8 = sshll.u32 %s395_s5, 4  ;;  %s2637_s10 = sshll.u32 %s401_s28, 7  ;;  %s405_s8 = int_to_ptr.vmem [resolvable:$true] %s404_s8 }
  0x51   : > { %s3842_s21 = scalar_select %p50_p7, %s3615_s19, %s52_s15  }
  0x52   : > { %p3848_p1 = pnand %p3217_p5, %p3826_p10  ;;  %s4498_s0 = sld [smem:[#allocation33_spill]] }
  0x53   : > { %4496 = sst [smem:[#allocation24_spill]] %s3842_s21  ;;  %s392_s17 = scalar_lea.sflag [#allocation3], %s3834_s30 }
  0x54   : > { %p3473_p9 = pneg %p3848_p1  ;;  %s3484_s5 = scalar_lea.vmem %s405_s8, 1024 }
  0x55   : > { %p3485_p12 = scmp.ne.s32.totalorder %s405_s8, %s3484_s5  ;;  %s3642_s2 = smov [#allocation2]  }
  0x56   : > { %s3489_s15 = sshll.u32 %s3642_s2, 4  ;;  %s3490_s15 = int_to_ptr.vmem [resolvable:$false] %s3489_s15 }
  0x57   : > { %p3487_p2 = pnand %p3485_p12, %p3473_p9  ;;  %s3491_s28 = scalar_lea.vmem %s3490_s15, 2048 }
  0x58   : > { %s403_s16 = scalar_lea.hbm %s4498_s0, %s2637_s10  ;;  %p3492_p6 = scmp.lt.s32.totalorder %s405_s8, %s3490_s15 }
  0x59   : > { %p3488_p4 = pneg %p3487_p2  ;;  %p3493_p11 = scmp.lt.s32.totalorder %s3491_s28, %s3484_s5 }
  0x5b   : > { %p3494_p13 = por %p3493_p11, %p3492_p6 }
  0x5d   : > { %p3495_p3 = pnand %p3494_p13, %p3488_p4 }
  0x5f   : > { %3498 = shalt.err (!%p3495_p3)
}
  0x60   : > { %s3643_s6 = smov 128   ;;  %s3644_s7 = smov 8  }
  0x61   : > { %3206 = dma.hbm_to_vmem [thread:$0]  (!%p3848_p1), %s403_s16, 1024, %s405_s8, %s392_s17, %s3643_s6, %s3643_s6, %s3644_s7  }
  0x62   : > { %s414_s10 = sand.u32 1, %s3635_s24   ;;  %s2638_s26 = sshll.u32 %s3834_s30, 5 }
  0x63   : > { %s2639_s14 = sshll.u32 %s3627_s22, 2  ;;  %s2640_s11 = sshll.u32 %s3631_s23, 4 }
  0x64   : > { %s424_s12 = sadd.s32 %s2640_s11, %s2639_s14  ;;  %s418_s5 = scalar_lea.vmem [#allocation5], %s2638_s26 }
  0x65   : > { %s427_s2 = sshll.u32 %s418_s5, 4  ;;  %s2641_s15 = sshll.u32 %s424_s12, 7  ;;  %s428_s2 = int_to_ptr.vmem [resolvable:$true] %s427_s2 }
  0x66   : > { %s426_s13 = scalar_lea.hbm %s4449_s1, %s2641_s15  ;;  %s415_s21 = scalar_lea.sflag [#allocation6], %s414_s10 }
  0x67   : > { %s3512_s19 = scalar_lea.vmem %s428_s2, 512  ;;  %s3645_s8 = smov [#allocation5]  }
  0x68   : > { %p3513_p10 = scmp.ne.s32.totalorder %s428_s2, %s3512_s19  ;;  %s3517_s30 = sshll.u32 %s3645_s8, 4  ;;  %s3518_s30 = int_to_ptr.vmem [resolvable:$false] %s3517_s30 }
  0x69   : > { %s3519_s16 = scalar_lea.vmem %s3518_s30, 1024  ;;  %p3520_p12 = scmp.lt.s32.totalorder %s428_s2, %s3518_s30 }
  0x6a   : > { %p3515_p5 = pnand %p3513_p10, %p3473_p9  ;;  %p3521_p2 = scmp.lt.s32.totalorder %s3519_s16, %s3512_s19 }
  0x6c   : > { %p3516_p7 = pneg %p3515_p5  ;;  %p3522_p4 = por %p3521_p2, %p3520_p12 }
  0x6e   : > { %p3523_p6 = pnand %p3522_p4, %p3516_p7 }
  0x70   : > { %3526 = shalt.err (!%p3523_p6)
}
  0x71   : > { %3209 = dma.hbm_to_vmem [thread:$0]  (!%p3848_p1), %s426_s13, 512, %s428_s2, %s415_s21, %s3643_s6, %s3643_s6, %s3644_s7  }
  0x72   : > { %439 = sbr.rel (%p3771_p8) target bundleno = 944 (0x3b0), region = 64 }
  0x77   : > { %s3884_s0 = sand.u32 1, %s3611_s18   ;;  %p4499_p9 = scmp.ne.s32.totalorder %s4482_s27, 0 }
  0x78   : > { %s2643_s19 = sshll.u32 %s3884_s0, 6  ;;  %s442_s17 = scalar_lea.sflag [#allocation3], %s3884_s0 }
  0x79   : > { %s3890_s10 = scalar_lea.vmem [#allocation2], %s2643_s19 }
  0x7a   : > { %3586 = dma.done.wait (%p4499_p9), %s442_s17, 1024  }
  0x7b   : > { %3588 = vsyncadd (%p4499_p9), %s442_s17, 4294966272  ;;  %s450_s9 = sand.u32 1, %s3752_s25   ;;  %s2644_s29 = sshll.u32 %s3884_s0, 5 }
  0x7c   : > { %s451_s21 = scalar_lea.sflag [#allocation6], %s450_s9  ;;  %s3898_s13 = scalar_lea.vmem [#allocation5], %s2644_s29 }
  0x7d   : > { %3590 = dma.done.wait (%p4499_p9), %s451_s21, 512  }
  0x7e   : > { %3592 = vsyncadd (%p4499_p9), %s451_s21, 4294966784  ;;  %p4500_p8 = scmp.eq.s32.totalorder %s3752_s25, 0 }
  0x80   : > { %3594 = dma.done.wait (%p4500_p8), [#allocation6], 1024   ;;  %p4501_p1 = pmov %p4500_p8 }
  0x82   : > { %3596 = vsyncadd (%p4501_p1), [#allocation6], 4294966272  ;;  %p4502_p11 = pmov %p4501_p1 }
  0x83   : > { %p4503_p13 = pmov %p4501_p1 }
  0x84   : > { %3598 = dma.done.wait (%p4502_p11), [#allocation9], 10240  }
  0x85   : > { %3600 = vsyncadd (%p4503_p13), [#allocation9], 4294957056  ;;  %v3297_v0 = vld [vmem:[#allocation7 + $0x38] sm:$0xff]   ;;  %v3298_v1 = vld [vmem:[#allocation7 + $0x30] sm:$0xff]   ;;  %v772_v44 = vlaneseq  ;;  %s762_s25 = sadd.s32 1, %s3619_s20  ;;  %p759_p10 = scmp.gt.s32.totalorder %s3619_s20, 0 }
  0x86   : > { %2891 = vmatprep.subr.bf16.mxu0 %v3297_v0  ;;  %2915 = vmatprep.subr.bf16.mxu1 %v3297_v0  ;;  %v3299_v2 = vld [vmem:[#allocation7 + $0x28] sm:$0xff]   ;;  %v3300_v3 = vld [vmem:[#allocation7 + $0x20] sm:$0xff]   ;;  %v3301_v10 = vld [vmem:[#allocation7 + $0x18] sm:$0xff]   ;;  %p763_p3 = scmp.lt.s32.totalorder %s762_s25, 4  ;;  %s4520_s28 = sld [smem:[#allocation36_spill]] }
  0x87   : > { %2892 = vmatpush3.bf16.msra.mxu0 %v3297_v0  ;;  %2916 = vmatpush3.bf16.msra.mxu1 %v3297_v0  ;;  %v513_v4 = vld [vmem:[%s3890_s10] sm:$0xff]  ;;  %v514_v5 = vld [vmem:[%s3890_s10 + $0x8] sm:$0xff]  ;;  %v3302_v11 = vld [vmem:[#allocation7 + $0x10] sm:$0xff]   ;;  %v3931_v45 = vshrl.u32 %v772_v44, 7  ;;  %s3943_s26 = scalar_select %p759_p10, 1, 0 }
  0x88   : > { %2893 = vmatprep.subr.bf16.mxu0 %v3298_v1  ;;  %2917 = vmatprep.subr.bf16.mxu1 %v3298_v1  ;;  %v521_v6 = vld [vmem:[%s3898_s13] sm:$0xff]  ;;  %v543_v7 = vpack.c.bf16 %v514_v5, %v513_v4  ;;  %v522_v8 = vld [vmem:[%s3898_s13 + $0x8] sm:$0xff]  ;;  %v515_v14 = vld [vmem:[%s3890_s10 + $0x10] sm:$0xff]  ;;  %s764_s27 = scalar_select %p763_p3, 1, 0 }
  0x89   : > { %v696_v9 = vpack.c.bf16 %v522_v8, %v521_v6  ;;  %v3303_v12 = vld [vmem:[#allocation7 + $0x8] sm:$0xff]   ;;  %v3304_v13 = vld [vmem:[#allocation7] sm:$0xff]   ;;  %v516_v15 = vld [vmem:[%s3890_s10 + $0x18] sm:$0xff]  ;;  %v774_v46 = vadd.s32 8, %v3931_v45  ;;  %v775_v47 = vadd.s32 16, %v3931_v45  ;;  %v777_v49 = vadd.s32 32, %v3931_v45  ;;  %s761_s5 = scvt.s32.f32 %s3943_s26 }
  0x8a   : > { %2907 = vmatprep.mubr.bf16.mxu0 %v543_v7  ;;  %v523_v16 = vld [vmem:[%s3898_s13 + $0x10] sm:$0xff]  ;;  %v524_v17 = vld [vmem:[%s3898_s13 + $0x18] sm:$0xff]  ;;  %v517_v18 = vld [vmem:[%s3890_s10 + $0x20] sm:$0xff]  ;;  %v544_v22 = vpack.c.bf16 %v516_v15, %v515_v14  ;;  %v776_v50 = vadd.s32 24, %v3931_v45  ;;  %s3950_s12 = scvt.s32.f32 %s764_s27  ;;  %v785_v56 = vand.u32 15, %v3931_v45  ;;  %v779_v61 = vadd.s32 48, %v3931_v45 }
  0x8b   : > { %2894 = vmatpush3.bf16.msra.mxu0 %v3298_v1  ;;  %2918 = vmatpush3.bf16.msra.mxu1 %v3298_v1  ;;  %v518_v19 = vld [vmem:[%s3890_s10 + $0x28] sm:$0xff]  ;;  %v3305_v20 = vld [vmem:[#allocation8 + $0x78] sm:$0xff]   ;;  %v697_v23 = vpack.c.bf16 %v524_v17, %v523_v16  ;;  %v3306_v24 = vld [vmem:[#allocation8 + $0x70] sm:$0xff]   ;;  %v792_v51 = vand.u32 15, %v774_v46  ;;  %v799_v57 = vand.u32 15, %v775_v47  ;;  %v813_v60 = vand.u32 15, %v777_v49 }
  0x8c   : > { %2895 = vmatprep.subr.bf16.mxu0 %v3299_v2  ;;  %2919 = vmatprep.subr.bf16.mxu1 %v3299_v2  ;;  %v3308_v21 = vld [vmem:[#allocation8 + $0x38] sm:$0xff]   ;;  %v545_v25 = vpack.c.bf16 %v518_v19, %v517_v18  ;;  %v519_v26 = vld [vmem:[%s3890_s10 + $0x30] sm:$0xff]  ;;  %v3307_v28 = vld [vmem:[#allocation8 + $0x68] sm:$0xff]   ;;  %v806_v62 = vand.u32 15, %v776_v50  ;;  %v769_v1 = vstv %s3950_s12  ;;  %v778_v4 = vadd.s32 40, %v3931_v45  ;;  %s4527_s16 = sld [smem:[#allocation37_spill]] }
  0x8d   : > { %2931 = vmatprep.mubr.bf16.mxu1 %v696_v9  ;;  %v520_v27 = vld [vmem:[%s3890_s10 + $0x38] sm:$0xff]  ;;  %v3309_v30 = vld [vmem:[#allocation8 + $0x60] sm:$0xff]   ;;  %v3310_v31 = vld [vmem:[#allocation8 + $0x30] sm:$0xff]   ;;  %vm898_vm0 = vcmp.le.s32.totalorder %v792_v51, 14  ;;  %vm3963_vm1 = vcmp.ge.s32.totalorder %v785_v56, 1  ;;  %vm3967_vm2 = vcmp.ge.s32.totalorder %v799_v57, 1  ;;  %v766_v15 = vstv %s761_s5 }
  0x8e   : > { %v546_v29 = vpack.c.bf16 %v520_v27, %v519_v26  ;;  %v3311_v32 = vld [vmem:[#allocation8 + $0x58] sm:$0xff]   ;;  %v3312_v33 = vld [vmem:[#allocation8 + $0x28] sm:$0xff]   ;;  %v3313_v34 = vld [vmem:[#allocation8 + $0x50] sm:$0xff]   ;;  %vm881_vm3 = vcmp.ge.s32.totalorder %v813_v60, 1  ;;  %vm3975_vm4 = vcmp.le.s32.totalorder %v806_v62, 14  ;;  %vm925_vm7 = vcmp.lt.s32.totalorder %v3931_v45, 1 }
  0x8f   : > { %2896 = vmatpush3.bf16.msra.mxu0 %v3299_v2  ;;  %2920 = vmatpush3.bf16.msra.mxu1 %v3299_v2  ;;  %v3314_v35 = vld [vmem:[#allocation8 + $0x20] sm:$0xff]   ;;  %v3315_v36 = vld [vmem:[#allocation8 + $0x48] sm:$0xff]   ;;  %v3316_v37 = vld [vmem:[#allocation8 + $0x18] sm:$0xff]   ;;  %vm1213_vm8 = vcmp.lt.s32.totalorder %v3931_v45, 7  ;;  %s4530_s29 = sld [smem:[#allocation39_spill]]  ;;  %s4371_s27 = scalar_lea.vmem [#allocation11], %s2643_s19 }
  0x90   : > { %2897 = vmatprep.subr.bf16.mxu0 %v3300_v3  ;;  %2921 = vmatprep.subr.bf16.mxu1 %v3300_v3  ;;  %v3317_v38 = vld [vmem:[#allocation8 + $0x40] sm:$0xff]   ;;  %v3318_v39 = vld [vmem:[#allocation8 + $0x10] sm:$0xff]   ;;  %v3924_v40 = vld [vmem:[#allocation8 + $0xb8] sm:$0xff]   ;;  %s4531_s25 = sld [smem:[#allocation40_spill]]  ;;  %s2744_s19 = sshll.u32 %s3619_s20, 3 }
  0x91   : > { %v3320_v41 = vld [vmem:[#allocation8 + $0x8] sm:$0xff]   ;;  %v3322_v42 = vld [vmem:[#allocation8] sm:$0xff]   ;;  %v3927_v43 = vld [vmem:[#allocation8 + $0xf8] sm:$0xff]   ;;  %s4532_s6 = sld [smem:[#allocation19_spill]]  ;;  %s2483_s14 = sshll.u32 %s4371_s27, 4  ;;  %s4388_s14 = int_to_ptr.vmem [resolvable:$true] %s2483_s14 }
  0x92   : > { %v3939_v48 = vld [vmem:[%s4451_s3] ss:$0 sm:$0xff]  ;;  %s4534_s2 = sld [smem:[#allocation41_spill]]  ;;  %s3527_s8 = scalar_lea.vmem %s4388_s14, 1024 }
  0x93   : > { %2898 = vmatpush3.bf16.msra.mxu0 %v3300_v3  ;;  %2922 = vmatpush3.bf16.msra.mxu1 %v3300_v3  ;;  %v3948_v52 = vld [vmem:[%s4452_s4] ss:$0 sm:$0xff]  ;;  %p3528_p5 = scmp.ne.s32.totalorder %s4388_s14, %s3527_s8 }
  0x94   : > { %2899 = vmatprep.subr.bf16.mxu0 %v3301_v10  ;;  %2923 = vmatprep.subr.bf16.mxu1 %v3301_v10 }
  0x95   : > { %p3529_p7 = pnand %p3528_p5, %p3822_p0 }
  0x97   : > { %2900 = vmatpush3.bf16.msra.mxu0 %v3301_v10  ;;  %2924 = vmatpush3.bf16.msra.mxu1 %v3301_v10  ;;  %s2745_s7 = sshll.u32 %s4532_s6, 5  ;;  %p3530_p12 = pneg %p3529_p7 }
  0x98   : > { %2901 = vmatprep.subr.bf16.mxu0 %v3302_v11  ;;  %2925 = vmatprep.subr.bf16.mxu1 %v3302_v11  ;;  %s2480_s20 = sadd.s32 %s2745_s7, %s2744_s19 }
  0x99   : > { %s2746_s11 = sshll.u32 %s2480_s20, 7 }
  0x9a   : > { %s4394_s15 = scalar_lea.hbm %s4534_s2, %s2746_s11 }
  0x9b   : > { %2902 = vmatpush3.bf16.msra.mxu0 %v3302_v11  ;;  %2926 = vmatpush3.bf16.msra.mxu1 %v3302_v11  ;;  %v3646_v11 = vmov 0.0  }
  0x9c   : > { %2903 = vmatprep.subr.bf16.mxu0 %v3303_v12  ;;  %2927 = vmatprep.subr.bf16.mxu1 %v3303_v12  ;;  %v885_v26 = vsel %vm3963_vm1, 1.0, %v3646_v11  ;;  %v887_v27 = vsel %vm3967_vm2, 1.0, %v3646_v11 }
  0x9f   : > { %2904 = vmatpush3.bf16.msra.mxu0 %v3303_v12  ;;  %2928 = vmatpush3.bf16.msra.mxu1 %v3303_v12  ;;  %v906_v12 = vsel %vm898_vm0, 1.0, %v3646_v11 }
  0xa0   : > { %2905 = vmatprep.subr.bf16.mxu0 %v3304_v13  ;;  %2929 = vmatprep.subr.bf16.mxu1 %v3304_v13 }
  0xa3   : > { %2906 = vmatpush3.bf16.msra.mxu0 %v3304_v13  ;;  %2930 = vmatpush3.bf16.msra.mxu1 %v3304_v13  ;;  %v827_v13 = vand.u32 15, %v779_v61 }
  0xa4   : > { %2935 = vmatprep.subr.bf16.mxu0 %v3305_v20  ;;  %2959 = vmatprep.subr.bf16.mxu1 %v3308_v21 }
  0xa5   : > { %vm883_vm5 = vcmp.ge.s32.totalorder %v827_v13, 1 }
  0xa6   : > { %2908 = vmatmul.mubr.bf16.vlgmr.msra.gmra.mxu0 %v544_v22  ;;  %2932 = vmatmul.mubr.bf16.vlgmr.msra.gmra.mxu1 %v697_v23  ;;  %v820_v22 = vand.u32 15, %v778_v4  ;;  %v891_v46 = vsel %vm883_vm5, 1.0, %v3646_v11 }
  0xa7   : > { %2911 = vmatprep.mubr.bf16.mxu0 %v545_v25  ;;  %2936 = vmatpush3.bf16.msra.mxu0 %v3305_v20 }
  0xa8   : > { %2937 = vmatprep.subr.bf16.mxu0 %v3306_v24  ;;  %2960 = vmatpush3.bf16.msra.mxu1 %v3308_v21  ;;  %vm902_vm6 = vcmp.le.s32.totalorder %v820_v22, 14 }
  0xa9   : > { %2961 = vmatprep.subr.bf16.mxu1 %v3310_v31  ;;  %v910_v57 = vsel %vm902_vm6, 1.0, %v3646_v11 }
  0xab   : > { %2938 = vmatpush3.bf16.msra.mxu0 %v3306_v24  ;;  %v3647_v24 = vmov 1.0  }
  0xac   : > { %2939 = vmatprep.subr.bf16.mxu0 %v3307_v28  ;;  %2962 = vmatpush3.bf16.msra.mxu1 %v3310_v31  ;;  %v3986_v25 = vpack.c.bf16 %v906_v12, %v3647_v24  ;;  %v780_v31 = vadd.s32 56, %v3931_v45  ;;  %v4030_v61 = vpack.c.bf16 %v3647_v24, %v891_v46 }
  0xad   : > { %2963 = vmatprep.subr.bf16.mxu1 %v3312_v33 }
  0xae   : > { %2912 = vmatmul.mubr.bf16.gmra.mxu0 %v546_v29 }
  0xaf   : > { %2940 = vmatpush3.bf16.msra.mxu0 %v3307_v28 }
  0xb0   : > { %2941 = vmatprep.subr.bf16.mxu0 %v3309_v30  ;;  %2964 = vmatpush3.bf16.msra.mxu1 %v3312_v33 }
  0xb1   : > { %2965 = vmatprep.subr.bf16.mxu1 %v3314_v35 }
  0xb3   : > { %2942 = vmatpush3.bf16.msra.mxu0 %v3309_v30  ;;  %v889_v30 = vsel %vm881_vm3, 1.0, %v3646_v11 }
  0xb4   : > { %2943 = vmatprep.subr.bf16.mxu0 %v3311_v32  ;;  %2966 = vmatpush3.bf16.msra.mxu1 %v3314_v35  ;;  %v908_v35 = vsel %vm3975_vm4, 1.0, %v3646_v11  ;;  %v4014_v50 = vpack.c.bf16 %v3647_v24, %v889_v30 }
  0xb5   : > { %2967 = vmatprep.subr.bf16.mxu1 %v3316_v37  ;;  %v4017_v51 = vpack.c.bf16 %v908_v35, %v3647_v24 }
  0xb7   : > { %2944 = vmatpush3.bf16.msra.mxu0 %v3311_v32 }
  0xb8   : > { %2945 = vmatprep.subr.bf16.mxu0 %v3313_v34  ;;  %2968 = vmatpush3.bf16.msra.mxu1 %v3316_v37 }
  0xb9   : > { %2969 = vmatprep.subr.bf16.mxu1 %v3318_v39 }
  0xbb   : > { %2946 = vmatpush3.bf16.msra.mxu0 %v3313_v34 }
  0xbc   : > { %2947 = vmatprep.subr.bf16.mxu0 %v3315_v36  ;;  %2970 = vmatpush3.bf16.msra.mxu1 %v3318_v39  ;;  %v4007_v39 = vpack.c.bf16 %v3647_v24, %v887_v27 }
  0xbd   : > { %2971 = vmatprep.subr.bf16.mxu1 %v3320_v41 }
  0xbf   : > { %2948 = vmatpush3.bf16.msra.mxu0 %v3315_v36 }
  0xc0   : > { %2949 = vmatprep.subr.bf16.mxu0 %v3317_v38  ;;  %2972 = vmatpush3.bf16.msra.mxu1 %v3320_v41 }
  0xc1   : > { %2973 = vmatprep.subr.bf16.mxu1 %v3322_v42 }
  0xc3   : > { %2950 = vmatpush3.bf16.msra.mxu0 %v3317_v38  ;;  %v4004_v38 = vpack.c.bf16 %v3647_v24, %v885_v26  ;;  %v3321_v26 = vld [vmem:[#allocation8 + $0xb0] sm:$0xff]  }
  0xc4   : > { %2983 = vmatprep.subr.bf16.mxu0 %v3924_v40  ;;  %2974 = vmatpush3.bf16.msra.mxu1 %v3322_v42 }
  0xc5   : > { %3007 = vmatprep.subr.bf16.mxu1 %v3927_v43 }
 0x166   : > { %v2909_v53 = vpop.f32.mrf.mxu0  ;;  %v2933_v54 = vpop.f32.mrf.mxu1 }
 0x167   : > { %v749_v55 = vmul.f32 %v2933_v54, %v3939_v48  ;;  %v668_v5 = vmul.f32 %v2909_v53, %v3939_v48  ;;  %v834_v53 = vand.u32 15, %v780_v31 }
 0x168   : > { %v629_v58 = vpop.f32.mrf.mxu0  ;;  %v732_v59 = vpop.f32.mrf.mxu1 }
 0x169   : > { %v3956_v63 = vadd.f32 %v3948_v52, %v749_v55  ;;  %v747_v0 = vmul.f32 %v3939_v48, %v732_v59  ;;  %v666_v8 = vmul.f32 %v3939_v48, %v629_v58  ;;  %v682_v23 = vadd.f32 %v3948_v52, %v668_v5 }
 0x16a   : > { %v2910_v2 = vpop.f32.mrf.mxu0  ;;  %v2934_v3 = vpop.f32.mrf.mxu1  ;;  %vm4052_vm9 = vcmp.le.s32.totalorder %v834_v53, 14 }
 0x16b   : > { %v750_v9 = vmul.f32 %v2934_v3, %v3939_v48  ;;  %v751_v14 = vadd.f32 %v3948_v52, %v747_v0  ;;  %v669_v17 = vmul.f32 %v2910_v2, %v3939_v48  ;;  %v680_v28 = vadd.f32 %v3948_v52, %v666_v8 }
 0x16c   : > { %v632_v10 = vpop.f32.mrf.mxu0  ;;  %v735_v20 = vpop.f32.mrf.mxu1  ;;  %v690_v41 = vmax.f32 %v682_v23, 0.0  ;;  %v757_v58 = vmax.f32 %v3956_v63, 0.0 }
 0x16d   : > { %v3981_v18 = vadd.f32 %v3948_v52, %v750_v9  ;;  %v667_v19 = vmul.f32 %v3939_v48, %v632_v10  ;;  %v755_v32 = vmax.f32 %v751_v14, 0.0  ;;  %v748_v34 = vmul.f32 %v3939_v48, %v735_v20 }
 0x16e   : > { %v2913_v21 = vpop.f32.mrf.mxu0  ;;  %v683_v36 = vadd.f32 %v3948_v52, %v669_v17  ;;  %v688_v47 = vmax.f32 %v680_v28, 0.0  ;;  %v4032_v62 = vrot.slane %v690_v41, 7  ;;  %v4037_v4 = vrot.slane %v690_v41, 1 }
 0x16f   : > { %v681_v33 = vadd.f32 %v3948_v52, %v667_v19  ;;  %v752_v42 = vadd.f32 %v3948_v52, %v748_v34  ;;  %v4019_v54 = vmul.f32 %v766_v15, %v755_v32  ;;  %v672_v0 = vmul.f32 %v2913_v21, %v3939_v48 }
 0x170   : > { %v645_v29 = vpop.f32.mrf.mxu0  ;;  %v4027_v59 = vmax.f32 %v683_v36, 0.0  ;;  %v4039_v5 = vrot.slane %v688_v47, 7  ;;  %v758_v63 = vmax.f32 %v3981_v18, 0.0  ;;  %v4042_v7 = vrot.slane %v688_v47, 1 }
 0x171   : > { %v670_v44 = vmul.f32 %v3939_v48, %v645_v29  ;;  %v4021_v55 = vmax.f32 %v681_v33, 0.0  ;;  %v756_v60 = vmax.f32 %v752_v42, 0.0  ;;  %v917_v8 = vrot.slane %v4019_v54, 7 }
 0x172   : > { %v2914_v37 = vpop.f32.mrf.mxu0  ;;  %v922_v12 = vrot.slane %v4027_v59, 7  ;;  %v1205_v16 = vrot.slane %v4019_v54, 1  ;;  %v686_v17 = vadd.f32 %v3948_v52, %v672_v0  ;;  %v1210_v20 = vrot.slane %v4027_v59, 1 }
 0x173   : > { %v673_v56 = vmul.f32 %v2914_v37, %v3939_v48  ;;  %v684_v2 = vadd.f32 %v3948_v52, %v670_v44  ;;  %v768_v6 = vmul.f32 %v766_v15, %v756_v60  ;;  %v920_v9 = vrot.slane %v4021_v55, 7 }
 0x174   : > { %v648_v49 = vpop.f32.mrf.mxu0  ;;  %v4059_v21 = vmul.f32 %v769_v1, %v758_v63  ;;  %v4062_v22 = vpack.c.bf16 %v4021_v55, %v688_v47  ;;  %v4088_v33 = vsel %vm925_vm7, %v4032_v62, %v922_v12  ;;  %v4090_v34 = vmax.f32 %v686_v17, 0.0 }
 0x175   : > { %v671_v3 = vmul.f32 %v3939_v48, %v648_v49  ;;  %v687_v10 = vadd.f32 %v3948_v52, %v673_v56  ;;  %v918_v13 = vrot.slane %v768_v6, 7  ;;  %v1206_v48 = vrot.slane %v768_v6, 1 }
 0x176   : > { %v692_v18 = vmax.f32 %v684_v2, 0.0  ;;  %v958_v15 = vpack.c.bf16 %v768_v6, %v4019_v54  ;;  %v929_v29 = vsel %vm925_vm7, %v920_v9, %v4032_v62  ;;  %v4097_v37 = vsel %vm925_vm7, %v4039_v5, %v920_v9  ;;  %v3341_v54 = vld [vmem:[#allocation8 + $0x120] sm:$0xff]  }
 0x177   : > { %v685_v14 = vadd.f32 %v3948_v52, %v671_v3  ;;  %v4064_v27 = vmax.f32 %v687_v10, 0.0  ;;  %v4067_v52 = vpack.c.bf16 %v4027_v59, %v690_v41  ;;  %v931_v28 = vsel %vm925_vm7, %v918_v13, %v4039_v5  ;;  %v3323_v41 = vld [vmem:[#allocation8 + $0xa8] sm:$0xff]  }
 0x178   : > { %2951 = vmatprep.mubr.bf16.mxu0 %v958_v15  ;;  %v1219_v31 = vsel %vm1213_vm8, %v1206_v48, %v4042_v7  ;;  %v1220_v32 = vsel %vm1213_vm8, %v1205_v16, %v1206_v48  ;;  %v923_v35 = vrot.slane %v692_v18, 7  ;;  %v1211_v36 = vrot.slane %v692_v18, 1 }
 0x179   : > { %v693_v23 = vmax.f32 %v685_v14, 0.0  ;;  %2952 = vmatmul.mubr.bf16.vlgmr.msra.gmra.mxu0 %v4062_v22  ;;  %v932_v42 = vsel %vm925_vm7, %v917_v8, %v918_v13  ;;  %v935_v46 = vpack.c.bf16 %v4097_v37, %v931_v28  ;;  %v4109_v47 = vrot.slane %v4064_v27, 7  ;;  %v3325_v13 = vld [vmem:[#allocation8 + $0xa0] sm:$0xff]   ;;  %v3326_v14 = vld [vmem:[#allocation8 + $0xf0] sm:$0xff]  }
 0x17a   : > { %2984 = vmatpush3.bf16.msra.mxu0 %v3924_v40  ;;  %2955 = vmatprep.mubr.bf16.mxu0 %v4067_v52  ;;  %v4106_v40 = vpack.c.bf16 %v4088_v33, %v929_v29  ;;  %v1222_v49 = vpack.c.bf16 %v1219_v31, %v1220_v32  ;;  %v1806_v59 = vrot.slane %v4059_v21, 7  ;;  %v4120_v2 = vpack.c.bf16 %v910_v57, %v3647_v24 }
 0x17b   : > { %v4075_v30 = vrot.slane %v693_v23, 7  ;;  %2985 = vmatprep.subr.bf16.mxu0 %v3321_v26  ;;  %v4115_v60 = vrot.slane %v693_v23, 1  ;;  %v4117_v0 = vpack.c.bf16 %v693_v23, %v692_v18  ;;  %v4124_v3 = vmul.f32 %v769_v1, %v757_v58 }
 0x17c   : > { %v1656_v63 = vrot.slane %v4090_v34, 1  ;;  %v1657_v9 = vrot.slane %v4064_v27, 1  ;;  %v939_v10 = vmul.bf16 %v935_v46, %v4007_v39  ;;  %v1215_v1 = vsel %vm1213_vm8, %v1210_v20, %v1211_v36 }
 0x17d   : > { %v933_v44 = vsel %vm925_vm7, %v4075_v30, %v917_v8  ;;  %v926_v56 = vsel %vm925_vm7, %v923_v35, %v4075_v30  ;;  %v927_v8 = vsel %vm925_vm7, %v922_v12, %v923_v35  ;;  %v1226_v57 = vmul.bf16 %v1222_v49, %v3986_v25  ;;  %v3328_v35 = vld [vmem:[#allocation8 + $0xe8] sm:$0xff]  }
 0x17e   : > { %v934_v53 = vpack.c.bf16 %v932_v42, %v933_v44  ;;  %2986 = vmatpush3.bf16.msra.mxu0 %v3321_v26  ;;  %v4132_v48 = vpack.c.bf16 %v926_v56, %v927_v8  ;;  %v940_v58 = vmul.bf16 %v4106_v40, %v4014_v50  ;;  %v1372_v12 = vsel %vm925_vm7, %v4109_v47, %v4039_v5 }
 0x17f   : > { %2987 = vmatprep.subr.bf16.mxu0 %v3323_v41  ;;  %v1216_v17 = vsel %vm1213_vm8, %v4037_v4, %v1210_v20  ;;  %v912_v18 = vsel %vm4052_vm9, 1.0, %v3646_v11  ;;  %v4153_v15 = vsel %vm1213_vm8, %v1211_v36, %v4115_v60  ;;  %v1809_v5 = vsel %vm925_vm7, %v1806_v59, %v4032_v62  ;;  %v3327_v62 = vld [vmem:[#allocation8 + $0x98] sm:$0xff]  }
 0x180   : > { %v938_v6 = vmul.bf16 %v934_v53, %v4004_v38  ;;  %v1659_v20 = vsel %vm1213_vm8, %v4115_v60, %v1656_v63  ;;  %v1805_v23 = vrot.slane %v4124_v3, 7  ;;  %v4162_v26 = vpack.c.bf16 %v1215_v1, %v1216_v17  ;;  %v3332_v17 = vld [vmem:[#allocation8 + $0xd8] sm:$0xff]  }
 0x181   : > { %2956 = vmatmul.mubr.bf16.gmra.mxu0 %v4117_v0  ;;  %v1810_v11 = vpack.c.bf16 %v4088_v33, %v1809_v5  ;;  %v4166_v19 = vpack.c.bf16 %v1659_v20, %v4153_v15  ;;  %v2094_v28 = vrot.slane %v4059_v21, 1  ;;  %v4172_v29 = vsel %vm1213_vm8, %v1656_v63, %v1657_v9  ;;  %v3329_v63 = vld [vmem:[#allocation8 + $0x90] sm:$0xff]  }
 0x182   : > { %2975 = vmatprep.mubr.bf16.mxu1 %v938_v6  ;;  %2988 = vmatpush3.bf16.msra.mxu0 %v3323_v41  ;;  %v4177_v31 = vsel %vm1213_vm8, %v1657_v9, %v4042_v7  ;;  %v1813_v32 = vmul.bf16 %v4132_v48, %v4007_v39  ;;  %v2093_v33 = vrot.slane %v4124_v3, 1  ;;  %v4189_v42 = vpack.c.bf16 %v912_v18, %v3647_v24  ;;  %v3333_v18 = vld [vmem:[#allocation8 + $0x80] sm:$0xff]  }
 0x183   : > { %2976 = vmatmul.mubr.bf16.vlgmr.msra.gmra.mxu1 %v939_v10  ;;  %2999 = vmatprep.mubr.bf16.mxu0 %v1226_v57  ;;  %v4184_v36 = vmul.bf16 %v1810_v11, %v4004_v38  ;;  %v2101_v41 = vmul.bf16 %v4166_v19, %v4017_v51  ;;  %v1662_v44 = vpack.c.bf16 %v4177_v31, %v4172_v29  ;;  %v3368_v31 = vld [vmem:[#allocation8 + $0x1c8] sm:$0xff]  }
 0x184   : > { %2989 = vmatprep.subr.bf16.mxu0 %v3325_v13  ;;  %3008 = vmatpush3.bf16.msra.mxu1 %v3927_v43  ;;  %v1373_v43 = vpack.c.bf16 %v4097_v37, %v1372_v12  ;;  %v1807_v46 = vsel %vm925_vm7, %v1805_v23, %v1806_v59  ;;  %v1808_v49 = vsel %vm925_vm7, %v4109_v47, %v1805_v23  ;;  %v1208_v12 = vrot.slane %v4021_v55, 1  ;;  %v3334_v23 = vld [vmem:[#allocation8 + $0xd0] sm:$0xff]   ;;  %v3335_v55 = vld [vmem:[#allocation8 + $0x138] sm:$0xff]  }
 0x185   : > { %2979 = vmatprep.mubr.bf16.mxu1 %v940_v58  ;;  %3009 = vmatprep.subr.bf16.mxu1 %v3326_v14  ;;  %v1811_v37 = vpack.c.bf16 %v1807_v46, %v1808_v49  ;;  %v2100_v53 = vmul.bf16 %v4162_v26, %v3986_v25  ;;  %v1954_v56 = vpack.c.bf16 %v4059_v21, %v4124_v3  ;;  %v3339_v46 = vld [vmem:[#allocation8 + $0x128] sm:$0xff]   ;;  %v3340_v49 = vld [vmem:[#allocation8 + $0x178] sm:$0xff]   ;;  %v3378_v21 = vld [vmem:[#allocation10 + $0x30] sm:$0xff]  }
 0x186   : > { %2990 = vmatpush3.bf16.msra.mxu0 %v3325_v13  ;;  %v2096_v24 = vsel %vm1213_vm8, %v1657_v9, %v2093_v33  ;;  %v941_v59 = vmul.bf16 %v4132_v48, %v4030_v61  ;;  %v2095_v8 = vsel %vm1213_vm8, %v2093_v33, %v2094_v28  ;;  %v1375_v10 = vmul.bf16 %v1373_v43, %v4004_v38  ;;  %v3330_v13 = vld [vmem:[#allocation8 + $0xe0] sm:$0xff]   ;;  %v3337_v33 = vld [vmem:[#allocation8 + $0x130] sm:$0xff]   ;;  %v3379_v3 = vld [vmem:[#allocation10 + $0x28] sm:$0xff]  }
 0x187   : > { %2991 = vmatprep.subr.bf16.mxu0 %v3327_v62  ;;  %v2098_v6 = vpack.c.bf16 %v2096_v24, %v4172_v29  ;;  %v4211_v1 = vmul.bf16 %v1811_v37, %v4030_v61  ;;  %v2097_v9 = vsel %vm1213_vm8, %v2094_v28, %v4037_v4  ;;  %v1217_v5 = vsel %vm1213_vm8, %v1208_v12, %v4037_v4  ;;  %v3336_v28 = vld [vmem:[#allocation8 + $0xc8] sm:$0xff]   ;;  %v3367_v29 = vld [vmem:[#allocation8 + $0x238] sm:$0xff]  }
 0x188   : > { %3010 = vmatpush3.bf16.msra.mxu1 %v3326_v14  ;;  %v2099_v58 = vpack.c.bf16 %v2097_v9, %v2095_v8  ;;  %v3331_v14 = vld [vmem:[#allocation8 + $0x88] sm:$0xff]   ;;  %v1218_v20 = vsel %vm1213_vm8, %v4042_v7, %v1208_v12  ;;  %v1228_v4 = vmul.bf16 %v4162_v26, %v4120_v2  ;;  %v3338_v7 = vld [vmem:[#allocation8 + $0xc0] sm:$0xff]   ;;  %v1368_v37 = vrot.slane %v4090_v34, 7  ;;  %v3345_v8 = vld [vmem:[#allocation8 + $0x110] sm:$0xff]  }
 0x189   : > { %3011 = vmatprep.subr.bf16.mxu1 %v3328_v35  ;;  %v4217_v57 = vmul.bf16 %v2098_v6, %v4120_v2  ;;  %v1223_v11 = vpack.c.bf16 %v1217_v5, %v1218_v20  ;;  %v3343_v6 = vld [vmem:[#allocation8 + $0x118] sm:$0xff]   ;;  %v3349_v9 = vld [vmem:[#allocation8 + $0x100] sm:$0xff]   ;;  %v3353_v12 = vld [vmem:[#allocation8 + $0x1b0] sm:$0xff]   ;;  %v4260_v20 = vpack.c.bf16 %v4064_v27, %v4090_v34 }
 0x18a   : > { %2992 = vmatpush3.bf16.msra.mxu0 %v3327_v62  ;;  %v4220_v38 = vmul.bf16 %v2099_v58, %v4189_v42  ;;  %v3350_v58 = vld [vmem:[#allocation8 + $0x150] sm:$0xff]   ;;  %v3356_v5 = vld [vmem:[#allocation8 + $0x1f8] sm:$0xff]   ;;  %v3360_v34 = vld [vmem:[#allocation8 + $0x1e8] sm:$0xff]  }
 0x18b   : > { %2980 = vmatmul.mubr.bf16.gmra.mxu1 %v941_v59  ;;  %2993 = vmatprep.subr.bf16.mxu0 %v3329_v63  ;;  %v1227_v62 = vmul.bf16 %v1223_v11, %v4017_v51  ;;  %v1370_v59 = vsel %vm925_vm7, %v1368_v37, %v4109_v47  ;;  %v1663_v45 = vmul.bf16 %v1223_v11, %v3986_v25  ;;  %v3359_v27 = vld [vmem:[#allocation8 + $0x198] sm:$0xff]   ;;  %v3376_v25 = vld [vmem:[#allocation8 + $0x200] sm:$0xff]  }
 0x18c   : > { %3023 = vmatprep.mubr.bf16.mxu1 %v1375_v10  ;;  %3012 = vmatpush3.bf16.msra.mxu1 %v3328_v35  ;;  %v1221_v35 = vsel %vm1213_vm8, %v4115_v60, %v1205_v16  ;;  %v1376_v16 = vmul.bf16 %v4106_v40, %v4007_v39  ;;  %v3342_v60 = vld [vmem:[#allocation8 + $0x170] sm:$0xff]   ;;  %v3346_v10 = vld [vmem:[#allocation8 + $0x160] sm:$0xff]   ;;  %v1664_v11 = vmul.bf16 %v4162_v26, %v4017_v51  ;;  %v3373_v39 = vld [vmem:[#allocation8 + $0x218] sm:$0xff]  }
 0x18d   : > { %3013 = vmatprep.subr.bf16.mxu1 %v3330_v13  ;;  %v1225_v43 = vpack.c.bf16 %v1221_v35, %v4153_v15  ;;  %v1377_v15 = vmul.bf16 %v4132_v48, %v4014_v50  ;;  %v3366_v35 = vld [vmem:[#allocation8 + $0x1d0] sm:$0xff]   ;;  %v3375_v48 = vld [vmem:[#allocation8 + $0x208] sm:$0xff]   ;;  %v3380_v26 = vld [vmem:[#allocation10 + $0x20] sm:$0xff]  }
 0x18e   : > { %2994 = vmatpush3.bf16.msra.mxu0 %v3329_v63  ;;  %v1371_v63 = vsel %vm925_vm7, %v4075_v30, %v1368_v37  ;;  %v3347_v30 = vld [vmem:[#allocation8 + $0x108] sm:$0xff]   ;;  %v3382_v51 = vld [vmem:[#allocation10 + $0x10] sm:$0xff]  }
 0x18f   : > { %2995 = vmatprep.subr.bf16.mxu0 %v3331_v14  ;;  %v1229_v24 = vmul.bf16 %v1225_v43, %v4189_v42  ;;  %v4251_v40 = vpack.c.bf16 %v1370_v59, %v1371_v63  ;;  %v3371_v43 = vld [vmem:[#allocation8 + $0x228] sm:$0xff]  }
 0x190   : > { %3014 = vmatpush3.bf16.msra.mxu1 %v3330_v13  ;;  %v3348_v13 = vld [vmem:[#allocation8 + $0x158] sm:$0xff]  }
 0x191   : > { %3015 = vmatprep.subr.bf16.mxu1 %v3332_v17  ;;  %v1378_v47 = vmul.bf16 %v4251_v40, %v4030_v61  ;;  %v3351_v61 = vld [vmem:[#allocation8 + $0x1b8] sm:$0xff]  }
 0x192   : > { %2996 = vmatpush3.bf16.msra.mxu0 %v3331_v14  ;;  %v3352_v14 = vld [vmem:[#allocation8 + $0x148] sm:$0xff]  }
 0x193   : > { %2997 = vmatprep.subr.bf16.mxu0 %v3333_v18 }
 0x194   : > { %3016 = vmatpush3.bf16.msra.mxu1 %v3332_v17  ;;  %v3354_v17 = vld [vmem:[#allocation8 + $0x140] sm:$0xff]  }
 0x195   : > { %3017 = vmatprep.subr.bf16.mxu1 %v3334_v23 }
 0x196   : > { %2998 = vmatpush3.bf16.msra.mxu0 %v3333_v18  ;;  %v3355_v18 = vld [vmem:[#allocation8 + $0x1a8] sm:$0xff]  }
 0x197   : > { %3031 = vmatprep.subr.bf16.mxu0 %v3335_v55 }
 0x198   : > { %3018 = vmatpush3.bf16.msra.mxu1 %v3334_v23  ;;  %v3357_v23 = vld [vmem:[#allocation8 + $0x1a0] sm:$0xff]  }
 0x199   : > { %3019 = vmatprep.subr.bf16.mxu1 %v3336_v28  ;;  %3000 = vmatmul.mubr.bf16.vlgmr.msra.gmra.mxu0 %v1227_v62  ;;  %v3361_v62 = vld [vmem:[#allocation8 + $0x190] sm:$0xff]  }
 0x19a   : > { %3003 = vmatprep.mubr.bf16.mxu0 %v1228_v4  ;;  %3032 = vmatpush3.bf16.msra.mxu0 %v3335_v55  ;;  %v3358_v55 = vld [vmem:[#allocation8 + $0x1f0] sm:$0xff]   ;;  %v3364_v4 = vld [vmem:[#allocation8 + $0x1d8] sm:$0xff]  }
 0x19b   : > { %3033 = vmatprep.subr.bf16.mxu0 %v3337_v33 }
 0x19c   : > { %3020 = vmatpush3.bf16.msra.mxu1 %v3336_v28  ;;  %v1665_v28 = vmul.bf16 %v4166_v19, %v4120_v2  ;;  %v3363_v2 = vld [vmem:[#allocation8 + $0x188] sm:$0xff]  }
 0x19d   : > { %3021 = vmatprep.subr.bf16.mxu1 %v3338_v7 }
 0x19e   : > { %3034 = vmatpush3.bf16.msra.mxu0 %v3337_v33  ;;  %v1666_v33 = vmul.bf16 %v1662_v44, %v4189_v42  ;;  %v3369_v42 = vld [vmem:[#allocation8 + $0x230] sm:$0xff]   ;;  %v3370_v44 = vld [vmem:[#allocation8 + $0x1c0] sm:$0xff]  }
 0x19f   : > { %3035 = vmatprep.subr.bf16.mxu0 %v3339_v46 }
 0x1a0   : > { %3022 = vmatpush3.bf16.msra.mxu1 %v3338_v7  ;;  %v3365_v7 = vld [vmem:[#allocation8 + $0x180] sm:$0xff]  }
 0x1a1   : > { %3055 = vmatprep.subr.bf16.mxu1 %v3340_v49  ;;  %3004 = vmatmul.mubr.bf16.gmra.mxu0 %v1229_v24 }
 0x1a2   : > { %3036 = vmatpush3.bf16.msra.mxu0 %v3339_v46  ;;  %3047 = vmatprep.mubr.bf16.mxu0 %v4062_v22  ;;  %v3344_v22 = vld [vmem:[#allocation8 + $0x168] sm:$0xff]   ;;  %v3372_v46 = vld [vmem:[#allocation8 + $0x220] sm:$0xff]  }
 0x1a3   : > { %3024 = vmatmul.mubr.bf16.vlgmr.msra.gmra.mxu1 %v1376_v16  ;;  %3037 = vmatprep.subr.bf16.mxu0 %v3341_v54 }
 0x1a4   : > { %3027 = vmatprep.mubr.bf16.mxu1 %v1377_v15  ;;  %3056 = vmatpush3.bf16.msra.mxu1 %v3340_v49 }
 0x1a5   : > { %3057 = vmatprep.subr.bf16.mxu1 %v3342_v60 }
 0x1a6   : > { %3038 = vmatpush3.bf16.msra.mxu0 %v3341_v54 }
 0x1a7   : > { %3039 = vmatprep.subr.bf16.mxu0 %v3343_v6 }
 0x1a8   : > { %3058 = vmatpush3.bf16.msra.mxu1 %v3342_v60 }
 0x1a9   : > { %3059 = vmatprep.subr.bf16.mxu1 %v3344_v22 }
 0x1aa   : > { %3040 = vmatpush3.bf16.msra.mxu0 %v3343_v6 }
 0x1ab   : > { %3028 = vmatmul.mubr.bf16.gmra.mxu1 %v1378_v47  ;;  %3041 = vmatprep.subr.bf16.mxu0 %v3345_v8 }
 0x1ac   : > { %3060 = vmatpush3.bf16.msra.mxu1 %v3344_v22  ;;  %3071 = vmatprep.mubr.bf16.mxu1 %v1663_v45 }
 0x1ad   : > { %3061 = vmatprep.subr.bf16.mxu1 %v3346_v10 }
 0x1ae   : > { %3042 = vmatpush3.bf16.msra.mxu0 %v3345_v8 }
 0x1af   : > { %3043 = vmatprep.subr.bf16.mxu0 %v3347_v30 }
 0x1b0   : > { %3062 = vmatpush3.bf16.msra.mxu1 %v3346_v10 }
 0x1b1   : > { %3063 = vmatprep.subr.bf16.mxu1 %v3348_v13 }
 0x1b2   : > { %3044 = vmatpush3.bf16.msra.mxu0 %v3347_v30 }
 0x1b3   : > { %3045 = vmatprep.subr.bf16.mxu0 %v3349_v9 }
 0x1b4   : > { %3064 = vmatpush3.bf16.msra.mxu1 %v3348_v13 }
 0x1b5   : > { %3065 = vmatprep.subr.bf16.mxu1 %v3350_v58 }
 0x1b6   : > { %3046 = vmatpush3.bf16.msra.mxu0 %v3349_v9 }
 0x1b7   : > { %3079 = vmatprep.subr.bf16.mxu0 %v3351_v61 }
 0x1b8   : > { %3066 = vmatpush3.bf16.msra.mxu1 %v3350_v58 }
 0x1b9   : > { %3048 = vmatmul.mubr.bf16.vlgmr.msra.gmra.mxu0 %v4067_v52  ;;  %3067 = vmatprep.subr.bf16.mxu1 %v3352_v14 }
 0x1ba   : > { %3051 = vmatprep.mubr.bf16.mxu0 %v4117_v0  ;;  %3080 = vmatpush3.bf16.msra.mxu0 %v3351_v61 }
 0x1bb   : > { %3081 = vmatprep.subr.bf16.mxu0 %v3353_v12 }
 0x1bc   : > { %3068 = vmatpush3.bf16.msra.mxu1 %v3352_v14 }
 0x1bd   : > { %3069 = vmatprep.subr.bf16.mxu1 %v3354_v17 }
 0x1be   : > { %3082 = vmatpush3.bf16.msra.mxu0 %v3353_v12 }
 0x1bf   : > { %3083 = vmatprep.subr.bf16.mxu0 %v3355_v18 }
 0x1c0   : > { %3070 = vmatpush3.bf16.msra.mxu1 %v3354_v17 }
 0x1c1   : > { %3052 = vmatmul.mubr.bf16.gmra.mxu0 %v4260_v20  ;;  %3103 = vmatprep.subr.bf16.mxu1 %v3356_v5 }
 0x1c2   : > { %3084 = vmatpush3.bf16.msra.mxu0 %v3355_v18  ;;  %3095 = vmatprep.mubr.bf16.mxu0 %v4184_v36  ;;  %v3362_v36 = vld [vmem:[#allocation8 + $0x1e0] sm:$0xff]  }
 0x1c3   : > { %3072 = vmatmul.mubr.bf16.vlgmr.msra.gmra.mxu1 %v1664_v11  ;;  %3085 = vmatprep.subr.bf16.mxu0 %v3357_v23 }
 0x1c4   : > { %3075 = vmatprep.mubr.bf16.mxu1 %v1665_v28  ;;  %3104 = vmatpush3.bf16.msra.mxu1 %v3356_v5 }
 0x1c5   : > { %3105 = vmatprep.subr.bf16.mxu1 %v3358_v55 }
 0x1c6   : > { %3086 = vmatpush3.bf16.msra.mxu0 %v3357_v23 }
 0x1c7   : > { %3087 = vmatprep.subr.bf16.mxu0 %v3359_v27 }
 0x1c8   : > { %3106 = vmatpush3.bf16.msra.mxu1 %v3358_v55 }
 0x1c9   : > { %3107 = vmatprep.subr.bf16.mxu1 %v3360_v34 }
 0x1ca   : > { %3088 = vmatpush3.bf16.msra.mxu0 %v3359_v27 }
 0x1cb   : > { %3076 = vmatmul.mubr.bf16.gmra.mxu1 %v1666_v33  ;;  %3089 = vmatprep.subr.bf16.mxu0 %v3361_v62 }
 0x1cc   : > { %3108 = vmatpush3.bf16.msra.mxu1 %v3360_v34  ;;  %3119 = vmatprep.mubr.bf16.mxu1 %v4067_v52  ;;  %v1814_v52 = vmul.bf16 %v4251_v40, %v4014_v50  ;;  %v3374_v50 = vld [vmem:[#allocation8 + $0x210] sm:$0xff]  }
 0x1cd   : > { %3109 = vmatprep.subr.bf16.mxu1 %v3362_v36 }
 0x1ce   : > { %3090 = vmatpush3.bf16.msra.mxu0 %v3361_v62 }
 0x1cf   : > { %3091 = vmatprep.subr.bf16.mxu0 %v3363_v2 }
 0x1d0   : > { %3110 = vmatpush3.bf16.msra.mxu1 %v3362_v36 }
 0x1d1   : > { %3111 = vmatprep.subr.bf16.mxu1 %v3364_v4 }
 0x1d2   : > { %3092 = vmatpush3.bf16.msra.mxu0 %v3363_v2 }
 0x1d3   : > { %3093 = vmatprep.subr.bf16.mxu0 %v3365_v7 }
 0x1d4   : > { %3112 = vmatpush3.bf16.msra.mxu1 %v3364_v4 }
 0x1d5   : > { %3113 = vmatprep.subr.bf16.mxu1 %v3366_v35 }
 0x1d6   : > { %3094 = vmatpush3.bf16.msra.mxu0 %v3365_v7 }
 0x1d7   : > { %3127 = vmatprep.subr.bf16.mxu0 %v3367_v29 }
 0x1d8   : > { %3114 = vmatpush3.bf16.msra.mxu1 %v3366_v35 }
 0x1d9   : > { %3096 = vmatmul.mubr.bf16.vlgmr.msra.gmra.mxu0 %v1813_v32  ;;  %3115 = vmatprep.subr.bf16.mxu1 %v3368_v31  ;;  %v3381_v32 = vld [vmem:[#allocation10 + $0x18] sm:$0xff]  }
 0x1da   : > { %3099 = vmatprep.mubr.bf16.mxu0 %v1814_v52  ;;  %3128 = vmatpush3.bf16.msra.mxu0 %v3367_v29 }
 0x1db   : > { %3129 = vmatprep.subr.bf16.mxu0 %v3369_v42 }
 0x1dc   : > { %3116 = vmatpush3.bf16.msra.mxu1 %v3368_v31 }
 0x1dd   : > { %3117 = vmatprep.subr.bf16.mxu1 %v3370_v44 }
 0x1de   : > { %3130 = vmatpush3.bf16.msra.mxu0 %v3369_v42 }
 0x1df   : > { %3131 = vmatprep.subr.bf16.mxu0 %v3371_v43 }
 0x1e0   : > { %3118 = vmatpush3.bf16.msra.mxu1 %v3370_v44 }
 0x1e1   : > { %3100 = vmatmul.mubr.bf16.gmra.mxu0 %v4211_v1 }
 0x1e2   : > { %3132 = vmatpush3.bf16.msra.mxu0 %v3371_v43  ;;  %3143 = vmatprep.mubr.bf16.mxu0 %v2100_v53 }
 0x1e3   : > { %3120 = vmatmul.mubr.bf16.vlgmr.msra.gmra.mxu1 %v4117_v0  ;;  %3133 = vmatprep.subr.bf16.mxu0 %v3372_v46  ;;  %v3377_v0 = vld [vmem:[#allocation10 + $0x38] sm:$0xff]  }
 0x1e4   : > { %3123 = vmatprep.mubr.bf16.mxu1 %v4260_v20  ;;  %3151 = vmatprep.subr.bf16.mxu1 %v3377_v0 }
 0x1e5   : > { %3152 = vmatpush3.bf16.msra.mxu1 %v3377_v0 }
 0x1e6   : > { %3134 = vmatpush3.bf16.msra.mxu0 %v3372_v46  ;;  %3153 = vmatprep.subr.bf16.mxu1 %v3378_v21 }
 0x1e7   : > { %3135 = vmatprep.subr.bf16.mxu0 %v3373_v39 }
 0x1e9   : > { %3154 = vmatpush3.bf16.msra.mxu1 %v3378_v21 }
 0x1ea   : > { %3136 = vmatpush3.bf16.msra.mxu0 %v3373_v39  ;;  %3155 = vmatprep.subr.bf16.mxu1 %v3379_v3 }
 0x1eb   : > { %3124 = vmatmul.mubr.bf16.gmra.mxu1 %v1954_v56  ;;  %3137 = vmatprep.subr.bf16.mxu0 %v3374_v50 }
 0x1ed   : > { %3156 = vmatpush3.bf16.msra.mxu1 %v3379_v3 }
 0x1ee   : > { %3138 = vmatpush3.bf16.msra.mxu0 %v3374_v50  ;;  %3157 = vmatprep.subr.bf16.mxu1 %v3380_v26 }
 0x1ef   : > { %3139 = vmatprep.subr.bf16.mxu0 %v3375_v48 }
 0x1f1   : > { %3158 = vmatpush3.bf16.msra.mxu1 %v3380_v26 }
 0x1f2   : > { %3140 = vmatpush3.bf16.msra.mxu0 %v3375_v48  ;;  %3159 = vmatprep.subr.bf16.mxu1 %v3381_v32 }
 0x1f3   : > { %3141 = vmatprep.subr.bf16.mxu0 %v3376_v25 }
 0x1f5   : > { %3160 = vmatpush3.bf16.msra.mxu1 %v3381_v32 }
 0x1f6   : > { %3142 = vmatpush3.bf16.msra.mxu0 %v3376_v25  ;;  %3161 = vmatprep.subr.bf16.mxu1 %v3382_v51 }
 0x1f9   : > { %3144 = vmatmul.mubr.bf16.vlgmr.msra.gmra.mxu0 %v2101_v41  ;;  %3162 = vmatpush3.bf16.msra.mxu1 %v3382_v51  ;;  %v3383_v41 = vld [vmem:[#allocation10 + $0x8] sm:$0xff]  }
 0x1fa   : > { %3147 = vmatprep.mubr.bf16.mxu0 %v4217_v57  ;;  %3163 = vmatprep.subr.bf16.mxu1 %v3383_v41  ;;  %v3384_v57 = vld [vmem:[#allocation10] sm:$0xff]  }
 0x1fd   : > { %3164 = vmatpush3.bf16.msra.mxu1 %v3383_v41 }
 0x1fe   : > { %3165 = vmatprep.subr.bf16.mxu1 %v3384_v57 }
 0x201   : > { %3148 = vmatmul.mubr.bf16.gmra.mxu0 %v4220_v38  ;;  %3166 = vmatpush3.bf16.msra.mxu1 %v3384_v57 }
 0x239   : > { %v4292_v53 = vpop.f32.mrf.mxu0 }
 0x23b   : > { %v4294_v19 = vpop.f32.mrf.mxu0 }
 0x23d   : > { %v4296_v56 = vpop.f32.mrf.mxu0 }
 0x23f   : > { %v1064_v38 = vpop.f32.mrf.mxu0 }
 0x241   : > { %v4298_v49 = vpop.f32.mrf.mxu0 }
 0x243   : > { %v2977_v1 = vpop.f32.mrf.mxu1  ;;  %v4300_v24 = vpop.f32.mrf.mxu0 }
 0x244   : > { %v1183_v25 = vadd.f32 %v2977_v1, %v4292_v53 }
 0x245   : > { %v1174_v37 = vpop.f32.mrf.mxu1  ;;  %v4302_v16 = vpop.f32.mrf.mxu0 }
 0x246   : > { %v1175_v0 = vadd.f32 %v1174_v37, %v4294_v19 }
 0x247   : > { %v2978_v54 = vpop.f32.mrf.mxu1  ;;  %v4304_v15 = vpop.f32.mrf.mxu0 }
 0x248   : > { %v1186_v32 = vadd.f32 %v2978_v54, %v4296_v56 }
 0x249   : > { %v1177_v60 = vpop.f32.mrf.mxu1 }
 0x24a   : > { %v1178_v57 = vadd.f32 %v1177_v60, %v1064_v38 }
 0x24b   : > { %v2981_v59 = vpop.f32.mrf.mxu1 }
 0x24c   : > { %v1199_v53 = vadd.f32 %v2981_v59, %v4298_v49 }
 0x24d   : > { %v1190_v6 = vpop.f32.mrf.mxu1 }
 0x24e   : > { %v1191_v1 = vadd.f32 %v1190_v6, %v4300_v24 }
 0x24f   : > { %v4306_v22 = vpop.f32.mrf.mxu1 }
 0x251   : > { %v4308_v47 = vpop.f32.mrf.mxu1 }
 0x252   : > { %v1194_v49 = vadd.f32 %v4308_v47, %v4304_v15  ;;  %v2731_v15 = vld [vmem:[%s4520_s28] ss:$0 sm:$0xff]  ;;  %s2468_s28 = scalar_lea.sflag [#allocation4], %s3884_s0 }
 0x259   : > { %v3001_v63 = vpop.f32.mrf.mxu0 }
 0x25a   : > { %v1362_v21 = vadd.f32 %v3001_v63, %v1183_v25 }
 0x25b   : > { %v1329_v40 = vpop.f32.mrf.mxu0 }
 0x25c   : > { %v1360_v51 = vadd.f32 %v1329_v40, %v1175_v0 }
 0x25d   : > { %v3002_v8 = vpop.f32.mrf.mxu0 }
 0x25f   : > { %v1332_v10 = vpop.f32.mrf.mxu0 }
 0x261   : > { %v3005_v30 = vpop.f32.mrf.mxu0 }
 0x262   : > { %v1366_v54 = vadd.f32 %v3005_v30, %v1199_v53 }
 0x263   : > { %v3025_v45 = vpop.f32.mrf.mxu1  ;;  %v1345_v9 = vpop.f32.mrf.mxu0 }
 0x264   : > { %v1511_v41 = vadd.f32 %v3025_v45, %v1362_v21  ;;  %v2732_v21 = vld [vmem:[%s4527_s16] ss:$0 sm:$0xff] }
 0x265   : > { %v1478_v13 = vpop.f32.mrf.mxu1  ;;  %v4310_v61 = vpop.f32.mrf.mxu0 }
 0x267   : > { %v3026_v58 = vpop.f32.mrf.mxu1  ;;  %v4312_v12 = vpop.f32.mrf.mxu0 }
 0x269   : > { %v1481_v14 = vpop.f32.mrf.mxu1 }
 0x26b   : > { %v3029_v17 = vpop.f32.mrf.mxu1 }
 0x26c   : > { %v1515_v59 = vadd.f32 %v3029_v17, %v1366_v54 }
 0x26d   : > { %v1494_v5 = vpop.f32.mrf.mxu1 }
 0x26f   : > { %v4314_v23 = vpop.f32.mrf.mxu1 }
 0x271   : > { %v4316_v55 = vpop.f32.mrf.mxu1 }
 0x272   : > { %4512 = vst [vmem:[#allocation25_spill] sm:$0xff] %v4316_v55 }
 0x279   : > { %v3049_v18 = vpop.f32.mrf.mxu0 }
 0x27b   : > { %v1617_v20 = vpop.f32.mrf.mxu0 }
 0x27d   : > { %v3050_v11 = vpop.f32.mrf.mxu0 }
 0x27f   : > { %v1620_v28 = vpop.f32.mrf.mxu0 }
 0x281   : > { %v3053_v34 = vpop.f32.mrf.mxu0 }
 0x283   : > { %v3073_v27 = vpop.f32.mrf.mxu1  ;;  %v1633_v33 = vpop.f32.mrf.mxu0 }
 0x285   : > { %v1766_v62 = vpop.f32.mrf.mxu1  ;;  %v4318_v2 = vpop.f32.mrf.mxu0 }
 0x286   : > { %4513 = vst [vmem:[#allocation26_spill] sm:$0xff] %v4318_v2 }
 0x287   : > { %v3074_v36 = vpop.f32.mrf.mxu1  ;;  %v4320_v7 = vpop.f32.mrf.mxu0 }
 0x288   : > { %4514 = vst [vmem:[#allocation27_spill] sm:$0xff] %v4320_v7  ;;  %v1509_v7 = vadd.f32 %v1478_v13, %v1360_v51 }
 0x289   : > { %v1769_v4 = vpop.f32.mrf.mxu1 }
 0x28a   : > { %v1648_v55 = vadd.f32 %v1617_v20, %v1509_v7 }
 0x28b   : > { %v4322_v35 = vpop.f32.mrf.mxu1 }
 0x28c   : > { %4515 = vst [vmem:[#allocation28_spill] sm:$0xff] %v4322_v35  ;;  %v1797_v56 = vadd.f32 %v1766_v62, %v1648_v55  ;;  %v1654_v55 = vadd.f32 %v3053_v34, %v1515_v59 }
 0x28d   : > { %v4324_v31 = vpop.f32.mrf.mxu1 }
 0x28e   : > { %4516 = vst [vmem:[#allocation29_spill] sm:$0xff] %v4324_v31 }
 0x28f   : > { %v4326_v52 = vpop.f32.mrf.mxu1 }
 0x290   : > { %4517 = vst [vmem:[#allocation30_spill] sm:$0xff] %v4326_v52  ;;  %v1363_v52 = vadd.f32 %v3002_v8, %v1186_v32  ;;  %v1364_v8 = vadd.f32 %v1345_v9, %v1191_v1  ;;  %v1365_v9 = vadd.f32 %v4312_v12, %v1194_v49 }
 0x291   : > { %v4328_v43 = vpop.f32.mrf.mxu1 }
 0x292   : > { %4518 = vst [vmem:[#allocation31_spill] sm:$0xff] %v4328_v43  ;;  %v1650_v43 = vadd.f32 %v3049_v18, %v1511_v41  ;;  %v1512_v35 = vadd.f32 %v3026_v58, %v1363_v52  ;;  %v1513_v6 = vadd.f32 %v1494_v5, %v1364_v8  ;;  %v4521_v5 = vld [vmem:[#allocation25_spill] sm:$0xff] }
 0x293   : > { %v4522_v7 = vld [vmem:[#allocation28_spill] sm:$0xff] }
 0x294   : > { %v1799_v19 = vadd.f32 %v3073_v27, %v1650_v43  ;;  %v1651_v63 = vadd.f32 %v3050_v11, %v1512_v35  ;;  %v4525_v43 = vld [vmem:[#allocation27_spill] sm:$0xff] }
 0x295   : > { %v4523_v12 = vld [vmem:[#allocation29_spill] sm:$0xff] }
 0x296   : > { %v1800_v13 = vadd.f32 %v3074_v36, %v1651_v63  ;;  %v1652_v36 = vadd.f32 %v1633_v33, %v1513_v6  ;;  %v4524_v33 = vld [vmem:[#allocation26_spill] sm:$0xff] }
 0x297   : > { %v4528_v51 = vld [vmem:[#allocation30_spill] sm:$0xff] }
 0x298   : > { %v1801_v34 = vadd.f32 %v4523_v12, %v1652_v36  ;;  %v2742_v12 = vld [vmem:[%s4531_s25] ss:$0 sm:$0xff] }
 0x299   : > { %v3097_v29 = vpop.f32.mrf.mxu0  ;;  %v4529_v41 = vld [vmem:[#allocation31_spill] sm:$0xff] }
 0x29a   : > { %v1948_v40 = vadd.f32 %v3097_v29, %v1799_v19 }
 0x29b   : > { %v1915_v42 = vpop.f32.mrf.mxu0 }
 0x29c   : > { %v1946_v18 = vadd.f32 %v1915_v42, %v1797_v56 }
 0x29d   : > { %v3098_v44 = vpop.f32.mrf.mxu0 }
 0x29e   : > { %v1949_v20 = vadd.f32 %v3098_v44, %v1800_v13 }
 0x29f   : > { %v1918_v46 = vpop.f32.mrf.mxu0 }
 0x2a1   : > { %v4330_v50 = vpop.f32.mrf.mxu0 }
 0x2a2   : > { %4519 = vst [vmem:[#allocation32_spill] sm:$0xff] %v4330_v50  ;;  %v1361_v50 = vadd.f32 %v1332_v10, %v1178_v57  ;;  %v1202_v10 = vadd.f32 %v4306_v22, %v4302_v16 }
 0x2a3   : > { %v3121_v39 = vpop.f32.mrf.mxu1  ;;  %v1931_v3 = vpop.f32.mrf.mxu0 }
 0x2a4   : > { %v1510_v37 = vadd.f32 %v1481_v14, %v1361_v50  ;;  %v2087_v58 = vadd.f32 %v3121_v39, %v1948_v40  ;;  %v1367_v11 = vadd.f32 %v4310_v61, %v1202_v10  ;;  %v1803_v61 = vadd.f32 %v4522_v7, %v1654_v55 }
 0x2a5   : > { %v2054_v48 = vpop.f32.mrf.mxu1  ;;  %v4335_v2 = vpop.f32.mrf.mxu0 }
 0x2a6   : > { %v1649_v45 = vadd.f32 %v1620_v28, %v1510_v37  ;;  %v2085_v30 = vadd.f32 %v2054_v48, %v1946_v18  ;;  %v1516_v17 = vadd.f32 %v4314_v23, %v1367_v11  ;;  %v1950_v23 = vadd.f32 %v1931_v3, %v1801_v34 }
 0x2a7   : > { %v3122_v26 = vpop.f32.mrf.mxu1  ;;  %v1934_v38 = vpop.f32.mrf.mxu0 }
 0x2a8   : > { %v1798_v14 = vadd.f32 %v1769_v4, %v1649_v45  ;;  %v2088_v22 = vadd.f32 %v3122_v26, %v1949_v20  ;;  %v1514_v4 = vadd.f32 %v4521_v5, %v1365_v9  ;;  %v1655_v44 = vadd.f32 %v4524_v33, %v1516_v17 }
 0x2a9   : > { %v2057_v31 = vpop.f32.mrf.mxu1  ;;  %v4526_v39 = vld [vmem:[#allocation32_spill] sm:$0xff] }
 0x2aa   : > { %v1947_v16 = vadd.f32 %v1918_v46, %v1798_v14  ;;  %v1653_v46 = vadd.f32 %v4525_v43, %v1514_v4  ;;  %v1952_v50 = vadd.f32 %v4526_v39, %v1803_v61 }
 0x2ab   : > { %v3125_v60 = vpop.f32.mrf.mxu1 }
 0x2ac   : > { %v2086_v29 = vadd.f32 %v2057_v31, %v1947_v16  ;;  %v1804_v31 = vadd.f32 %v4528_v51, %v1655_v44  ;;  %v1802_v57 = vadd.f32 %v4529_v41, %v1653_v46  ;;  %v2091_v53 = vadd.f32 %v3125_v60, %v1952_v50  ;;  %v3385_v44 = vld [vmem:[%s3890_s10 + $0x10] sm:$0xff]  ;;  %v3387_v51 = vld [vmem:[%s3890_s10 + $0x18] sm:$0xff] }
 0x2ad   : > { %v2070_v28 = vpop.f32.mrf.mxu1 }
 0x2ae   : > { %v2089_v1 = vadd.f32 %v2070_v28, %v1950_v23  ;;  %v1953_v54 = vadd.f32 %v4335_v2, %v1804_v31  ;;  %v1951_v13 = vadd.f32 %v1934_v38, %v1802_v57 }
 0x2af   : > { %v3126_v48 = vpop.f32.mrf.mxu1 }
 0x2b0   : > { %v2092_v49 = vadd.f32 %v3126_v48, %v1953_v54 }
 0x2b1   : > { %v2073_v40 = vpop.f32.mrf.mxu1 }
 0x2b9   : > { %v3145_v24 = vpop.f32.mrf.mxu0 }
 0x2ba   : > { %v2236_v27 = vadd.f32 %v3145_v24, %v2087_v58  ;;  %v2090_v24 = vadd.f32 %v2073_v40, %v1951_v13 }
 0x2bb   : > { %v2203_v62 = vpop.f32.mrf.mxu0 }
 0x2bc   : > { %v2234_v47 = vadd.f32 %v2203_v62, %v2085_v30  ;;  %v2251_v25 = vmul.f32 %v2731_v15, %v2236_v27 }
 0x2bd   : > { %v3146_v35 = vpop.f32.mrf.mxu0 }
 0x2be   : > { %v2249_v42 = vmul.f32 %v2731_v15, %v2234_v47  ;;  %v2237_v52 = vadd.f32 %v3146_v35, %v2088_v22  ;;  %v2266_v3 = vadd.f32 %v2732_v21, %v2251_v25  ;;  %v2741_v35 = vld [vmem:[%s4530_s29] ss:$0 sm:$0xff] }
 0x2bf   : > { %v2206_v0 = vpop.f32.mrf.mxu0  ;;  %v3386_v25 = vld [vmem:[%s3890_s10] sm:$0xff] }
 0x2c0   : > { %v2252_v26 = vmul.f32 %v2731_v15, %v2237_v52  ;;  %v2235_v32 = vadd.f32 %v2206_v0, %v2086_v29  ;;  %v2264_v37 = vadd.f32 %v2732_v21, %v2249_v42  ;;  %v2274_v20 = vmax.f32 %v2266_v3, 0.0  ;;  %v3389_v3 = vld [vmem:[%s3890_s10 + $0x30] sm:$0xff] }
 0x2c1   : > { %v3149_v19 = vpop.f32.mrf.mxu0 }
 0x2c2   : > { %v2267_v63 = vadd.f32 %v2732_v21, %v2252_v26  ;;  %v2250_v56 = vmul.f32 %v2731_v15, %v2235_v32  ;;  %v2240_v8 = vadd.f32 %v3149_v19, %v2091_v53  ;;  %v2272_v6 = vmax.f32 %v2264_v37, 0.0 }
 0x2c3   : > { %v2219_v45 = vpop.f32.mrf.mxu0 }
 0x2c4   : > { %v2265_v18 = vadd.f32 %v2732_v21, %v2250_v56  ;;  %v2238_v10 = vadd.f32 %v2219_v45, %v2089_v1  ;;  %v2275_v59 = vmax.f32 %v2267_v63, 0.0  ;;  %v2255_v30 = vmul.f32 %v2731_v15, %v2240_v8  ;;  %v3388_v1 = vld [vmem:[%s3890_s10 + $0x8] sm:$0xff] }
 0x2c5   : > { %v3150_v58 = vpop.f32.mrf.mxu0 }
 0x2c6   : > { %v2273_v60 = vmax.f32 %v2265_v18, 0.0  ;;  %v2253_v14 = vmul.f32 %v2731_v15, %v2238_v10  ;;  %v2241_v11 = vadd.f32 %v3150_v58, %v2092_v49  ;;  %v2281_v28 = vpack.c.bf16 %v2275_v59, %v2274_v20  ;;  %v3390_v49 = vld [vmem:[%s3890_s10 + $0x20] sm:$0xff] }
 0x2c7   : > { %v2222_v9 = vpop.f32.mrf.mxu0  ;;  %v2270_v38 = vadd.f32 %v2732_v21, %v2255_v30 }
 0x2c8   : > { %v2239_v55 = vadd.f32 %v2222_v9, %v2090_v24  ;;  %v2280_v2 = vpack.c.bf16 %v2273_v60, %v2272_v6  ;;  %v2256_v27 = vmul.f32 %v2731_v15, %v2241_v11  ;;  %v2268_v62 = vadd.f32 %v2732_v21, %v2253_v14  ;;  %v3391_v60 = vld [vmem:[%s3890_s10 + $0x38] sm:$0xff]  ;;  %v3392_v11 = vld [vmem:[%s3890_s10 + $0x28] sm:$0xff]  ;;  %s3648_s10 = smov [#allocation11]  }
 0x2c9   : > { %v2278_v4 = vmax.f32 %v2270_v38, 0.0  ;;  %s3531_s30 = sshll.u32 %s3648_s10, 4  ;;  %s3532_s30 = int_to_ptr.vmem [resolvable:$false] %s3531_s30 }
 0x2ca   : > { %v2254_v36 = vmul.f32 %v2731_v15, %v2239_v55  ;;  %3167 = vmatprep.mubr.bf16.mxu1 %v2280_v2  ;;  %v2271_v16 = vadd.f32 %v2732_v21, %v2256_v27  ;;  %v2276_v17 = vmax.f32 %v2268_v62, 0.0  ;;  %s3533_s16 = scalar_lea.vmem %s3532_s30, 2048  ;;  %p3534_p2 = scmp.lt.s32.totalorder %s4388_s14, %s3532_s30 }
 0x2cb   : > { %3168 = vmatmul.mubr.bf16.vlgmr.msra.gmra.mxu1 %v2281_v28  ;;  %p3535_p4 = scmp.lt.s32.totalorder %s3533_s16, %s3527_s8 }
 0x2cc   : > { %v2269_v22 = vadd.f32 %v2732_v21, %v2254_v36  ;;  %v2279_v47 = vmax.f32 %v2271_v16, 0.0 }
 0x2cd   : > { %p3536_p6 = por %p3535_p4, %p3534_p2 }
 0x2ce   : > { %v2277_v5 = vmax.f32 %v2269_v22, 0.0  ;;  %v2283_v61 = vpack.c.bf16 %v2279_v47, %v2278_v4 }
 0x2cf   : > { %p3537_p9 = pnand %p3536_p6, %p3530_p12 }
 0x2d0   : > { %v2282_v7 = vpack.c.bf16 %v2277_v5, %v2276_v17 }
 0x2d2   : > { %3171 = vmatprep.mubr.bf16.mxu1 %v2282_v7 }
 0x2d3   : > { %3172 = vmatmul.mubr.bf16.gmra.mxu1 %v2283_v61 }
 0x38b   : > { %v3169_v15 = vpop.f32.mrf.mxu1 }
 0x38c   : > { %v2422_v34 = vmul.f32 %v3169_v15, %v2741_v35 }
 0x38d   : > { %v2382_v29 = vpop.f32.mrf.mxu1 }
 0x38e   : > { %v2437_v42 = vadd.f32 %v2742_v12, %v2422_v34  ;;  %v2420_v52 = vmul.f32 %v2741_v35, %v2382_v29 }
 0x38f   : > { %v3170_v33 = vpop.f32.mrf.mxu1 }
 0x390   : > { %v2445_v43 = vadd.f32 %v3385_v44, %v2437_v42  ;;  %v2435_v46 = vadd.f32 %v2742_v12, %v2420_v52  ;;  %v2423_v39 = vmul.f32 %v3170_v33, %v2741_v35 }
 0x391   : > { %v2385_v50 = vpop.f32.mrf.mxu1 }
 0x392   : > { %v2453_v48 = vmax.f32 %v2445_v43, 0.0  ;;  %v2443_v0 = vadd.f32 %v3386_v25, %v2435_v46  ;;  %v2438_v23 = vadd.f32 %v2742_v12, %v2423_v39  ;;  %v2421_v21 = vmul.f32 %v2741_v35, %v2385_v50 }
 0x393   : > { %v3173_v26 = vpop.f32.mrf.mxu1 }
 0x394   : > { %2461 = vst [vmem:[%s4371_s27 + $0x10] sm:$0xff] %v2453_v48  ;;  %v2451_v32 = vmax.f32 %v2443_v0, 0.0  ;;  %v2446_v31 = vadd.f32 %v3387_v51, %v2438_v23  ;;  %v2436_v41 = vadd.f32 %v2742_v12, %v2421_v21  ;;  %v2426_v57 = vmul.f32 %v3173_v26, %v2741_v35 }
 0x395   : > { %v2398_v53 = vpop.f32.mrf.mxu1 }
 0x396   : > { %2459 = vst [vmem:[%s4371_s27] sm:$0xff] %v2451_v32  ;;  %v2454_v19 = vmax.f32 %v2446_v31, 0.0  ;;  %v2444_v37 = vadd.f32 %v3388_v1, %v2436_v41  ;;  %v2441_v63 = vadd.f32 %v2742_v12, %v2426_v57  ;;  %v2424_v56 = vmul.f32 %v2741_v35, %v2398_v53 }
 0x397   : > { %v3174_v54 = vpop.f32.mrf.mxu1 }
 0x398   : > { %2462 = vst [vmem:[%s4371_s27 + $0x18] sm:$0xff] %v2454_v19  ;;  %v2452_v40 = vmax.f32 %v2444_v37, 0.0  ;;  %v2449_v8 = vadd.f32 %v3389_v3, %v2441_v63  ;;  %v2439_v45 = vadd.f32 %v2742_v12, %v2424_v56  ;;  %v2427_v13 = vmul.f32 %v3174_v54, %v2741_v35 }
 0x399   : > { %v2401_v18 = vpop.f32.mrf.mxu1 }
 0x39a   : > { %2460 = vst [vmem:[%s4371_s27 + $0x8] sm:$0xff] %v2452_v40  ;;  %v2457_v10 = vmax.f32 %v2449_v8, 0.0  ;;  %v2447_v59 = vadd.f32 %v3390_v49, %v2439_v45  ;;  %v2442_v58 = vadd.f32 %v2742_v12, %v2427_v13  ;;  %v2425_v24 = vmul.f32 %v2741_v35, %v2401_v18 }
 0x39c   : > { %2465 = vst [vmem:[%s4371_s27 + $0x30] sm:$0xff] %v2457_v10  ;;  %v2455_v6 = vmax.f32 %v2447_v59, 0.0  ;;  %v2450_v14 = vadd.f32 %v3391_v60, %v2442_v58  ;;  %v2440_v20 = vadd.f32 %v2742_v12, %v2425_v24 }
 0x39e   : > { %2463 = vst [vmem:[%s4371_s27 + $0x20] sm:$0xff] %v2455_v6  ;;  %v2458_v30 = vmax.f32 %v2450_v14, 0.0  ;;  %v2448_v9 = vadd.f32 %v3392_v11, %v2440_v20 }
 0x3a0   : > { %2466 = vst [vmem:[%s4371_s27 + $0x38] sm:$0xff] %v2458_v30  ;;  %v2456_v55 = vmax.f32 %v2448_v9, 0.0 }
 0x3a2   : > { %2464 = vst [vmem:[%s4371_s27 + $0x28] sm:$0xff] %v2456_v55 }
 0x3a3   : > { %3540 = shalt.err (!%p3537_p9)
}
 0x3a4   : > { %s3541_s17 = scalar_lea.hbm %s4394_s15, 1024  ;;  %s3545_s21 = scalar_lea.hbm %s4534_s2, 8192 }
 0x3a5   : > { %p3542_p8 = scmp.ne.s32.totalorder %s4394_s15, %s3541_s17  ;;  %p3546_p13 = scmp.lt.s32.totalorder %s4394_s15, %s4534_s2 }
 0x3a6   : > { %p3547_p3 = scmp.lt.s32.totalorder %s3545_s21, %s3541_s17 }
 0x3a7   : > { %p3543_p1 = pnand %p3542_p8, %p3822_p0 }
 0x3a8   : > { %p3548_p10 = por %p3547_p3, %p3546_p13 }
 0x3a9   : > { %p3544_p11 = pneg %p3543_p1 }
 0x3ab   : > { %p3549_p5 = pnand %p3548_p10, %p3544_p11 }
 0x3ad   : > { %3552 = shalt.err (!%p3549_p5)
}
 0x3ae   : > { %s3649_s27 = smov 128   ;;  %s3650_s6 = smov 8  }
 0x3af   : > { %3191 = dma.vmem_to_hbm [thread:$0]  (%p3822_p0), %s4388_s14, 1024, %s4394_s15, %s2468_s28, %s3649_s27, %s3649_s27, %s3650_s6  }
 0x3b0 PF: > { %s4535_s19 = sld [smem:[#allocation17_spill]]  ;;  %p3221_p7 = scmp.ge.s32.totalorder %s3635_s24, 2 }
 0x3b1   : > { %s4536_s7 = sld [smem:[#allocation20_spill]] }
 0x3b6   : > { %s2498_s20 = sand.u32 1, %s4535_s19  }
 0x3b7   : > { %p4537_p12 = scmp.ne.s32.totalorder %s4536_s7, 0  ;;  %s2499_s11 = scalar_lea.sflag [#allocation4], %s2498_s20 }
 0x3b9   : > { %p3211_p2 = pnand %p3221_p7, %p4537_p12 }
 0x3bb   : > { %p3212_p4 = pneg %p3211_p2 }
 0x3bd   : > { %3602 = dma.done.wait (%p3212_p4), %s2499_s11, 1024  }
 0x3be   : > { %3604 = vsyncadd (%p3212_p4), %s2499_s11, 4294966272  ;;  %s31_s24 = sadd.s32 1, %s3635_s24   ;;  %s4538_s12 = sld [smem:[#allocation18_spill]] }
 0x3bf   : > { %p28_p6 = scmp.ge.s32.totalorder %s31_s24, 10   ;;  %s4539_s19 = sld [smem:[#allocation24_spill]] }
 0x3c0   : > { %s4540_s0 = sld [smem:[#allocation21_spill]]  ;;  %s4542_s17 = smov %s3611_s18 }
 0x3c1   : > { %s4541_s26 = sld [smem:[#allocation23_spill]]  ;;  %s4544_s20 = smov %s3627_s22 }
 0x3c2   : > { %s4545_s21 = smov %s3631_s23 }
 0x3c3   :  { %30 = sbr.rel (!%p28_p6) target bundleno = 20 (0x14), region = 142 }
 0x3c4   : > { %s4543_s18 = smov %s4538_s12 }
 0x3c6   : > { %s4546_s22 = smov %s4540_s0 }
 0x3c7   : > { %s4547_s23 = smov %s4541_s26 }
 0x3c8   :  { %2504 = vsyncpa [#allocation3], 1 }
 0x3c9   :  { %2506 = vsyncpa [#allocation3 + $0x1], 1 }
 0x3ca   :  { %2507 = vsyncpa [#allocation6], 1 }
 0x3cb   :  { %2509 = vsyncpa [#allocation6 + $0x1], 1 }
 0x3cc   :  { %2510 = vsyncpa [#allocation9], 1 }
 0x3cd   :  { %2511 = vsyncpa [#allocation4], 1 }
 0x3ce   :  { %2513 = vsyncpa [#allocation4 + $0x1], 1 }

// kernel: tpu_custom_call.1
= control target key start
LH: loop header
LB: loop body
LE: loop exit
PB: predicated region body
PF: predicated region fallthrough
CT: control target
= control target key end

     0   :  { %s4448_s0 = inlined_call_operand.hbm [shape: f32[2,256,128], index: 0, kind: input, shape index: {}]   ;;  %s4449_s1 = inlined_call_operand.hbm [shape: f32[2,4,32,128], index: 1, kind: input, shape index: {}]   ;;  %s4450_s2 = inlined_call_operand.hbm [shape: bf16[128,128], index: 2, kind: input, shape index: {}]   ;;  %s4451_s3 = inlined_call_operand.vmem [shape: f32[1,128], index: 3, kind: input, shape index: {}]   ;;  %s4452_s4 = inlined_call_operand.vmem [shape: f32[1,128], index: 4, kind: input, shape index: {}]   ;;  %s4453_s5 = inlined_call_operand.hbm [shape: bf16[9,128,128], index: 5, kind: input, shape index: {}]   ;;  %s4454_s6 = inlined_call_operand.vmem [shape: f32[1,128], index: 6, kind: input, shape index: {}]   ;;  %s4455_s7 = inlined_call_operand.vmem [shape: f32[1,128], index: 7, kind: input, shape index: {}]   ;;  %s4456_s8 = inlined_call_operand.hbm [shape: bf16[128,128], index: 8, kind: input, shape index: {}]   ;;  %s4457_s9 = inlined_call_operand.vmem [shape: f32[1,128], index: 9, kind: input, shape index: {}]   ;;  %s4458_s10 = inlined_call_operand.vmem [shape: f32[1,128], index: 10, kind: input, shape index: {}]   ;;  %s4459_s11 = inlined_call_operand.hbm [shape: f32[2,256,128], index: 11, kind: output, shape index: {}]  }
   0x1   :  { %4470 = sst [smem:[#allocation33_spill]] %s4448_s0 }
   0x2   :  { %4471 = sst [smem:[#allocation34_spill]] %s4450_s2 }
   0x3   :  { %4472 = sst [smem:[#allocation35_spill]] %s4453_s5 }
   0x4   :  { %4473 = sst [smem:[#allocation36_spill]] %s4454_s6 }
   0x5   :  { %4474 = sst [smem:[#allocation37_spill]] %s4455_s7 }
   0x6   :  { %4475 = sst [smem:[#allocation38_spill]] %s4456_s8 }
   0x7   :  { %4476 = sst [smem:[#allocation39_spill]] %s4457_s9 }
   0x8   :  { %4477 = sst [smem:[#allocation40_spill]] %s4458_s10 }
   0x9   :  { %4478 = sst [smem:[#allocation41_spill]] %s4459_s11 }
   0xa   :  { %16 = vsyncpa [#allocation3], 0 }
   0xb   :  { %18 = vsyncpa [#allocation3 + $0x1], 0 }
   0xc   :  { %19 = vsyncpa [#allocation6], 0 }
   0xd   :  { %21 = vsyncpa [#allocation6 + $0x1], 0 }
   0xe   :  { %22 = vsyncpa [#allocation9], 0 }
   0xf   :  { %23 = vsyncpa [#allocation4], 0 }
  0x10   :  { %25 = vsyncpa [#allocation4 + $0x1], 0  ;;  %s3711_s17 = smov 0   ;;  %s3713_s18 = smov 0  }
  0x11   :  { %s3715_s19 = smov 0   ;;  %s3717_s20 = smov 0  }
  0x12   :  { %s3719_s21 = smov 0   ;;  %s3721_s22 = smov 0  }
  0x13   :  { %s3723_s23 = smov 0   ;;  %s3725_s24 = smov 0  }
  0x14 LB: > { %4479 = sst [smem:[#allocation17_spill]] %s3607_s17  ;;  %s3752_s25 = sadd.s32 4294967295, %s3635_s24   ;;  %s3635_s24 = sphi %s3725_s24, %s31_s24   ;;  %s3631_s23 = sphi %s3723_s23, %s4547_s23   ;;  %s3627_s22 = sphi %s3721_s22, %s4546_s22   ;;  %s3623_s21 = sphi %s3719_s21, %s4545_s21   ;;  %s3619_s20 = sphi %s3717_s20, %s4544_s20   ;;  %s3615_s19 = sphi %s3715_s19, %s4539_s19   ;;  %s3611_s18 = sphi %s3713_s18, %s4543_s18   ;;  %s3607_s17 = sphi %s3711_s17, %s4542_s17  }
  0x15   : > { %4480 = sst [smem:[#allocation18_spill]] %s3615_s19  ;;  %s2628_s26 = sadd.s32 4294967294, %s3635_s24  }
  0x16   : > { %4481 = sst [smem:[#allocation19_spill]] %s3623_s21  ;;  %p65_p0 = scmp.ne.s32.totalorder %s3611_s18, %s3607_s17 }
  0x17   : > { %p4463_p1 = scmp.eq.s32.totalorder %s3752_s25, 0  ;;  %p314_p3 = scmp.eq.s32.totalorder %s2628_s26, 7 }
  0x18   : > { %p2629_p5 = scmp.ge.s32.totalorder %s3635_s24, 1  ;;  %p321_p7 = scmp.lt.s32.totalorder %s3635_s24, 9 }
  0x19   : > { %p3761_p4 = por %p4463_p1, %p65_p0  ;;  %p3766_p6 = por %p314_p3, %p65_p0 }
  0x1a   : > { %p3771_p8 = pnand %p2629_p5, %p321_p7  ;;  %s3637_s30 = smov [#allocation7]  }
  0x1b   : > { %s4482_s27 = scalar_select %p3761_p4, 1, 0 }
  0x1c   : > { %s4483_s28 = scalar_select %p3766_p6, 1, 0 }
  0x1d   : > { %s333_s12 = sshll.u32 %s3637_s30, 4  ;;  %p3193_p9 = pneg %p3771_p8  ;;  %s334_s12 = int_to_ptr.vmem [resolvable:$true] %s333_s12 }
  0x1e   : > { %4484 = sst [smem:[#allocation20_spill]] %s4483_s28  ;;  %s3638_s14 = smov [#allocation8]  }
  0x1f   : > { %p3779_p10 = pnand %p3193_p9, %p4463_p1  ;;  %s352_s15 = sshll.u32 %s3638_s14, 4  ;;  %s353_s15 = int_to_ptr.vmem [resolvable:$true] %s352_s15 }
  0x20   : > { %s3639_s16 = smov [#allocation10]   ;;  %s3404_s28 = scalar_lea.vmem %s334_s12, 1024 }
  0x21   : > { %s371_s26 = sshll.u32 %s3639_s16, 4  ;;  %p3395_p11 = pneg %p3779_p10  ;;  %s372_s26 = int_to_ptr.vmem [resolvable:$true] %s371_s26 }
  0x22   : > { %p3405_p12 = scmp.ne.s32.totalorder %s334_s12, %s3404_s28  ;;  %p3412_p3 = scmp.lt.s32.totalorder %s334_s12, %s334_s12 }
  0x23   : > { %p3413_p5 = scmp.lt.s32.totalorder %s3404_s28, %s3404_s28 }
  0x24   : > { %p3407_p13 = pnand %p3405_p12, %p3395_p11 }
  0x25   : > { %p3414_p7 = por %p3413_p5, %p3412_p3 }
  0x26   : > { %p3408_p0 = pneg %p3407_p13 }
  0x28   : > { %p3415_p9 = pnand %p3414_p7, %p3408_p0 }
  0x2a   : > { %3418 = shalt.err (!%p3415_p9)
}
  0x2b   : > { %s3640_s30 = smov 64   ;;  %s3641_s14 = smov 4  }
  0x2c   : > { %s4487_s2 = sld [smem:[#allocation34_spill]]  ;;  %s3430_s11 = scalar_lea.vmem %s353_s15, 9216 }
  0x2d   : > { %p3431_p1 = scmp.ne.s32.totalorder %s353_s15, %s3430_s11  ;;  %p3438_p2 = scmp.lt.s32.totalorder %s353_s15, %s353_s15 }
  0x2e   : > { %p3439_p6 = scmp.lt.s32.totalorder %s3430_s11, %s3430_s11 }
  0x2f   : > { %p3433_p12 = pnand %p3431_p1, %p3395_p11 }
  0x30   : > { %p3440_p3 = por %p3439_p6, %p3438_p2 }
  0x31   : > { %p3434_p13 = pneg %p3433_p12 }
  0x32   : > { %3196 = dma.hbm_to_vmem [thread:$0]  (!%p3779_p10), %s4487_s2, 1024, %s334_s12, [#allocation6], %s3640_s30, %s3640_s30, %s3641_s14  }
  0x33   : > { %p3441_p0 = pnand %p3440_p3, %p3434_p13 }
  0x35   : > { %3444 = shalt.err (!%p3441_p0)
}
  0x36   : > { %s4488_s5 = sld [smem:[#allocation35_spill]]  ;;  %s3456_s17 = scalar_lea.vmem %s372_s26, 1024 }
  0x37   : > { %p3457_p5 = scmp.ne.s32.totalorder %s372_s26, %s3456_s17  ;;  %p3464_p9 = scmp.lt.s32.totalorder %s372_s26, %s372_s26 }
  0x38   : > { %p3465_p12 = scmp.lt.s32.totalorder %s3456_s17, %s3456_s17 }
  0x39   : > { %p3459_p7 = pnand %p3457_p5, %p3395_p11 }
  0x3a   : > { %p3466_p4 = por %p3465_p12, %p3464_p9 }
  0x3b   : > { %p3460_p1 = pneg %p3459_p7 }
  0x3c   : > { %3199 = dma.hbm_to_vmem [thread:$0]  (!%p3779_p10), %s4488_s5, 9216, %s353_s15, [#allocation9], %s3640_s30, %s3640_s30, %s3641_s14  }
  0x3d   : > { %p3467_p2 = pnand %p3466_p4, %p3460_p1 }
  0x3f   : > { %3470 = shalt.err (!%p3467_p2)
}
  0x40   : > { %s4489_s8 = sld [smem:[#allocation38_spill]]  ;;  %s40_s21 = sadd.s32 1, %s3627_s22 }
  0x41   : > { %p41_p4 = scmp.ge.s32.totalorder %s40_s21, 4  ;;  %s43_s13 = sadd.s32 1, %s3631_s23 }
  0x42   : > { %s52_s15 = sadd.s32 1, %s3615_s19  ;;  %p59_p6 = scmp.ne.s32.totalorder %s3615_s19, %s3611_s18 }
  0x43   : > { %s4549_s21 = smov (%p41_p4, %s40_s21), 0  ;;  %s4551_s13 = smov (!%p41_p4, %s43_s13), %s3631_s23 }
  0x44   : > { %4490 = sst [smem:[#allocation21_spill]] %s4549_s21  ;;  %s48_s16 = ssub.s32 %s3627_s22, %s4549_s21 }
  0x45   : > { %p60_p11 = scmp.eq.s32.totalorder %s3635_s24, 0  ;;  %p45_p13 = scmp.ge.s32.totalorder %s4551_s13, 2 }
  0x46   : > { %3202 = dma.hbm_to_vmem [thread:$0]  (!%p3779_p10), %s4489_s8, 1024, %s372_s26, [#allocation9], %s3640_s30, %s3640_s30, %s3641_s14  }
  0x47   : > { %p4491_p3 = scmp.eq.s32.totalorder %s3752_s25, 7  ;;  %p3826_p10 = por %p60_p11, %p59_p6 }
  0x48   : > { %p3217_p5 = scmp.lt.s32.totalorder %s3635_s24, 8  ;;  %s4553_s13 = smov (%p45_p13, %s4551_s13), 0 }
  0x49   : > { %p3822_p0 = por %p4491_p3, %p59_p6  ;;  %4495 = sst [smem:[#allocation23_spill]] %s4553_s13 }
  0x4a   : > { %s3834_s30 = sand.u32 1, %s3615_s19   ;;  %s2635_s14 = sshll.u32 %s3627_s22, 3 }
  0x4b   : > { %s4492_s28 = scalar_select %p3822_p0, 1, 0 }
  0x4c   : > { %s47_s17 = ssub.s32 %s3631_s23, %s4553_s13  ;;  %s2634_s12 = sshll.u32 %s3834_s30, 6 }
  0x4d   : > { %4493 = sst [smem:[#allocation22_spill]] %s4492_s28  ;;  %s49_s11 = sor.u32 %s48_s16, %s47_s17 }
  0x4e   : > { %p50_p7 = scmp.eq.s32.totalorder %s49_s11, 0  ;;  %s2636_s2 = sshll.u32 %s3631_s23, 5 }
  0x4f   : > { %s395_s5 = scalar_lea.vmem [#allocation2], %s2634_s12  ;;  %s401_s28 = sadd.s32 %s2636_s2, %s2635_s14 }
  0x50   : > { %s404_s8 = sshll.u32 %s395_s5, 4  ;;  %s2637_s10 = sshll.u32 %s401_s28, 7  ;;  %s405_s8 = int_to_ptr.vmem [resolvable:$true] %s404_s8 }
  0x51   : > { %s3842_s21 = scalar_select %p50_p7, %s3615_s19, %s52_s15  }
  0x52   : > { %p3848_p1 = pnand %p3217_p5, %p3826_p10  ;;  %s4498_s0 = sld [smem:[#allocation33_spill]] }
  0x53   : > { %4496 = sst [smem:[#allocation24_spill]] %s3842_s21  ;;  %s392_s17 = scalar_lea.sflag [#allocation3], %s3834_s30 }
  0x54   : > { %p3473_p9 = pneg %p3848_p1  ;;  %s3484_s5 = scalar_lea.vmem %s405_s8, 1024 }
  0x55   : > { %p3485_p12 = scmp.ne.s32.totalorder %s405_s8, %s3484_s5  ;;  %s3642_s2 = smov [#allocation2]  }
  0x56   : > { %s3489_s15 = sshll.u32 %s3642_s2, 4  ;;  %s3490_s15 = int_to_ptr.vmem [resolvable:$false] %s3489_s15 }
  0x57   : > { %p3487_p2 = pnand %p3485_p12, %p3473_p9  ;;  %s3491_s28 = scalar_lea.vmem %s3490_s15, 2048 }
  0x58   : > { %s403_s16 = scalar_lea.hbm %s4498_s0, %s2637_s10  ;;  %p3492_p6 = scmp.lt.s32.totalorder %s405_s8, %s3490_s15 }
  0x59   : > { %p3488_p4 = pneg %p3487_p2  ;;  %p3493_p11 = scmp.lt.s32.totalorder %s3491_s28, %s3484_s5 }
  0x5b   : > { %p3494_p13 = por %p3493_p11, %p3492_p6 }
  0x5d   : > { %p3495_p3 = pnand %p3494_p13, %p3488_p4 }
  0x5f   : > { %3498 = shalt.err (!%p3495_p3)
}
  0x60   : > { %s3643_s6 = smov 128   ;;  %s3644_s7 = smov 8  }
  0x61   : > { %3206 = dma.hbm_to_vmem [thread:$0]  (!%p3848_p1), %s403_s16, 1024, %s405_s8, %s392_s17, %s3643_s6, %s3643_s6, %s3644_s7  }
  0x62   : > { %s414_s10 = sand.u32 1, %s3635_s24   ;;  %s2638_s26 = sshll.u32 %s3834_s30, 5 }
  0x63   : > { %s2639_s14 = sshll.u32 %s3627_s22, 2  ;;  %s2640_s11 = sshll.u32 %s3631_s23, 4 }
  0x64   : > { %s424_s12 = sadd.s32 %s2640_s11, %s2639_s14  ;;  %s418_s5 = scalar_lea.vmem [#allocation5], %s2638_s26 }
  0x65   : > { %s427_s2 = sshll.u32 %s418_s5, 4  ;;  %s2641_s15 = sshll.u32 %s424_s12, 7  ;;  %s428_s2 = int_to_ptr.vmem [resolvable:$true] %s427_s2 }
  0x66   : > { %s426_s13 = scalar_lea.hbm %s4449_s1, %s2641_s15  ;;  %s415_s21 = scalar_lea.sflag [#allocation6], %s414_s10 }
  0x67   : > { %s3512_s19 = scalar_lea.vmem %s428_s2, 512  ;;  %s3645_s8 = smov [#allocation5]  }
  0x68   : > { %p3513_p10 = scmp.ne.s32.totalorder %s428_s2, %s3512_s19  ;;  %s3517_s30 = sshll.u32 %s3645_s8, 4  ;;  %s3518_s30 = int_to_ptr.vmem [resolvable:$false] %s3517_s30 }
  0x69   : > { %s3519_s16 = scalar_lea.vmem %s3518_s30, 1024  ;;  %p3520_p12 = scmp.lt.s32.totalorder %s428_s2, %s3518_s30 }
  0x6a   : > { %p3515_p5 = pnand %p3513_p10, %p3473_p9  ;;  %p3521_p2 = scmp.lt.s32.totalorder %s3519_s16, %s3512_s19 }
  0x6c   : > { %p3516_p7 = pneg %p3515_p5  ;;  %p3522_p4 = por %p3521_p2, %p3520_p12 }
  0x6e   : > { %p3523_p6 = pnand %p3522_p4, %p3516_p7 }
  0x70   : > { %3526 = shalt.err (!%p3523_p6)
}
  0x71   : > { %3209 = dma.hbm_to_vmem [thread:$0]  (!%p3848_p1), %s426_s13, 512, %s428_s2, %s415_s21, %s3643_s6, %s3643_s6, %s3644_s7  }
  0x72   : > { %439 = sbr.rel (%p3771_p8) target bundleno = 944 (0x3b0), region = 64 }
  0x77   : > { %s3884_s0 = sand.u32 1, %s3611_s18   ;;  %p4499_p9 = scmp.ne.s32.totalorder %s4482_s27, 0 }
  0x78   : > { %s2643_s19 = sshll.u32 %s3884_s0, 6  ;;  %s442_s17 = scalar_lea.sflag [#allocation3], %s3884_s0 }
  0x79   : > { %s3890_s10 = scalar_lea.vmem [#allocation2], %s2643_s19 }
  0x7a   : > { %3586 = dma.done.wait (%p4499_p9), %s442_s17, 1024  }
  0x7b   : > { %3588 = vsyncadd (%p4499_p9), %s442_s17, 4294966272  ;;  %s450_s9 = sand.u32 1, %s3752_s25   ;;  %s2644_s29 = sshll.u32 %s3884_s0, 5 }
  0x7c   : > { %s451_s21 = scalar_lea.sflag [#allocation6], %s450_s9  ;;  %s3898_s13 = scalar_lea.vmem [#allocation5], %s2644_s29 }
  0x7d   : > { %3590 = dma.done.wait (%p4499_p9), %s451_s21, 512  }
  0x7e   : > { %3592 = vsyncadd (%p4499_p9), %s451_s21, 4294966784  ;;  %p4500_p8 = scmp.eq.s32.totalorder %s3752_s25, 0 }
  0x80   : > { %3594 = dma.done.wait (%p4500_p8), [#allocation6], 1024   ;;  %p4501_p1 = pmov %p4500_p8 }
  0x82   : > { %3596 = vsyncadd (%p4501_p1), [#allocation6], 4294966272  ;;  %p4502_p11 = pmov %p4501_p1 }
  0x83   : > { %p4503_p13 = pmov %p4501_p1 }
  0x84   : > { %3598 = dma.done.wait (%p4502_p11), [#allocation9], 10240  }
  0x85   : > { %3600 = vsyncadd (%p4503_p13), [#allocation9], 4294957056  ;;  %v3297_v0 = vld [vmem:[#allocation7 + $0x38] sm:$0xff]   ;;  %v3298_v1 = vld [vmem:[#allocation7 + $0x30] sm:$0xff]   ;;  %v772_v44 = vlaneseq  ;;  %s762_s25 = sadd.s32 1, %s3619_s20  ;;  %p759_p10 = scmp.gt.s32.totalorder %s3619_s20, 0 }
  0x86   : > { %2891 = vmatprep.subr.bf16.mxu0 %v3297_v0  ;;  %2915 = vmatprep.subr.bf16.mxu1 %v3297_v0  ;;  %v3299_v2 = vld [vmem:[#allocation7 + $0x28] sm:$0xff]   ;;  %v3300_v3 = vld [vmem:[#allocation7 + $0x20] sm:$0xff]   ;;  %v3301_v10 = vld [vmem:[#allocation7 + $0x18] sm:$0xff]   ;;  %p763_p3 = scmp.lt.s32.totalorder %s762_s25, 4  ;;  %s4520_s28 = sld [smem:[#allocation36_spill]] }
  0x87   : > { %2892 = vmatpush3.bf16.msra.mxu0 %v3297_v0  ;;  %2916 = vmatpush3.bf16.msra.mxu1 %v3297_v0  ;;  %v513_v4 = vld [vmem:[%s3890_s10] sm:$0xff]  ;;  %v514_v5 = vld [vmem:[%s3890_s10 + $0x8] sm:$0xff]  ;;  %v3302_v11 = vld [vmem:[#allocation7 + $0x10] sm:$0xff]   ;;  %v3931_v45 = vshrl.u32 %v772_v44, 7  ;;  %s3943_s26 = scalar_select %p759_p10, 1, 0 }
  0x88   : > { %2893 = vmatprep.subr.bf16.mxu0 %v3298_v1  ;;  %2917 = vmatprep.subr.bf16.mxu1 %v3298_v1  ;;  %v521_v6 = vld [vmem:[%s3898_s13] sm:$0xff]  ;;  %v543_v7 = vpack.c.bf16 %v514_v5, %v513_v4  ;;  %v522_v8 = vld [vmem:[%s3898_s13 + $0x8] sm:$0xff]  ;;  %v515_v14 = vld [vmem:[%s3890_s10 + $0x10] sm:$0xff]  ;;  %s764_s27 = scalar_select %p763_p3, 1, 0 }
  0x89   : > { %v696_v9 = vpack.c.bf16 %v522_v8, %v521_v6  ;;  %v3303_v12 = vld [vmem:[#allocation7 + $0x8] sm:$0xff]   ;;  %v3304_v13 = vld [vmem:[#allocation7] sm:$0xff]   ;;  %v516_v15 = vld [vmem:[%s3890_s10 + $0x18] sm:$0xff]  ;;  %v774_v46 = vadd.s32 8, %v3931_v45  ;;  %v775_v47 = vadd.s32 16, %v3931_v45  ;;  %v777_v49 = vadd.s32 32, %v3931_v45  ;;  %s761_s5 = scvt.s32.f32 %s3943_s26 }
  0x8a   : > { %2907 = vmatprep.mubr.bf16.mxu0 %v543_v7  ;;  %v523_v16 = vld [vmem:[%s3898_s13 + $0x10] sm:$0xff]  ;;  %v524_v17 = vld [vmem:[%s3898_s13 + $0x18] sm:$0xff]  ;;  %v517_v18 = vld [vmem:[%s3890_s10 + $0x20] sm:$0xff]  ;;  %v544_v22 = vpack.c.bf16 %v516_v15, %v515_v14  ;;  %v776_v50 = vadd.s32 24, %v3931_v45  ;;  %s3950_s12 = scvt.s32.f32 %s764_s27  ;;  %v785_v56 = vand.u32 15, %v3931_v45  ;;  %v779_v61 = vadd.s32 48, %v3931_v45 }
  0x8b   : > { %2894 = vmatpush3.bf16.msra.mxu0 %v3298_v1  ;;  %2918 = vmatpush3.bf16.msra.mxu1 %v3298_v1  ;;  %v518_v19 = vld [vmem:[%s3890_s10 + $0x28] sm:$0xff]  ;;  %v3305_v20 = vld [vmem:[#allocation8 + $0x78] sm:$0xff]   ;;  %v697_v23 = vpack.c.bf16 %v524_v17, %v523_v16  ;;  %v3306_v24 = vld [vmem:[#allocation8 + $0x70] sm:$0xff]   ;;  %v792_v51 = vand.u32 15, %v774_v46  ;;  %v799_v57 = vand.u32 15, %v775_v47  ;;  %v813_v60 = vand.u32 15, %v777_v49 }
  0x8c   : > { %2895 = vmatprep.subr.bf16.mxu0 %v3299_v2  ;;  %2919 = vmatprep.subr.bf16.mxu1 %v3299_v2  ;;  %v3308_v21 = vld [vmem:[#allocation8 + $0x38] sm:$0xff]   ;;  %v545_v25 = vpack.c.bf16 %v518_v19, %v517_v18  ;;  %v519_v26 = vld [vmem:[%s3890_s10 + $0x30] sm:$0xff]  ;;  %v3307_v28 = vld [vmem:[#allocation8 + $0x68] sm:$0xff]   ;;  %v806_v62 = vand.u32 15, %v776_v50  ;;  %v769_v1 = vstv %s3950_s12  ;;  %v778_v4 = vadd.s32 40, %v3931_v45  ;;  %s4527_s16 = sld [smem:[#allocation37_spill]] }
  0x8d   : > { %2931 = vmatprep.mubr.bf16.mxu1 %v696_v9  ;;  %v520_v27 = vld [vmem:[%s3890_s10 + $0x38] sm:$0xff]  ;;  %v3309_v30 = vld [vmem:[#allocation8 + $0x60] sm:$0xff]   ;;  %v3310_v31 = vld [vmem:[#allocation8 + $0x30] sm:$0xff]   ;;  %vm898_vm0 = vcmp.le.s32.totalorder %v792_v51, 14  ;;  %vm3963_vm1 = vcmp.ge.s32.totalorder %v785_v56, 1  ;;  %vm3967_vm2 = vcmp.ge.s32.totalorder %v799_v57, 1  ;;  %v766_v15 = vstv %s761_s5 }
  0x8e   : > { %v546_v29 = vpack.c.bf16 %v520_v27, %v519_v26  ;;  %v3311_v32 = vld [vmem:[#allocation8 + $0x58] sm:$0xff]   ;;  %v3312_v33 = vld [vmem:[#allocation8 + $0x28] sm:$0xff]   ;;  %v3313_v34 = vld [vmem:[#allocation8 + $0x50] sm:$0xff]   ;;  %vm881_vm3 = vcmp.ge.s32.totalorder %v813_v60, 1  ;;  %vm3975_vm4 = vcmp.le.s32.totalorder %v806_v62, 14  ;;  %vm925_vm7 = vcmp.lt.s32.totalorder %v3931_v45, 1 }
  0x8f   : > { %2896 = vmatpush3.bf16.msra.mxu0 %v3299_v2  ;;  %2920 = vmatpush3.bf16.msra.mxu1 %v3299_v2  ;;  %v3314_v35 = vld [vmem:[#allocation8 + $0x20] sm:$0xff]   ;;  %v3315_v36 = vld [vmem:[#allocation8 + $0x48] sm:$0xff]   ;;  %v3316_v37 = vld [vmem:[#allocation8 + $0x18] sm:$0xff]   ;;  %vm1213_vm8 = vcmp.lt.s32.totalorder %v3931_v45, 7  ;;  %s4530_s29 = sld [smem:[#allocation39_spill]]  ;;  %s4371_s27 = scalar_lea.vmem [#allocation11], %s2643_s19 }
  0x90   : > { %2897 = vmatprep.subr.bf16.mxu0 %v3300_v3  ;;  %2921 = vmatprep.subr.bf16.mxu1 %v3300_v3  ;;  %v3317_v38 = vld [vmem:[#allocation8 + $0x40] sm:$0xff]   ;;  %v3318_v39 = vld [vmem:[#allocation8 + $0x10] sm:$0xff]   ;;  %v3924_v40 = vld [vmem:[#allocation8 + $0xb8] sm:$0xff]   ;;  %s4531_s25 = sld [smem:[#allocation40_spill]]  ;;  %s2744_s19 = sshll.u32 %s3619_s20, 3 }
  0x91   : > { %v3320_v41 = vld [vmem:[#allocation8 + $0x8] sm:$0xff]   ;;  %v3322_v42 = vld [vmem:[#allocation8] sm:$0xff]   ;;  %v3927_v43 = vld [vmem:[#allocation8 + $0xf8] sm:$0xff]   ;;  %s4532_s6 = sld [smem:[#allocation19_spill]]  ;;  %s2483_s14 = sshll.u32 %s4371_s27, 4  ;;  %s4388_s14 = int_to_ptr.vmem [resolvable:$true] %s2483_s14 }
  0x92   : > { %v3939_v48 = vld [vmem:[%s4451_s3] ss:$0 sm:$0xff]  ;;  %s4534_s2 = sld [smem:[#allocation41_spill]]  ;;  %s3527_s8 = scalar_lea.vmem %s4388_s14, 1024 }
  0x93   : > { %2898 = vmatpush3.bf16.msra.mxu0 %v3300_v3  ;;  %2922 = vmatpush3.bf16.msra.mxu1 %v3300_v3  ;;  %v3948_v52 = vld [vmem:[%s4452_s4] ss:$0 sm:$0xff]  ;;  %p3528_p5 = scmp.ne.s32.totalorder %s4388_s14, %s3527_s8 }
  0x94   : > { %2899 = vmatprep.subr.bf16.mxu0 %v3301_v10  ;;  %2923 = vmatprep.subr.bf16.mxu1 %v3301_v10 }
  0x95   : > { %p3529_p7 = pnand %p3528_p5, %p3822_p0 }
  0x97   : > { %2900 = vmatpush3.bf16.msra.mxu0 %v3301_v10  ;;  %2924 = vmatpush3.bf16.msra.mxu1 %v3301_v10  ;;  %s2745_s7 = sshll.u32 %s4532_s6, 5  ;;  %p3530_p12 = pneg %p3529_p7 }
  0x98   : > { %2901 = vmatprep.subr.bf16.mxu0 %v3302_v11  ;;  %2925 = vmatprep.subr.bf16.mxu1 %v3302_v11  ;;  %s2480_s20 = sadd.s32 %s2745_s7, %s2744_s19 }
  0x99   : > { %s2746_s11 = sshll.u32 %s2480_s20, 7 }
  0x9a   : > { %s4394_s15 = scalar_lea.hbm %s4534_s2, %s2746_s11 }
  0x9b   : > { %2902 = vmatpush3.bf16.msra.mxu0 %v3302_v11  ;;  %2926 = vmatpush3.bf16.msra.mxu1 %v3302_v11  ;;  %v3646_v11 = vmov 0.0  }
  0x9c   : > { %2903 = vmatprep.subr.bf16.mxu0 %v3303_v12  ;;  %2927 = vmatprep.subr.bf16.mxu1 %v3303_v12  ;;  %v885_v26 = vsel %vm3963_vm1, 1.0, %v3646_v11  ;;  %v887_v27 = vsel %vm3967_vm2, 1.0, %v3646_v11 }
  0x9f   : > { %2904 = vmatpush3.bf16.msra.mxu0 %v3303_v12  ;;  %2928 = vmatpush3.bf16.msra.mxu1 %v3303_v12  ;;  %v906_v12 = vsel %vm898_vm0, 1.0, %v3646_v11 }
  0xa0   : > { %2905 = vmatprep.subr.bf16.mxu0 %v3304_v13  ;;  %2929 = vmatprep.subr.bf16.mxu1 %v3304_v13 }
  0xa3   : > { %2906 = vmatpush3.bf16.msra.mxu0 %v3304_v13  ;;  %2930 = vmatpush3.bf16.msra.mxu1 %v3304_v13  ;;  %v827_v13 = vand.u32 15, %v779_v61 }
  0xa4   : > { %2935 = vmatprep.subr.bf16.mxu0 %v3305_v20  ;;  %2959 = vmatprep.subr.bf16.mxu1 %v3308_v21 }
  0xa5   : > { %vm883_vm5 = vcmp.ge.s32.totalorder %v827_v13, 1 }
  0xa6   : > { %2908 = vmatmul.mubr.bf16.vlgmr.msra.gmra.mxu0 %v544_v22  ;;  %2932 = vmatmul.mubr.bf16.vlgmr.msra.gmra.mxu1 %v697_v23  ;;  %v820_v22 = vand.u32 15, %v778_v4  ;;  %v891_v46 = vsel %vm883_vm5, 1.0, %v3646_v11 }
  0xa7   : > { %2911 = vmatprep.mubr.bf16.mxu0 %v545_v25  ;;  %2936 = vmatpush3.bf16.msra.mxu0 %v3305_v20 }
  0xa8   : > { %2937 = vmatprep.subr.bf16.mxu0 %v3306_v24  ;;  %2960 = vmatpush3.bf16.msra.mxu1 %v3308_v21  ;;  %vm902_vm6 = vcmp.le.s32.totalorder %v820_v22, 14 }
  0xa9   : > { %2961 = vmatprep.subr.bf16.mxu1 %v3310_v31  ;;  %v910_v57 = vsel %vm902_vm6, 1.0, %v3646_v11 }
  0xab   : > { %2938 = vmatpush3.bf16.msra.mxu0 %v3306_v24  ;;  %v3647_v24 = vmov 1.0  }
  0xac   : > { %2939 = vmatprep.subr.bf16.mxu0 %v3307_v28  ;;  %2962 = vmatpush3.bf16.msra.mxu1 %v3310_v31  ;;  %v3986_v25 = vpack.c.bf16 %v906_v12, %v3647_v24  ;;  %v780_v31 = vadd.s32 56, %v3931_v45  ;;  %v4030_v61 = vpack.c.bf16 %v3647_v24, %v891_v46 }
  0xad   : > { %2963 = vmatprep.subr.bf16.mxu1 %v3312_v33 }
  0xae   : > { %2912 = vmatmul.mubr.bf16.gmra.mxu0 %v546_v29 }
  0xaf   : > { %2940 = vmatpush3.bf16.msra.mxu0 %v3307_v28 }
  0xb0   : > { %2941 = vmatprep.subr.bf16.mxu0 %v3309_v30  ;;  %2964 = vmatpush3.bf16.msra.mxu1 %v3312_v33 }
  0xb1   : > { %2965 = vmatprep.subr.bf16.mxu1 %v3314_v35 }
  0xb3   : > { %2942 = vmatpush3.bf16.msra.mxu0 %v3309_v30  ;;  %v889_v30 = vsel %vm881_vm3, 1.0, %v3646_v11 }
  0xb4   : > { %2943 = vmatprep.subr.bf16.mxu0 %v3311_v32  ;;  %2966 = vmatpush3.bf16.msra.mxu1 %v3314_v35  ;;  %v908_v35 = vsel %vm3975_vm4, 1.0, %v3646_v11  ;;  %v4014_v50 = vpack.c.bf16 %v3647_v24, %v889_v30 }
  0xb5   : > { %2967 = vmatprep.subr.bf16.mxu1 %v3316_v37  ;;  %v4017_v51 = vpack.c.bf16 %v908_v35, %v3647_v24 }
  0xb7   : > { %2944 = vmatpush3.bf16.msra.mxu0 %v3311_v32 }
  0xb8   : > { %2945 = vmatprep.subr.bf16.mxu0 %v3313_v34  ;;  %2968 = vmatpush3.bf16.msra.mxu1 %v3316_v37 }
  0xb9   : > { %2969 = vmatprep.subr.bf16.mxu1 %v3318_v39 }
  0xbb   : > { %2946 = vmatpush3.bf16.msra.mxu0 %v3313_v34 }
  0xbc   : > { %2947 = vmatprep.subr.bf16.mxu0 %v3315_v36  ;;  %2970 = vmatpush3.bf16.msra.mxu1 %v3318_v39  ;;  %v4007_v39 = vpack.c.bf16 %v3647_v24, %v887_v27 }
  0xbd   : > { %2971 = vmatprep.subr.bf16.mxu1 %v3320_v41 }
  0xbf   : > { %2948 = vmatpush3.bf16.msra.mxu0 %v3315_v36 }
  0xc0   : > { %2949 = vmatprep.subr.bf16.mxu0 %v3317_v38  ;;  %2972 = vmatpush3.bf16.msra.mxu1 %v3320_v41 }
  0xc1   : > { %2973 = vmatprep.subr.bf16.mxu1 %v3322_v42 }
  0xc3   : > { %2950 = vmatpush3.bf16.msra.mxu0 %v3317_v38  ;;  %v4004_v38 = vpack.c.bf16 %v3647_v24, %v885_v26  ;;  %v3321_v26 = vld [vmem:[#allocation8 + $0xb0] sm:$0xff]  }
  0xc4   : > { %2983 = vmatprep.subr.bf16.mxu0 %v3924_v40  ;;  %2974 = vmatpush3.bf16.msra.mxu1 %v3322_v42 }
  0xc5   : > { %3007 = vmatprep.subr.bf16.mxu1 %v3927_v43 }
 0x166   : > { %v2909_v53 = vpop.f32.mrf.mxu0  ;;  %v2933_v54 = vpop.f32.mrf.mxu1 }
 0x167   : > { %v749_v55 = vmul.f32 %v2933_v54, %v3939_v48  ;;  %v668_v5 = vmul.f32 %v2909_v53, %v3939_v48  ;;  %v834_v53 = vand.u32 15, %v780_v31 }
 0x168   : > { %v629_v58 = vpop.f32.mrf.mxu0  ;;  %v732_v59 = vpop.f32.mrf.mxu1 }
 0x169   : > { %v3956_v63 = vadd.f32 %v3948_v52, %v749_v55  ;;  %v747_v0 = vmul.f32 %v3939_v48, %v732_v59  ;;  %v666_v8 = vmul.f32 %v3939_v48, %v629_v58  ;;  %v682_v23 = vadd.f32 %v3948_v52, %v668_v5 }
 0x16a   : > { %v2910_v2 = vpop.f32.mrf.mxu0  ;;  %v2934_v3 = vpop.f32.mrf.mxu1  ;;  %vm4052_vm9 = vcmp.le.s32.totalorder %v834_v53, 14 }
 0x16b   : > { %v750_v9 = vmul.f32 %v2934_v3, %v3939_v48  ;;  %v751_v14 = vadd.f32 %v3948_v52, %v747_v0  ;;  %v669_v17 = vmul.f32 %v2910_v2, %v3939_v48  ;;  %v680_v28 = vadd.f32 %v3948_v52, %v666_v8 }
 0x16c   : > { %v632_v10 = vpop.f32.mrf.mxu0  ;;  %v735_v20 = vpop.f32.mrf.mxu1  ;;  %v690_v41 = vmax.f32 %v682_v23, 0.0  ;;  %v757_v58 = vmax.f32 %v3956_v63, 0.0 }
 0x16d   : > { %v3981_v18 = vadd.f32 %v3948_v52, %v750_v9  ;;  %v667_v19 = vmul.f32 %v3939_v48, %v632_v10  ;;  %v755_v32 = vmax.f32 %v751_v14, 0.0  ;;  %v748_v34 = vmul.f32 %v3939_v48, %v735_v20 }
 0x16e   : > { %v2913_v21 = vpop.f32.mrf.mxu0  ;;  %v683_v36 = vadd.f32 %v3948_v52, %v669_v17  ;;  %v688_v47 = vmax.f32 %v680_v28, 0.0  ;;  %v4032_v62 = vrot.slane %v690_v41, 7  ;;  %v4037_v4 = vrot.slane %v690_v41, 1 }
 0x16f   : > { %v681_v33 = vadd.f32 %v3948_v52, %v667_v19  ;;  %v752_v42 = vadd.f32 %v3948_v52, %v748_v34  ;;  %v4019_v54 = vmul.f32 %v766_v15, %v755_v32  ;;  %v672_v0 = vmul.f32 %v2913_v21, %v3939_v48 }
 0x170   : > { %v645_v29 = vpop.f32.mrf.mxu0  ;;  %v4027_v59 = vmax.f32 %v683_v36, 0.0  ;;  %v4039_v5 = vrot.slane %v688_v47, 7  ;;  %v758_v63 = vmax.f32 %v3981_v18, 0.0  ;;  %v4042_v7 = vrot.slane %v688_v47, 1 }
 0x171   : > { %v670_v44 = vmul.f32 %v3939_v48, %v645_v29  ;;  %v4021_v55 = vmax.f32 %v681_v33, 0.0  ;;  %v756_v60 = vmax.f32 %v752_v42, 0.0  ;;  %v917_v8 = vrot.slane %v4019_v54, 7 }
 0x172   : > { %v2914_v37 = vpop.f32.mrf.mxu0  ;;  %v922_v12 = vrot.slane %v4027_v59, 7  ;;  %v1205_v16 = vrot.slane %v4019_v54, 1  ;;  %v686_v17 = vadd.f32 %v3948_v52, %v672_v0  ;;  %v1210_v20 = vrot.slane %v4027_v59, 1 }
 0x173   : > { %v673_v56 = vmul.f32 %v2914_v37, %v3939_v48  ;;  %v684_v2 = vadd.f32 %v3948_v52, %v670_v44  ;;  %v768_v6 = vmul.f32 %v766_v15, %v756_v60  ;;  %v920_v9 = vrot.slane %v4021_v55, 7 }
 0x174   : > { %v648_v49 = vpop.f32.mrf.mxu0  ;;  %v4059_v21 = vmul.f32 %v769_v1, %v758_v63  ;;  %v4062_v22 = vpack.c.bf16 %v4021_v55, %v688_v47  ;;  %v4088_v33 = vsel %vm925_vm7, %v4032_v62, %v922_v12  ;;  %v4090_v34 = vmax.f32 %v686_v17, 0.0 }
 0x175   : > { %v671_v3 = vmul.f32 %v3939_v48, %v648_v49  ;;  %v687_v10 = vadd.f32 %v3948_v52, %v673_v56  ;;  %v918_v13 = vrot.slane %v768_v6, 7  ;;  %v1206_v48 = vrot.slane %v768_v6, 1 }
 0x176   : > { %v692_v18 = vmax.f32 %v684_v2, 0.0  ;;  %v958_v15 = vpack.c.bf16 %v768_v6, %v4019_v54  ;;  %v929_v29 = vsel %vm925_vm7, %v920_v9, %v4032_v62  ;;  %v4097_v37 = vsel %vm925_vm7, %v4039_v5, %v920_v9  ;;  %v3341_v54 = vld [vmem:[#allocation8 + $0x120] sm:$0xff]  }
 0x177   : > { %v685_v14 = vadd.f32 %v3948_v52, %v671_v3  ;;  %v4064_v27 = vmax.f32 %v687_v10, 0.0  ;;  %v4067_v52 = vpack.c.bf16 %v4027_v59, %v690_v41  ;;  %v931_v28 = vsel %vm925_vm7, %v918_v13, %v4039_v5  ;;  %v3323_v41 = vld [vmem:[#allocation8 + $0xa8] sm:$0xff]  }
 0x178   : > { %2951 = vmatprep.mubr.bf16.mxu0 %v958_v15  ;;  %v1219_v31 = vsel %vm1213_vm8, %v1206_v48, %v4042_v7  ;;  %v1220_v32 = vsel %vm1213_vm8, %v1205_v16, %v1206_v48  ;;  %v923_v35 = vrot.slane %v692_v18, 7  ;;  %v1211_v36 = vrot.slane %v692_v18, 1 }
 0x179   : > { %v693_v23 = vmax.f32 %v685_v14, 0.0  ;;  %2952 = vmatmul.mubr.bf16.vlgmr.msra.gmra.mxu0 %v4062_v22  ;;  %v932_v42 = vsel %vm925_vm7, %v917_v8, %v918_v13  ;;  %v935_v46 = vpack.c.bf16 %v4097_v37, %v931_v28  ;;  %v4109_v47 = vrot.slane %v4064_v27, 7  ;;  %v3325_v13 = vld [vmem:[#allocation8 + $0xa0] sm:$0xff]   ;;  %v3326_v14 = vld [vmem:[#allocation8 + $0xf0] sm:$0xff]  }
 0x17a   : > { %2984 = vmatpush3.bf16.msra.mxu0 %v3924_v40  ;;  %2955 = vmatprep.mubr.bf16.mxu0 %v4067_v52  ;;  %v4106_v40 = vpack.c.bf16 %v4088_v33, %v929_v29  ;;  %v1222_v49 = vpack.c.bf16 %v1219_v31, %v1220_v32  ;;  %v1806_v59 = vrot.slane %v4059_v21, 7  ;;  %v4120_v2 = vpack.c.bf16 %v910_v57, %v3647_v24 }
 0x17b   : > { %v4075_v30 = vrot.slane %v693_v23, 7  ;;  %2985 = vmatprep.subr.bf16.mxu0 %v3321_v26  ;;  %v4115_v60 = vrot.slane %v693_v23, 1  ;;  %v4117_v0 = vpack.c.bf16 %v693_v23, %v692_v18  ;;  %v4124_v3 = vmul.f32 %v769_v1, %v757_v58 }
 0x17c   : > { %v1656_v63 = vrot.slane %v4090_v34, 1  ;;  %v1657_v9 = vrot.slane %v4064_v27, 1  ;;  %v939_v10 = vmul.bf16 %v935_v46, %v4007_v39  ;;  %v1215_v1 = vsel %vm1213_vm8, %v1210_v20, %v1211_v36 }
 0x17d   : > { %v933_v44 = vsel %vm925_vm7, %v4075_v30, %v917_v8  ;;  %v926_v56 = vsel %vm925_vm7, %v923_v35, %v4075_v30  ;;  %v927_v8 = vsel %vm925_vm7, %v922_v12, %v923_v35  ;;  %v1226_v57 = vmul.bf16 %v1222_v49, %v3986_v25  ;;  %v3328_v35 = vld [vmem:[#allocation8 + $0xe8] sm:$0xff]  }
 0x17e   : > { %v934_v53 = vpack.c.bf16 %v932_v42, %v933_v44  ;;  %2986 = vmatpush3.bf16.msra.mxu0 %v3321_v26  ;;  %v4132_v48 = vpack.c.bf16 %v926_v56, %v927_v8  ;;  %v940_v58 = vmul.bf16 %v4106_v40, %v4014_v50  ;;  %v1372_v12 = vsel %vm925_vm7, %v4109_v47, %v4039_v5 }
 0x17f   : > { %2987 = vmatprep.subr.bf16.mxu0 %v3323_v41  ;;  %v1216_v17 = vsel %vm1213_vm8, %v4037_v4, %v1210_v20  ;;  %v912_v18 = vsel %vm4052_vm9, 1.0, %v3646_v11  ;;  %v4153_v15 = vsel %vm1213_vm8, %v1211_v36, %v4115_v60  ;;  %v1809_v5 = vsel %vm925_vm7, %v1806_v59, %v4032_v62  ;;  %v3327_v62 = vld [vmem:[#allocation8 + $0x98] sm:$0xff]  }
 0x180   : > { %v938_v6 = vmul.bf16 %v934_v53, %v4004_v38  ;;  %v1659_v20 = vsel %vm1213_vm8, %v4115_v60, %v1656_v63  ;;  %v1805_v23 = vrot.slane %v4124_v3, 7  ;;  %v4162_v26 = vpack.c.bf16 %v1215_v1, %v1216_v17  ;;  %v3332_v17 = vld [vmem:[#allocation8 + $0xd8] sm:$0xff]  }
 0x181   : > { %2956 = vmatmul.mubr.bf16.gmra.mxu0 %v4117_v0  ;;  %v1810_v11 = vpack.c.bf16 %v4088_v33, %v1809_v5  ;;  %v4166_v19 = vpack.c.bf16 %v1659_v20, %v4153_v15  ;;  %v2094_v28 = vrot.slane %v4059_v21, 1  ;;  %v4172_v29 = vsel %vm1213_vm8, %v1656_v63, %v1657_v9  ;;  %v3329_v63 = vld [vmem:[#allocation8 + $0x90] sm:$0xff]  }
 0x182   : > { %2975 = vmatprep.mubr.bf16.mxu1 %v938_v6  ;;  %2988 = vmatpush3.bf16.msra.mxu0 %v3323_v41  ;;  %v4177_v31 = vsel %vm1213_vm8, %v1657_v9, %v4042_v7  ;;  %v1813_v32 = vmul.bf16 %v4132_v48, %v4007_v39  ;;  %v2093_v33 = vrot.slane %v4124_v3, 1  ;;  %v4189_v42 = vpack.c.bf16 %v912_v18, %v3647_v24  ;;  %v3333_v18 = vld [vmem:[#allocation8 + $0x80] sm:$0xff]  }
 0x183   : > { %2976 = vmatmul.mubr.bf16.vlgmr.msra.gmra.mxu1 %v939_v10  ;;  %2999 = vmatprep.mubr.bf16.mxu0 %v1226_v57  ;;  %v4184_v36 = vmul.bf16 %v1810_v11, %v4004_v38  ;;  %v2101_v41 = vmul.bf16 %v4166_v19, %v4017_v51  ;;  %v1662_v44 = vpack.c.bf16 %v4177_v31, %v4172_v29  ;;  %v3368_v31 = vld [vmem:[#allocation8 + $0x1c8] sm:$0xff]  }
 0x184   : > { %2989 = vmatprep.subr.bf16.mxu0 %v3325_v13  ;;  %3008 = vmatpush3.bf16.msra.mxu1 %v3927_v43  ;;  %v1373_v43 = vpack.c.bf16 %v4097_v37, %v1372_v12  ;;  %v1807_v46 = vsel %vm925_vm7, %v1805_v23, %v1806_v59  ;;  %v1808_v49 = vsel %vm925_vm7, %v4109_v47, %v1805_v23  ;;  %v1208_v12 = vrot.slane %v4021_v55, 1  ;;  %v3334_v23 = vld [vmem:[#allocation8 + $0xd0] sm:$0xff]   ;;  %v3335_v55 = vld [vmem:[#allocation8 + $0x138] sm:$0xff]  }
 0x185   : > { %2979 = vmatprep.mubr.bf16.mxu1 %v940_v58  ;;  %3009 = vmatprep.subr.bf16.mxu1 %v3326_v14  ;;  %v1811_v37 = vpack.c.bf16 %v1807_v46, %v1808_v49  ;;  %v2100_v53 = vmul.bf16 %v4162_v26, %v3986_v25  ;;  %v1954_v56 = vpack.c.bf16 %v4059_v21, %v4124_v3  ;;  %v3339_v46 = vld [vmem:[#allocation8 + $0x128] sm:$0xff]   ;;  %v3340_v49 = vld [vmem:[#allocation8 + $0x178] sm:$0xff]   ;;  %v3378_v21 = vld [vmem:[#allocation10 + $0x30] sm:$0xff]  }
 0x186   : > { %2990 = vmatpush3.bf16.msra.mxu0 %v3325_v13  ;;  %v2096_v24 = vsel %vm1213_vm8, %v1657_v9, %v2093_v33  ;;  %v941_v59 = vmul.bf16 %v4132_v48, %v4030_v61  ;;  %v2095_v8 = vsel %vm1213_vm8, %v2093_v33, %v2094_v28  ;;  %v1375_v10 = vmul.bf16 %v1373_v43, %v4004_v38  ;;  %v3330_v13 = vld [vmem:[#allocation8 + $0xe0] sm:$0xff]   ;;  %v3337_v33 = vld [vmem:[#allocation8 + $0x130] sm:$0xff]   ;;  %v3379_v3 = vld [vmem:[#allocation10 + $0x28] sm:$0xff]  }
 0x187   : > { %2991 = vmatprep.subr.bf16.mxu0 %v3327_v62  ;;  %v2098_v6 = vpack.c.bf16 %v2096_v24, %v4172_v29  ;;  %v4211_v1 = vmul.bf16 %v1811_v37, %v4030_v61  ;;  %v2097_v9 = vsel %vm1213_vm8, %v2094_v28, %v4037_v4  ;;  %v1217_v5 = vsel %vm1213_vm8, %v1208_v12, %v4037_v4  ;;  %v3336_v28 = vld [vmem:[#allocation8 + $0xc8] sm:$0xff]   ;;  %v3367_v29 = vld [vmem:[#allocation8 + $0x238] sm:$0xff]  }
 0x188   : > { %3010 = vmatpush3.bf16.msra.mxu1 %v3326_v14  ;;  %v2099_v58 = vpack.c.bf16 %v2097_v9, %v2095_v8  ;;  %v3331_v14 = vld [vmem:[#allocation8 + $0x88] sm:$0xff]   ;;  %v1218_v20 = vsel %vm1213_vm8, %v4042_v7, %v1208_v12  ;;  %v1228_v4 = vmul.bf16 %v4162_v26, %v4120_v2  ;;  %v3338_v7 = vld [vmem:[#allocation8 + $0xc0] sm:$0xff]   ;;  %v1368_v37 = vrot.slane %v4090_v34, 7  ;;  %v3345_v8 = vld [vmem:[#allocation8 + $0x110] sm:$0xff]  }
 0x189   : > { %3011 = vmatprep.subr.bf16.mxu1 %v3328_v35  ;;  %v4217_v57 = vmul.bf16 %v2098_v6, %v4120_v2  ;;  %v1223_v11 = vpack.c.bf16 %v1217_v5, %v1218_v20  ;;  %v3343_v6 = vld [vmem:[#allocation8 + $0x118] sm:$0xff]   ;;  %v3349_v9 = vld [vmem:[#allocation8 + $0x100] sm:$0xff]   ;;  %v3353_v12 = vld [vmem:[#allocation8 + $0x1b0] sm:$0xff]   ;;  %v4260_v20 = vpack.c.bf16 %v4064_v27, %v4090_v34 }
 0x18a   : > { %2992 = vmatpush3.bf16.msra.mxu0 %v3327_v62  ;;  %v4220_v38 = vmul.bf16 %v2099_v58, %v4189_v42  ;;  %v3350_v58 = vld [vmem:[#allocation8 + $0x150] sm:$0xff]   ;;  %v3356_v5 = vld [vmem:[#allocation8 + $0x1f8] sm:$0xff]   ;;  %v3360_v34 = vld [vmem:[#allocation8 + $0x1e8] sm:$0xff]  }
 0x18b   : > { %2980 = vmatmul.mubr.bf16.gmra.mxu1 %v941_v59  ;;  %2993 = vmatprep.subr.bf16.mxu0 %v3329_v63  ;;  %v1227_v62 = vmul.bf16 %v1223_v11, %v4017_v51  ;;  %v1370_v59 = vsel %vm925_vm7, %v1368_v37, %v4109_v47  ;;  %v1663_v45 = vmul.bf16 %v1223_v11, %v3986_v25  ;;  %v3359_v27 = vld [vmem:[#allocation8 + $0x198] sm:$0xff]   ;;  %v3376_v25 = vld [vmem:[#allocation8 + $0x200] sm:$0xff]  }
 0x18c   : > { %3023 = vmatprep.mubr.bf16.mxu1 %v1375_v10  ;;  %3012 = vmatpush3.bf16.msra.mxu1 %v3328_v35  ;;  %v1221_v35 = vsel %vm1213_vm8, %v4115_v60, %v1205_v16  ;;  %v1376_v16 = vmul.bf16 %v4106_v40, %v4007_v39  ;;  %v3342_v60 = vld [vmem:[#allocation8 + $0x170] sm:$0xff]   ;;  %v3346_v10 = vld [vmem:[#allocation8 + $0x160] sm:$0xff]   ;;  %v1664_v11 = vmul.bf16 %v4162_v26, %v4017_v51  ;;  %v3373_v39 = vld [vmem:[#allocation8 + $0x218] sm:$0xff]  }
 0x18d   : > { %3013 = vmatprep.subr.bf16.mxu1 %v3330_v13  ;;  %v1225_v43 = vpack.c.bf16 %v1221_v35, %v4153_v15  ;;  %v1377_v15 = vmul.bf16 %v4132_v48, %v4014_v50  ;;  %v3366_v35 = vld [vmem:[#allocation8 + $0x1d0] sm:$0xff]   ;;  %v3375_v48 = vld [vmem:[#allocation8 + $0x208] sm:$0xff]   ;;  %v3380_v26 = vld [vmem:[#allocation10 + $0x20] sm:$0xff]  }
 0x18e   : > { %2994 = vmatpush3.bf16.msra.mxu0 %v3329_v63  ;;  %v1371_v63 = vsel %vm925_vm7, %v4075_v30, %v1368_v37  ;;  %v3347_v30 = vld [vmem:[#allocation8 + $0x108] sm:$0xff]   ;;  %v3382_v51 = vld [vmem:[#allocation10 + $0x10] sm:$0xff]  }
 0x18f   : > { %2995 = vmatprep.subr.bf16.mxu0 %v3331_v14  ;;  %v1229_v24 = vmul.bf16 %v1225_v43, %v4189_v42  ;;  %v4251_v40 = vpack.c.bf16 %v1370_v59, %v1371_v63  ;;  %v3371_v43 = vld [vmem:[#allocation8 + $0x228] sm:$0xff]  }
 0x190   : > { %3014 = vmatpush3.bf16.msra.mxu1 %v3330_v13  ;;  %v3348_v13 = vld [vmem:[#allocation8 + $0x158] sm:$0xff]  }
 0x191   : > { %3015 = vmatprep.subr.bf16.mxu1 %v3332_v17  ;;  %v1378_v47 = vmul.bf16 %v4251_v40, %v4030_v61  ;;  %v3351_v61 = vld [vmem:[#allocation8 + $0x1b8] sm:$0xff]  }
 0x192   : > { %2996 = vmatpush3.bf16.msra.mxu0 %v3331_v14  ;;  %v3352_v14 = vld [vmem:[#allocation8 + $0x148] sm:$0xff]  }
 0x193   : > { %2997 = vmatprep.subr.bf16.mxu0 %v3333_v18 }
 0x194   : > { %3016 = vmatpush3.bf16.msra.mxu1 %v3332_v17  ;;  %v3354_v17 = vld [vmem:[#allocation8 + $0x140] sm:$0xff]  }
 0x195   : > { %3017 = vmatprep.subr.bf16.mxu1 %v3334_v23 }
 0x196   : > { %2998 = vmatpush3.bf16.msra.mxu0 %v3333_v18  ;;  %v3355_v18 = vld [vmem:[#allocation8 + $0x1a8] sm:$0xff]  }
 0x197   : > { %3031 = vmatprep.subr.bf16.mxu0 %v3335_v55 }
 0x198   : > { %3018 = vmatpush3.bf16.msra.mxu1 %v3334_v23  ;;  %v3357_v23 = vld [vmem:[#allocation8 + $0x1a0] sm:$0xff]  }
 0x199   : > { %3019 = vmatprep.subr.bf16.mxu1 %v3336_v28  ;;  %3000 = vmatmul.mubr.bf16.vlgmr.msra.gmra.mxu0 %v1227_v62  ;;  %v3361_v62 = vld [vmem:[#allocation8 + $0x190] sm:$0xff]  }
 0x19a   : > { %3003 = vmatprep.mubr.bf16.mxu0 %v1228_v4  ;;  %3032 = vmatpush3.bf16.msra.mxu0 %v3335_v55  ;;  %v3358_v55 = vld [vmem:[#allocation8 + $0x1f0] sm:$0xff]   ;;  %v3364_v4 = vld [vmem:[#allocation8 + $0x1d8] sm:$0xff]  }
 0x19b   : > { %3033 = vmatprep.subr.bf16.mxu0 %v3337_v33 }
 0x19c   : > { %3020 = vmatpush3.bf16.msra.mxu1 %v3336_v28  ;;  %v1665_v28 = vmul.bf16 %v4166_v19, %v4120_v2  ;;  %v3363_v2 = vld [vmem:[#allocation8 + $0x188] sm:$0xff]  }
 0x19d   : > { %3021 = vmatprep.subr.bf16.mxu1 %v3338_v7 }
 0x19e   : > { %3034 = vmatpush3.bf16.msra.mxu0 %v3337_v33  ;;  %v1666_v33 = vmul.bf16 %v1662_v44, %v4189_v42  ;;  %v3369_v42 = vld [vmem:[#allocation8 + $0x230] sm:$0xff]   ;;  %v3370_v44 = vld [vmem:[#allocation8 + $0x1c0] sm:$0xff]  }
 0x19f   : > { %3035 = vmatprep.subr.bf16.mxu0 %v3339_v46 }
 0x1a0   : > { %3022 = vmatpush3.bf16.msra.mxu1 %v3338_v7  ;;  %v3365_v7 = vld [vmem:[#allocation8 + $0x180] sm:$0xff]  }
 0x1a1   : > { %3055 = vmatprep.subr.bf16.mxu1 %v3340_v49  ;;  %3004 = vmatmul.mubr.bf16.gmra.mxu0 %v1229_v24 }
 0x1a2   : > { %3036 = vmatpush3.bf16.msra.mxu0 %v3339_v46  ;;  %3047 = vmatprep.mubr.bf16.mxu0 %v4062_v22  ;;  %v3344_v22 = vld [vmem:[#allocation8 + $0x168] sm:$0xff]   ;;  %v3372_v46 = vld [vmem:[#allocation8 + $0x220] sm:$0xff]  }
 0x1a3   : > { %3024 = vmatmul.mubr.bf16.vlgmr.msra.gmra.mxu1 %v1376_v16  ;;  %3037 = vmatprep.subr.bf16.mxu0 %v3341_v54 }
 0x1a4   : > { %3027 = vmatprep.mubr.bf16.mxu1 %v1377_v15  ;;  %3056 = vmatpush3.bf16.msra.mxu1 %v3340_v49 }
 0x1a5   : > { %3057 = vmatprep.subr.bf16.mxu1 %v3342_v60 }
 0x1a6   : > { %3038 = vmatpush3.bf16.msra.mxu0 %v3341_v54 }
 0x1a7   : > { %3039 = vmatprep.subr.bf16.mxu0 %v3343_v6 }
 0x1a8   : > { %3058 = vmatpush3.bf16.msra.mxu1 %v3342_v60 }
 0x1a9   : > { %3059 = vmatprep.subr.bf16.mxu1 %v3344_v22 }
 0x1aa   : > { %3040 = vmatpush3.bf16.msra.mxu0 %v3343_v6 }
 0x1ab   : > { %3028 = vmatmul.mubr.bf16.gmra.mxu1 %v1378_v47  ;;  %3041 = vmatprep.subr.bf16.mxu0 %v3345_v8 }
 0x1ac   : > { %3060 = vmatpush3.bf16.msra.mxu1 %v3344_v22  ;;  %3071 = vmatprep.mubr.bf16.mxu1 %v1663_v45 }
 0x1ad   : > { %3061 = vmatprep.subr.bf16.mxu1 %v3346_v10 }
 0x1ae   : > { %3042 = vmatpush3.bf16.msra.mxu0 %v3345_v8 }
 0x1af   : > { %3043 = vmatprep.subr.bf16.mxu0 %v3347_v30 }
 0x1b0   : > { %3062 = vmatpush3.bf16.msra.mxu1 %v3346_v10 }
 0x1b1   : > { %3063 = vmatprep.subr.bf16.mxu1 %v3348_v13 }
 0x1b2   : > { %3044 = vmatpush3.bf16.msra.mxu0 %v3347_v30 }
 0x1b3   : > { %3045 = vmatprep.subr.bf16.mxu0 %v3349_v9 }
 0x1b4   : > { %3064 = vmatpush3.bf16.msra.mxu1 %v3348_v13 }
 0x1b5   : > { %3065 = vmatprep.subr.bf16.mxu1 %v3350_v58 }
 0x1b6   : > { %3046 = vmatpush3.bf16.msra.mxu0 %v3349_v9 }
 0x1b7   : > { %3079 = vmatprep.subr.bf16.mxu0 %v3351_v61 }
 0x1b8   : > { %3066 = vmatpush3.bf16.msra.mxu1 %v3350_v58 }
 0x1b9   : > { %3048 = vmatmul.mubr.bf16.vlgmr.msra.gmra.mxu0 %v4067_v52  ;;  %3067 = vmatprep.subr.bf16.mxu1 %v3352_v14 }
 0x1ba   : > { %3051 = vmatprep.mubr.bf16.mxu0 %v4117_v0  ;;  %3080 = vmatpush3.bf16.msra.mxu0 %v3351_v61 }
 0x1bb   : > { %3081 = vmatprep.subr.bf16.mxu0 %v3353_v12 }
 0x1bc   : > { %3068 = vmatpush3.bf16.msra.mxu1 %v3352_v14 }
 0x1bd   : > { %3069 = vmatprep.subr.bf16.mxu1 %v3354_v17 }
 0x1be   : > { %3082 = vmatpush3.bf16.msra.mxu0 %v3353_v12 }
 0x1bf   : > { %3083 = vmatprep.subr.bf16.mxu0 %v3355_v18 }
 0x1c0   : > { %3070 = vmatpush3.bf16.msra.mxu1 %v3354_v17 }
 0x1c1   : > { %3052 = vmatmul.mubr.bf16.gmra.mxu0 %v4260_v20  ;;  %3103 = vmatprep.subr.bf16.mxu1 %v3356_v5 }
 0x1c2   : > { %3084 = vmatpush3.bf16.msra.mxu0 %v3355_v18  ;;  %3095 = vmatprep.mubr.bf16.mxu0 %v4184_v36  ;;  %v3362_v36 = vld [vmem:[#allocation8 + $0x1e0] sm:$0xff]  }
 0x1c3   : > { %3072 = vmatmul.mubr.bf16.vlgmr.msra.gmra.mxu1 %v1664_v11  ;;  %3085 = vmatprep.subr.bf16.mxu0 %v3357_v23 }
 0x1c4   : > { %3075 = vmatprep.mubr.bf16.mxu1 %v1665_v28  ;;  %3104 = vmatpush3.bf16.msra.mxu1 %v3356_v5 }
 0x1c5   : > { %3105 = vmatprep.subr.bf16.mxu1 %v3358_v55 }
 0x1c6   : > { %3086 = vmatpush3.bf16.msra.mxu0 %v3357_v23 }
 0x1c7   : > { %3087 = vmatprep.subr.bf16.mxu0 %v3359_v27 }
 0x1c8   : > { %3106 = vmatpush3.bf16.msra.mxu1 %v3358_v55 }
 0x1c9   : > { %3107 = vmatprep.subr.bf16.mxu1 %v3360_v34 }
 0x1ca   : > { %3088 = vmatpush3.bf16.msra.mxu0 %v3359_v27 }
 0x1cb   : > { %3076 = vmatmul.mubr.bf16.gmra.mxu1 %v1666_v33  ;;  %3089 = vmatprep.subr.bf16.mxu0 %v3361_v62 }
 0x1cc   : > { %3108 = vmatpush3.bf16.msra.mxu1 %v3360_v34  ;;  %3119 = vmatprep.mubr.bf16.mxu1 %v4067_v52  ;;  %v1814_v52 = vmul.bf16 %v4251_v40, %v4014_v50  ;;  %v3374_v50 = vld [vmem:[#allocation8 + $0x210] sm:$0xff]  }
 0x1cd   : > { %3109 = vmatprep.subr.bf16.mxu1 %v3362_v36 }
 0x1ce   : > { %3090 = vmatpush3.bf16.msra.mxu0 %v3361_v62 }
 0x1cf   : > { %3091 = vmatprep.subr.bf16.mxu0 %v3363_v2 }
 0x1d0   : > { %3110 = vmatpush3.bf16.msra.mxu1 %v3362_v36 }
 0x1d1   : > { %3111 = vmatprep.subr.bf16.mxu1 %v3364_v4 }
 0x1d2   : > { %3092 = vmatpush3.bf16.msra.mxu0 %v3363_v2 }
 0x1d3   : > { %3093 = vmatprep.subr.bf16.mxu0 %v3365_v7 }
 0x1d4   : > { %3112 = vmatpush3.bf16.msra.mxu1 %v3364_v4 }
 0x1d5   : > { %3113 = vmatprep.subr.bf16.mxu1 %v3366_v35 }
 0x1d6   : > { %3094 = vmatpush3.bf16.msra.mxu0 %v3365_v7 }
 0x1d7   : > { %3127 = vmatprep.subr.bf16.mxu0 %v3367_v29 }
 0x1d8   : > { %3114 = vmatpush3.bf16.msra.mxu1 %v3366_v35 }
 0x1d9   : > { %3096 = vmatmul.mubr.bf16.vlgmr.msra.gmra.mxu0 %v1813_v32  ;;  %3115 = vmatprep.subr.bf16.mxu1 %v3368_v31  ;;  %v3381_v32 = vld [vmem:[#allocation10 + $0x18] sm:$0xff]  }
 0x1da   : > { %3099 = vmatprep.mubr.bf16.mxu0 %v1814_v52  ;;  %3128 = vmatpush3.bf16.msra.mxu0 %v3367_v29 }
 0x1db   : > { %3129 = vmatprep.subr.bf16.mxu0 %v3369_v42 }
 0x1dc   : > { %3116 = vmatpush3.bf16.msra.mxu1 %v3368_v31 }
 0x1dd   : > { %3117 = vmatprep.subr.bf16.mxu1 %v3370_v44 }
 0x1de   : > { %3130 = vmatpush3.bf16.msra.mxu0 %v3369_v42 }
 0x1df   : > { %3131 = vmatprep.subr.bf16.mxu0 %v3371_v43 }
 0x1e0   : > { %3118 = vmatpush3.bf16.msra.mxu1 %v3370_v44 }
 0x1e1   : > { %3100 = vmatmul.mubr.bf16.gmra.mxu0 %v4211_v1 }
 0x1e2   : > { %3132 = vmatpush3.bf16.msra.mxu0 %v3371_v43  ;;  %3143 = vmatprep.mubr.bf16.mxu0 %v2100_v53 }
 0x1e3   : > { %3120 = vmatmul.mubr.bf16.vlgmr.msra.gmra.mxu1 %v4117_v0  ;;  %3133 = vmatprep.subr.bf16.mxu0 %v3372_v46  ;;  %v3377_v0 = vld [vmem:[#allocation10 + $0x38] sm:$0xff]  }
 0x1e4   : > { %3123 = vmatprep.mubr.bf16.mxu1 %v4260_v20  ;;  %3151 = vmatprep.subr.bf16.mxu1 %v3377_v0 }
 0x1e5   : > { %3152 = vmatpush3.bf16.msra.mxu1 %v3377_v0 }
 0x1e6   : > { %3134 = vmatpush3.bf16.msra.mxu0 %v3372_v46  ;;  %3153 = vmatprep.subr.bf16.mxu1 %v3378_v21 }
 0x1e7   : > { %3135 = vmatprep.subr.bf16.mxu0 %v3373_v39 }
 0x1e9   : > { %3154 = vmatpush3.bf16.msra.mxu1 %v3378_v21 }
 0x1ea   : > { %3136 = vmatpush3.bf16.msra.mxu0 %v3373_v39  ;;  %3155 = vmatprep.subr.bf16.mxu1 %v3379_v3 }
 0x1eb   : > { %3124 = vmatmul.mubr.bf16.gmra.mxu1 %v1954_v56  ;;  %3137 = vmatprep.subr.bf16.mxu0 %v3374_v50 }
 0x1ed   : > { %3156 = vmatpush3.bf16.msra.mxu1 %v3379_v3 }
 0x1ee   : > { %3138 = vmatpush3.bf16.msra.mxu0 %v3374_v50  ;;  %3157 = vmatprep.subr.bf16.mxu1 %v3380_v26 }
 0x1ef   : > { %3139 = vmatprep.subr.bf16.mxu0 %v3375_v48 }
 0x1f1   : > { %3158 = vmatpush3.bf16.msra.mxu1 %v3380_v26 }
 0x1f2   : > { %3140 = vmatpush3.bf16.msra.mxu0 %v3375_v48  ;;  %3159 = vmatprep.subr.bf16.mxu1 %v3381_v32 }
 0x1f3   : > { %3141 = vmatprep.subr.bf16.mxu0 %v3376_v25 }
 0x1f5   : > { %3160 = vmatpush3.bf16.msra.mxu1 %v3381_v32 }
 0x1f6   : > { %3142 = vmatpush3.bf16.msra.mxu0 %v3376_v25  ;;  %3161 = vmatprep.subr.bf16.mxu1 %v3382_v51 }
 0x1f9   : > { %3144 = vmatmul.mubr.bf16.vlgmr.msra.gmra.mxu0 %v2101_v41  ;;  %3162 = vmatpush3.bf16.msra.mxu1 %v3382_v51  ;;  %v3383_v41 = vld [vmem:[#allocation10 + $0x8] sm:$0xff]  }
 0x1fa   : > { %3147 = vmatprep.mubr.bf16.mxu0 %v4217_v57  ;;  %3163 = vmatprep.subr.bf16.mxu1 %v3383_v41  ;;  %v3384_v57 = vld [vmem:[#allocation10] sm:$0xff]  }
 0x1fd   : > { %3164 = vmatpush3.bf16.msra.mxu1 %v3383_v41 }
 0x1fe   : > { %3165 = vmatprep.subr.bf16.mxu1 %v3384_v57 }
 0x201   : > { %3148 = vmatmul.mubr.bf16.gmra.mxu0 %v4220_v38  ;;  %3166 = vmatpush3.bf16.msra.mxu1 %v3384_v57 }
 0x239   : > { %v4292_v53 = vpop.f32.mrf.mxu0 }
 0x23b   : > { %v4294_v19 = vpop.f32.mrf.mxu0 }
 0x23d   : > { %v4296_v56 = vpop.f32.mrf.mxu0 }
 0x23f   : > { %v1064_v38 = vpop.f32.mrf.mxu0 }
 0x241   : > { %v4298_v49 = vpop.f32.mrf.mxu0 }
 0x243   : > { %v2977_v1 = vpop.f32.mrf.mxu1  ;;  %v4300_v24 = vpop.f32.mrf.mxu0 }
 0x244   : > { %v1183_v25 = vadd.f32 %v2977_v1, %v4292_v53 }
 0x245   : > { %v1174_v37 = vpop.f32.mrf.mxu1  ;;  %v4302_v16 = vpop.f32.mrf.mxu0 }
 0x246   : > { %v1175_v0 = vadd.f32 %v1174_v37, %v4294_v19 }
 0x247   : > { %v2978_v54 = vpop.f32.mrf.mxu1  ;;  %v4304_v15 = vpop.f32.mrf.mxu0 }
 0x248   : > { %v1186_v32 = vadd.f32 %v2978_v54, %v4296_v56 }
 0x249   : > { %v1177_v60 = vpop.f32.mrf.mxu1 }
 0x24a   : > { %v1178_v57 = vadd.f32 %v1177_v60, %v1064_v38 }
 0x24b   : > { %v2981_v59 = vpop.f32.mrf.mxu1 }
 0x24c   : > { %v1199_v53 = vadd.f32 %v2981_v59, %v4298_v49 }
 0x24d   : > { %v1190_v6 = vpop.f32.mrf.mxu1 }
 0x24e   : > { %v1191_v1 = vadd.f32 %v1190_v6, %v4300_v24 }
 0x24f   : > { %v4306_v22 = vpop.f32.mrf.mxu1 }
 0x251   : > { %v4308_v47 = vpop.f32.mrf.mxu1 }
 0x252   : > { %v1194_v49 = vadd.f32 %v4308_v47, %v4304_v15  ;;  %v2731_v15 = vld [vmem:[%s4520_s28] ss:$0 sm:$0xff]  ;;  %s2468_s28 = scalar_lea.sflag [#allocation4], %s3884_s0 }
 0x259   : > { %v3001_v63 = vpop.f32.mrf.mxu0 }
 0x25a   : > { %v1362_v21 = vadd.f32 %v3001_v63, %v1183_v25 }
 0x25b   : > { %v1329_v40 = vpop.f32.mrf.mxu0 }
 0x25c   : > { %v1360_v51 = vadd.f32 %v1329_v40, %v1175_v0 }
 0x25d   : > { %v3002_v8 = vpop.f32.mrf.mxu0 }
 0x25f   : > { %v1332_v10 = vpop.f32.mrf.mxu0 }
 0x261   : > { %v3005_v30 = vpop.f32.mrf.mxu0 }
 0x262   : > { %v1366_v54 = vadd.f32 %v3005_v30, %v1199_v53 }
 0x263   : > { %v3025_v45 = vpop.f32.mrf.mxu1  ;;  %v1345_v9 = vpop.f32.mrf.mxu0 }
 0x264   : > { %v1511_v41 = vadd.f32 %v3025_v45, %v1362_v21  ;;  %v2732_v21 = vld [vmem:[%s4527_s16] ss:$0 sm:$0xff] }
 0x265   : > { %v1478_v13 = vpop.f32.mrf.mxu1  ;;  %v4310_v61 = vpop.f32.mrf.mxu0 }
 0x267   : > { %v3026_v58 = vpop.f32.mrf.mxu1  ;;  %v4312_v12 = vpop.f32.mrf.mxu0 }
 0x269   : > { %v1481_v14 = vpop.f32.mrf.mxu1 }
 0x26b   : > { %v3029_v17 = vpop.f32.mrf.mxu1 }
 0x26c   : > { %v1515_v59 = vadd.f32 %v3029_v17, %v1366_v54 }
 0x26d   : > { %v1494_v5 = vpop.f32.mrf.mxu1 }
 0x26f   : > { %v4314_v23 = vpop.f32.mrf.mxu1 }
 0x271   : > { %v4316_v55 = vpop.f32.mrf.mxu1 }
 0x272   : > { %4512 = vst [vmem:[#allocation25_spill] sm:$0xff] %v4316_v55 }
 0x279   : > { %v3049_v18 = vpop.f32.mrf.mxu0 }
 0x27b   : > { %v1617_v20 = vpop.f32.mrf.mxu0 }
 0x27d   : > { %v3050_v11 = vpop.f32.mrf.mxu0 }
 0x27f   : > { %v1620_v28 = vpop.f32.mrf.mxu0 }
 0x281   : > { %v3053_v34 = vpop.f32.mrf.mxu0 }
 0x283   : > { %v3073_v27 = vpop.f32.mrf.mxu1  ;;  %v1633_v33 = vpop.f32.mrf.mxu0 }
 0x285   : > { %v1766_v62 = vpop.f32.mrf.mxu1  ;;  %v4318_v2 = vpop.f32.mrf.mxu0 }
 0x286   : > { %4513 = vst [vmem:[#allocation26_spill] sm:$0xff] %v4318_v2 }
 0x287   : > { %v3074_v36 = vpop.f32.mrf.mxu1  ;;  %v4320_v7 = vpop.f32.mrf.mxu0 }
 0x288   : > { %4514 = vst [vmem:[#allocation27_spill] sm:$0xff] %v4320_v7  ;;  %v1509_v7 = vadd.f32 %v1478_v13, %v1360_v51 }
 0x289   : > { %v1769_v4 = vpop.f32.mrf.mxu1 }
 0x28a   : > { %v1648_v55 = vadd.f32 %v1617_v20, %v1509_v7 }
 0x28b   : > { %v4322_v35 = vpop.f32.mrf.mxu1 }
 0x28c   : > { %4515 = vst [vmem:[#allocation28_spill] sm:$0xff] %v4322_v35  ;;  %v1797_v56 = vadd.f32 %v1766_v62, %v1648_v55  ;;  %v1654_v55 = vadd.f32 %v3053_v34, %v1515_v59 }
 0x28d   : > { %v4324_v31 = vpop.f32.mrf.mxu1 }
 0x28e   : > { %4516 = vst [vmem:[#allocation29_spill] sm:$0xff] %v4324_v31 }
 0x28f   : > { %v4326_v52 = vpop.f32.mrf.mxu1 }
 0x290   : > { %4517 = vst [vmem:[#allocation30_spill] sm:$0xff] %v4326_v52  ;;  %v1363_v52 = vadd.f32 %v3002_v8, %v1186_v32  ;;  %v1364_v8 = vadd.f32 %v1345_v9, %v1191_v1  ;;  %v1365_v9 = vadd.f32 %v4312_v12, %v1194_v49 }
 0x291   : > { %v4328_v43 = vpop.f32.mrf.mxu1 }
 0x292   : > { %4518 = vst [vmem:[#allocation31_spill] sm:$0xff] %v4328_v43  ;;  %v1650_v43 = vadd.f32 %v3049_v18, %v1511_v41  ;;  %v1512_v35 = vadd.f32 %v3026_v58, %v1363_v52  ;;  %v1513_v6 = vadd.f32 %v1494_v5, %v1364_v8  ;;  %v4521_v5 = vld [vmem:[#allocation25_spill] sm:$0xff] }
 0x293   : > { %v4522_v7 = vld [vmem:[#allocation28_spill] sm:$0xff] }
 0x294   : > { %v1799_v19 = vadd.f32 %v3073_v27, %v1650_v43  ;;  %v1651_v63 = vadd.f32 %v3050_v11, %v1512_v35  ;;  %v4525_v43 = vld [vmem:[#allocation27_spill] sm:$0xff] }
 0x295   : > { %v4523_v12 = vld [vmem:[#allocation29_spill] sm:$0xff] }
 0x296   : > { %v1800_v13 = vadd.f32 %v3074_v36, %v1651_v63  ;;  %v1652_v36 = vadd.f32 %v1633_v33, %v1513_v6  ;;  %v4524_v33 = vld [vmem:[#allocation26_spill] sm:$0xff] }
 0x297   : > { %v4528_v51 = vld [vmem:[#allocation30_spill] sm:$0xff] }
 0x298   : > { %v1801_v34 = vadd.f32 %v4523_v12, %v1652_v36  ;;  %v2742_v12 = vld [vmem:[%s4531_s25] ss:$0 sm:$0xff] }
 0x299   : > { %v3097_v29 = vpop.f32.mrf.mxu0  ;;  %v4529_v41 = vld [vmem:[#allocation31_spill] sm:$0xff] }
 0x29a   : > { %v1948_v40 = vadd.f32 %v3097_v29, %v1799_v19 }
 0x29b   : > { %v1915_v42 = vpop.f32.mrf.mxu0 }
 0x29c   : > { %v1946_v18 = vadd.f32 %v1915_v42, %v1797_v56 }
 0x29d   : > { %v3098_v44 = vpop.f32.mrf.mxu0 }
 0x29e   : > { %v1949_v20 = vadd.f32 %v3098_v44, %v1800_v13 }
 0x29f   : > { %v1918_v46 = vpop.f32.mrf.mxu0 }
 0x2a1   : > { %v4330_v50 = vpop.f32.mrf.mxu0 }
 0x2a2   : > { %4519 = vst [vmem:[#allocation32_spill] sm:$0xff] %v4330_v50  ;;  %v1361_v50 = vadd.f32 %v1332_v10, %v1178_v57  ;;  %v1202_v10 = vadd.f32 %v4306_v22, %v4302_v16 }
 0x2a3   : > { %v3121_v39 = vpop.f32.mrf.mxu1  ;;  %v1931_v3 = vpop.f32.mrf.mxu0 }
 0x2a4   : > { %v1510_v37 = vadd.f32 %v1481_v14, %v1361_v50  ;;  %v2087_v58 = vadd.f32 %v3121_v39, %v1948_v40  ;;  %v1367_v11 = vadd.f32 %v4310_v61, %v1202_v10  ;;  %v1803_v61 = vadd.f32 %v4522_v7, %v1654_v55 }
 0x2a5   : > { %v2054_v48 = vpop.f32.mrf.mxu1  ;;  %v4335_v2 = vpop.f32.mrf.mxu0 }
 0x2a6   : > { %v1649_v45 = vadd.f32 %v1620_v28, %v1510_v37  ;;  %v2085_v30 = vadd.f32 %v2054_v48, %v1946_v18  ;;  %v1516_v17 = vadd.f32 %v4314_v23, %v1367_v11  ;;  %v1950_v23 = vadd.f32 %v1931_v3, %v1801_v34 }
 0x2a7   : > { %v3122_v26 = vpop.f32.mrf.mxu1  ;;  %v1934_v38 = vpop.f32.mrf.mxu0 }
 0x2a8   : > { %v1798_v14 = vadd.f32 %v1769_v4, %v1649_v45  ;;  %v2088_v22 = vadd.f32 %v3122_v26, %v1949_v20  ;;  %v1514_v4 = vadd.f32 %v4521_v5, %v1365_v9  ;;  %v1655_v44 = vadd.f32 %v4524_v33, %v1516_v17 }
 0x2a9   : > { %v2057_v31 = vpop.f32.mrf.mxu1  ;;  %v4526_v39 = vld [vmem:[#allocation32_spill] sm:$0xff] }
 0x2aa   : > { %v1947_v16 = vadd.f32 %v1918_v46, %v1798_v14  ;;  %v1653_v46 = vadd.f32 %v4525_v43, %v1514_v4  ;;  %v1952_v50 = vadd.f32 %v4526_v39, %v1803_v61 }
 0x2ab   : > { %v3125_v60 = vpop.f32.mrf.mxu1 }
 0x2ac   : > { %v2086_v29 = vadd.f32 %v2057_v31, %v1947_v16  ;;  %v1804_v31 = vadd.f32 %v4528_v51, %v1655_v44  ;;  %v1802_v57 = vadd.f32 %v4529_v41, %v1653_v46  ;;  %v2091_v53 = vadd.f32 %v3125_v60, %v1952_v50  ;;  %v3385_v44 = vld [vmem:[%s3890_s10 + $0x10] sm:$0xff]  ;;  %v3387_v51 = vld [vmem:[%s3890_s10 + $0x18] sm:$0xff] }
 0x2ad   : > { %v2070_v28 = vpop.f32.mrf.mxu1 }
 0x2ae   : > { %v2089_v1 = vadd.f32 %v2070_v28, %v1950_v23  ;;  %v1953_v54 = vadd.f32 %v4335_v2, %v1804_v31  ;;  %v1951_v13 = vadd.f32 %v1934_v38, %v1802_v57 }
 0x2af   : > { %v3126_v48 = vpop.f32.mrf.mxu1 }
 0x2b0   : > { %v2092_v49 = vadd.f32 %v3126_v48, %v1953_v54 }
 0x2b1   : > { %v2073_v40 = vpop.f32.mrf.mxu1 }
 0x2b9   : > { %v3145_v24 = vpop.f32.mrf.mxu0 }
 0x2ba   : > { %v2236_v27 = vadd.f32 %v3145_v24, %v2087_v58  ;;  %v2090_v24 = vadd.f32 %v2073_v40, %v1951_v13 }
 0x2bb   : > { %v2203_v62 = vpop.f32.mrf.mxu0 }
 0x2bc   : > { %v2234_v47 = vadd.f32 %v2203_v62, %v2085_v30  ;;  %v2251_v25 = vmul.f32 %v2731_v15, %v2236_v27 }
 0x2bd   : > { %v3146_v35 = vpop.f32.mrf.mxu0 }
 0x2be   : > { %v2249_v42 = vmul.f32 %v2731_v15, %v2234_v47  ;;  %v2237_v52 = vadd.f32 %v3146_v35, %v2088_v22  ;;  %v2266_v3 = vadd.f32 %v2732_v21, %v2251_v25  ;;  %v2741_v35 = vld [vmem:[%s4530_s29] ss:$0 sm:$0xff] }
 0x2bf   : > { %v2206_v0 = vpop.f32.mrf.mxu0  ;;  %v3386_v25 = vld [vmem:[%s3890_s10] sm:$0xff] }
 0x2c0   : > { %v2252_v26 = vmul.f32 %v2731_v15, %v2237_v52  ;;  %v2235_v32 = vadd.f32 %v2206_v0, %v2086_v29  ;;  %v2264_v37 = vadd.f32 %v2732_v21, %v2249_v42  ;;  %v2274_v20 = vmax.f32 %v2266_v3, 0.0  ;;  %v3389_v3 = vld [vmem:[%s3890_s10 + $0x30] sm:$0xff] }
 0x2c1   : > { %v3149_v19 = vpop.f32.mrf.mxu0 }
 0x2c2   : > { %v2267_v63 = vadd.f32 %v2732_v21, %v2252_v26  ;;  %v2250_v56 = vmul.f32 %v2731_v15, %v2235_v32  ;;  %v2240_v8 = vadd.f32 %v3149_v19, %v2091_v53  ;;  %v2272_v6 = vmax.f32 %v2264_v37, 0.0 }
 0x2c3   : > { %v2219_v45 = vpop.f32.mrf.mxu0 }
 0x2c4   : > { %v2265_v18 = vadd.f32 %v2732_v21, %v2250_v56  ;;  %v2238_v10 = vadd.f32 %v2219_v45, %v2089_v1  ;;  %v2275_v59 = vmax.f32 %v2267_v63, 0.0  ;;  %v2255_v30 = vmul.f32 %v2731_v15, %v2240_v8  ;;  %v3388_v1 = vld [vmem:[%s3890_s10 + $0x8] sm:$0xff] }
 0x2c5   : > { %v3150_v58 = vpop.f32.mrf.mxu0 }
 0x2c6   : > { %v2273_v60 = vmax.f32 %v2265_v18, 0.0  ;;  %v2253_v14 = vmul.f32 %v2731_v15, %v2238_v10  ;;  %v2241_v11 = vadd.f32 %v3150_v58, %v2092_v49  ;;  %v2281_v28 = vpack.c.bf16 %v2275_v59, %v2274_v20  ;;  %v3390_v49 = vld [vmem:[%s3890_s10 + $0x20] sm:$0xff] }
 0x2c7   : > { %v2222_v9 = vpop.f32.mrf.mxu0  ;;  %v2270_v38 = vadd.f32 %v2732_v21, %v2255_v30 }
 0x2c8   : > { %v2239_v55 = vadd.f32 %v2222_v9, %v2090_v24  ;;  %v2280_v2 = vpack.c.bf16 %v2273_v60, %v2272_v6  ;;  %v2256_v27 = vmul.f32 %v2731_v15, %v2241_v11  ;;  %v2268_v62 = vadd.f32 %v2732_v21, %v2253_v14  ;;  %v3391_v60 = vld [vmem:[%s3890_s10 + $0x38] sm:$0xff]  ;;  %v3392_v11 = vld [vmem:[%s3890_s10 + $0x28] sm:$0xff]  ;;  %s3648_s10 = smov [#allocation11]  }
 0x2c9   : > { %v2278_v4 = vmax.f32 %v2270_v38, 0.0  ;;  %s3531_s30 = sshll.u32 %s3648_s10, 4  ;;  %s3532_s30 = int_to_ptr.vmem [resolvable:$false] %s3531_s30 }
 0x2ca   : > { %v2254_v36 = vmul.f32 %v2731_v15, %v2239_v55  ;;  %3167 = vmatprep.mubr.bf16.mxu1 %v2280_v2  ;;  %v2271_v16 = vadd.f32 %v2732_v21, %v2256_v27  ;;  %v2276_v17 = vmax.f32 %v2268_v62, 0.0  ;;  %s3533_s16 = scalar_lea.vmem %s3532_s30, 2048  ;;  %p3534_p2 = scmp.lt.s32.totalorder %s4388_s14, %s3532_s30 }
 0x2cb   : > { %3168 = vmatmul.mubr.bf16.vlgmr.msra.gmra.mxu1 %v2281_v28  ;;  %p3535_p4 = scmp.lt.s32.totalorder %s3533_s16, %s3527_s8 }
 0x2cc   : > { %v2269_v22 = vadd.f32 %v2732_v21, %v2254_v36  ;;  %v2279_v47 = vmax.f32 %v2271_v16, 0.0 }
 0x2cd   : > { %p3536_p6 = por %p3535_p4, %p3534_p2 }
 0x2ce   : > { %v2277_v5 = vmax.f32 %v2269_v22, 0.0  ;;  %v2283_v61 = vpack.c.bf16 %v2279_v47, %v2278_v4 }
 0x2cf   : > { %p3537_p9 = pnand %p3536_p6, %p3530_p12 }
 0x2d0   : > { %v2282_v7 = vpack.c.bf16 %v2277_v5, %v2276_v17 }
 0x2d2   : > { %3171 = vmatprep.mubr.bf16.mxu1 %v2282_v7 }
 0x2d3   : > { %3172 = vmatmul.mubr.bf16.gmra.mxu1 %v2283_v61 }
 0x38b   : > { %v3169_v15 = vpop.f32.mrf.mxu1 }
 0x38c   : > { %v2422_v34 = vmul.f32 %v3169_v15, %v2741_v35 }
 0x38d   : > { %v2382_v29 = vpop.f32.mrf.mxu1 }
 0x38e   : > { %v2437_v42 = vadd.f32 %v2742_v12, %v2422_v34  ;;  %v2420_v52 = vmul.f32 %v2741_v35, %v2382_v29 }
 0x38f   : > { %v3170_v33 = vpop.f32.mrf.mxu1 }
 0x390   : > { %v2445_v43 = vadd.f32 %v3385_v44, %v2437_v42  ;;  %v2435_v46 = vadd.f32 %v2742_v12, %v2420_v52  ;;  %v2423_v39 = vmul.f32 %v3170_v33, %v2741_v35 }
 0x391   : > { %v2385_v50 = vpop.f32.mrf.mxu1 }
 0x392   : > { %v2453_v48 = vmax.f32 %v2445_v43, 0.0  ;;  %v2443_v0 = vadd.f32 %v3386_v25, %v2435_v46  ;;  %v2438_v23 = vadd.f32 %v2742_v12, %v2423_v39  ;;  %v2421_v21 = vmul.f32 %v2741_v35, %v2385_v50 }
 0x393   : > { %v3173_v26 = vpop.f32.mrf.mxu1 }
 0x394   : > { %2461 = vst [vmem:[%s4371_s27 + $0x10] sm:$0xff] %v2453_v48  ;;  %v2451_v32 = vmax.f32 %v2443_v0, 0.0  ;;  %v2446_v31 = vadd.f32 %v3387_v51, %v2438_v23  ;;  %v2436_v41 = vadd.f32 %v2742_v12, %v2421_v21  ;;  %v2426_v57 = vmul.f32 %v3173_v26, %v2741_v35 }
 0x395   : > { %v2398_v53 = vpop.f32.mrf.mxu1 }
 0x396   : > { %2459 = vst [vmem:[%s4371_s27] sm:$0xff] %v2451_v32  ;;  %v2454_v19 = vmax.f32 %v2446_v31, 0.0  ;;  %v2444_v37 = vadd.f32 %v3388_v1, %v2436_v41  ;;  %v2441_v63 = vadd.f32 %v2742_v12, %v2426_v57  ;;  %v2424_v56 = vmul.f32 %v2741_v35, %v2398_v53 }
 0x397   : > { %v3174_v54 = vpop.f32.mrf.mxu1 }
 0x398   : > { %2462 = vst [vmem:[%s4371_s27 + $0x18] sm:$0xff] %v2454_v19  ;;  %v2452_v40 = vmax.f32 %v2444_v37, 0.0  ;;  %v2449_v8 = vadd.f32 %v3389_v3, %v2441_v63  ;;  %v2439_v45 = vadd.f32 %v2742_v12, %v2424_v56  ;;  %v2427_v13 = vmul.f32 %v3174_v54, %v2741_v35 }
 0x399   : > { %v2401_v18 = vpop.f32.mrf.mxu1 }
 0x39a   : > { %2460 = vst [vmem:[%s4371_s27 + $0x8] sm:$0xff] %v2452_v40  ;;  %v2457_v10 = vmax.f32 %v2449_v8, 0.0  ;;  %v2447_v59 = vadd.f32 %v3390_v49, %v2439_v45  ;;  %v2442_v58 = vadd.f32 %v2742_v12, %v2427_v13  ;;  %v2425_v24 = vmul.f32 %v2741_v35, %v2401_v18 }
 0x39c   : > { %2465 = vst [vmem:[%s4371_s27 + $0x30] sm:$0xff] %v2457_v10  ;;  %v2455_v6 = vmax.f32 %v2447_v59, 0.0  ;;  %v2450_v14 = vadd.f32 %v3391_v60, %v2442_v58  ;;  %v2440_v20 = vadd.f32 %v2742_v12, %v2425_v24 }
 0x39e   : > { %2463 = vst [vmem:[%s4371_s27 + $0x20] sm:$0xff] %v2455_v6  ;;  %v2458_v30 = vmax.f32 %v2450_v14, 0.0  ;;  %v2448_v9 = vadd.f32 %v3392_v11, %v2440_v20 }
 0x3a0   : > { %2466 = vst [vmem:[%s4371_s27 + $0x38] sm:$0xff] %v2458_v30  ;;  %v2456_v55 = vmax.f32 %v2448_v9, 0.0 }
 0x3a2   : > { %2464 = vst [vmem:[%s4371_s27 + $0x28] sm:$0xff] %v2456_v55 }
 0x3a3   : > { %3540 = shalt.err (!%p3537_p9)
}
 0x3a4   : > { %s3541_s17 = scalar_lea.hbm %s4394_s15, 1024  ;;  %s3545_s21 = scalar_lea.hbm %s4534_s2, 8192 }
 0x3a5   : > { %p3542_p8 = scmp.ne.s32.totalorder %s4394_s15, %s3541_s17  ;;  %p3546_p13 = scmp.lt.s32.totalorder %s4394_s15, %s4534_s2 }
 0x3a6   : > { %p3547_p3 = scmp.lt.s32.totalorder %s3545_s21, %s3541_s17 }
 0x3a7   : > { %p3543_p1 = pnand %p3542_p8, %p3822_p0 }
 0x3a8   : > { %p3548_p10 = por %p3547_p3, %p3546_p13 }
 0x3a9   : > { %p3544_p11 = pneg %p3543_p1 }
 0x3ab   : > { %p3549_p5 = pnand %p3548_p10, %p3544_p11 }
 0x3ad   : > { %3552 = shalt.err (!%p3549_p5)
}
 0x3ae   : > { %s3649_s27 = smov 128   ;;  %s3650_s6 = smov 8  }
 0x3af   : > { %3191 = dma.vmem_to_hbm [thread:$0]  (%p3822_p0), %s4388_s14, 1024, %s4394_s15, %s2468_s28, %s3649_s27, %s3649_s27, %s3650_s6  }
 0x3b0 PF: > { %s4535_s19 = sld [smem:[#allocation17_spill]]  ;;  %p3221_p7 = scmp.ge.s32.totalorder %s3635_s24, 2 }
 0x3b1   : > { %s4536_s7 = sld [smem:[#allocation20_spill]] }
 0x3b6   : > { %s2498_s20 = sand.u32 1, %s4535_s19  }
 0x3b7   : > { %p4537_p12 = scmp.ne.s32.totalorder %s4536_s7, 0  ;;  %s2499_s11 = scalar_lea.sflag [#allocation4], %s2498_s20 }
 0x3b9   : > { %p3211_p2 = pnand %p3221_p7, %p4537_p12 }
 0x3bb   : > { %p3212_p4 = pneg %p3211_p2 }
 0x3bd   : > { %3602 = dma.done.wait (%p3212_p4), %s2499_s11, 1024  }
 0x3be   : > { %3604 = vsyncadd (%p3212_p4), %s2499_s11, 4294966272  ;;  %s31_s24 = sadd.s32 1, %s3635_s24   ;;  %s4538_s12 = sld [smem:[#allocation18_spill]] }
 0x3bf   : > { %p28_p6 = scmp.ge.s32.totalorder %s31_s24, 10   ;;  %s4539_s19 = sld [smem:[#allocation24_spill]] }
 0x3c0   : > { %s4540_s0 = sld [smem:[#allocation21_spill]]  ;;  %s4542_s17 = smov %s3611_s18 }
 0x3c1   : > { %s4541_s26 = sld [smem:[#allocation23_spill]]  ;;  %s4544_s20 = smov %s3627_s22 }
 0x3c2   : > { %s4545_s21 = smov %s3631_s23 }
 0x3c3   :  { %30 = sbr.rel (!%p28_p6) target bundleno = 20 (0x14), region = 142 }
 0x3c4   : > { %s4543_s18 = smov %s4538_s12 }
 0x3c6   : > { %s4546_s22 = smov %s4540_s0 }
 0x3c7   : > { %s4547_s23 = smov %s4541_s26 }
 0x3c8   :  { %2504 = vsyncpa [#allocation3], 1 }
 0x3c9   :  { %2506 = vsyncpa [#allocation3 + $0x1], 1 }
 0x3ca   :  { %2507 = vsyncpa [#allocation6], 1 }
 0x3cb   :  { %2509 = vsyncpa [#allocation6 + $0x1], 1 }
 0x3cc   :  { %2510 = vsyncpa [#allocation9], 1 }
 0x3cd   :  { %2511 = vsyncpa [#allocation4], 1 }
 0x3ce   :  { %2513 = vsyncpa [#allocation4 + $0x1], 1 }

</bundles_post_ra>
